<compile_context>
chip_gen: v6e
topology: v6e:2x2x1
jax: 0.10.0
libtpu: 0.0.40
codegen_flags: <defaults>
</compile_context>

<pallas_src>
import numpy as np
import jax
import jax.numpy as jnp
from jax.experimental import pallas as pl
from jax.experimental.pallas import tpu as pltpu

SUB = 8      # f32 sublanes per vreg
CHUNK = 128  # lanes per in-kernel stripe (one vreg wide)


# ----------------------------- small JAX helpers (glue) -----------------------------

def skew(a):
    x, y, z = a[..., 0], a[..., 1], a[..., 2]
    zero = jnp.zeros_like(x)
    return jnp.stack([
        jnp.stack([zero, -z, y], axis=-1),
        jnp.stack([z, zero, -x], axis=-1),
        jnp.stack([-y, x, zero], axis=-1),
    ], axis=-2)


def rpy2r(rpy):
    r, p, y = rpy[0], rpy[1], rpy[2]
    cr, sr = jnp.cos(r), jnp.sin(r)
    cp, sp = jnp.cos(p), jnp.sin(p)
    cy, sy = jnp.cos(y), jnp.sin(y)
    one = jnp.ones_like(r)
    zero = jnp.zeros_like(r)
    Rx = jnp.stack([jnp.stack([one, zero, zero]),
                    jnp.stack([zero, cr, -sr]),
                    jnp.stack([zero, sr, cr])])
    Ry = jnp.stack([jnp.stack([cp, zero, sp]),
                    jnp.stack([zero, one, zero]),
                    jnp.stack([-sp, zero, cp])])
    Rz = jnp.stack([jnp.stack([cy, -sy, zero]),
                    jnp.stack([sy, cy, zero]),
                    jnp.stack([zero, zero, one])])
    return Rz @ Ry @ Rx


def pr2t(p, rpy):
    R = rpy2r(rpy[0])
    T = jnp.eye(4, dtype=jnp.float32)
    T = T.at[:3, :3].set(R)
    T = T.at[:3, 3].set(p[0])
    return T


def _prep_joint_scalars(twist, eps=1e-8):
    """Pack per-joint, q-independent scalars into a (J, 25) SMEM table.

    Columns: w(0:3) v(3:6) n_eff(6) a(7:10) A2_sym(10:16) u(16:19) Au(19:22) A2u(22:25)
    a = w/||w|| (or 0), u = v/||w|| (or v), n_eff = ||w|| (or 1),
    A2_sym = unique entries (00,01,02,11,12,22) of skew(a)^2 (symmetric).
    """
    J = twist.shape[0]
    w = twist[:, 0:3]
    v = twist[:, 3:6]
    n = jnp.linalg.norm(w, axis=1)
    deg = (n < eps)
    inv_n = 1.0 / jnp.maximum(n, eps)
    a = jnp.where(deg[:, None], 0.0, w * inv_n[:, None])
    u = jnp.where(deg[:, None], v, v * inv_n[:, None])
    n_eff = jnp.where(deg, 1.0, n)
    A = skew(a)                                   # (J, 3, 3)
    A2 = jnp.einsum("jik,jkl->jil", A, A)
    Au = jnp.einsum("jik,jk->ji", A, u)
    A2u = jnp.einsum("jik,jk->ji", A2, u)
    A2_sym = jnp.stack([A2[:, 0, 0], A2[:, 0, 1], A2[:, 0, 2],
                        A2[:, 1, 1], A2[:, 1, 2], A2[:, 2, 2]], axis=1)
    pack = jnp.concatenate([w, v, n_eff[:, None], a, A2_sym, u, Au, A2u], axis=1)
    return pack.astype(jnp.float32)               # (J, 25)


def _round_up(x, m):
    return ((x + m - 1) // m) * m


def _ceil_div(a, b):
    return -(-a // b)


# --------------------------------- Pallas kernel ------------------------------------

def _poe_kernel(q_ref, scal_ref, tinit_ref, out_ref, twl_ref):
    # q_ref:     (J,    n_chunks, 8, 128)  VMEM  joint angles, batch packed per slab
    # scal_ref:  (J, 25)                   SMEM  per-joint twist-derived scalars
    # tinit_ref: (4, 4)                    SMEM  pr2t(init_p, init_rpy)
    # out_ref:   (12,   n_chunks, 8, 128)  VMEM  top 3 rows of chain transform
    # twl_ref:   (J*6,  n_chunks, 8, 128)  VMEM  body-frame twists
    J = scal_ref.shape[0]
    n_chunks, sub, chunk = q_ref.shape[1], q_ref.shape[2], q_ref.shape[3]

    # ---- SMEM scalar reads: once per grid step, hoisted out of the stripe loop ----
    jscal = []
    for j in range(J):
        w = [scal_ref[j, c] for c in range(0, 3)]
        v = [scal_ref[j, c] for c in range(3, 6)]
        n_eff = scal_ref[j, 6]
        a = [scal_ref[j, 7 + c] for c in range(3)]
        A2 = [scal_ref[j, 10 + c] for c in range(6)]      # (00, 01, 02, 11, 12, 22)
        u = [scal_ref[j, 16 + c] for c in range(3)]
        Au = [scal_ref[j, 19 + c] for c in range(3)]
        A2u = [scal_ref[j, 22 + c] for c in range(3)]
        jscal.append((w, v, n_eff, a, A2, u, Au, A2u))
    tin = [[tinit_ref[r, c] for c in range(4)] for r in range(3)]

    def make_S(j, theta, s, cth):
        # Top 3 rows of srodrigues(twist_j, q); exploits skew/A2-symmetry structure.
        _, _, _, a, A2, u, Au, A2u = jscal[j]
        omc = 1.0 - cth
        tms = theta - s
        sax, say, saz = s * a[0], s * a[1], s * a[2]
        o00, o01, o02 = omc * A2[0], omc * A2[1], omc * A2[2]
        o11, o12, o22 = omc * A2[3], omc * A2[4], omc * A2[5]
        S = [[None] * 4 for _ in range(3)]
        S[0][0] = 1.0 + o00
        S[1][1] = 1.0 + o11
        S[2][2] = 1.0 + o22
        S[0][1] = o01 - saz
        S[1][0] = o01 + saz
        S[0][2] = o02 + say
        S[2][0] = o02 - say
        S[1][2] = o12 - sax
        S[2][1] = o12 + sax
        for i in range(3):
            S[i][3] = theta * u[i] + omc * Au[i] + tms * A2u[i]
        return S

    # Stripe loop over 128-lane chunks: bounds live ranges while DMA tiles stay big.
    @pl.loop(0, n_chunks)
    def _(c):
        # Hoist EUP (sin/cos) work for the whole stripe so it overlaps VALU work.
        theta0 = None
        sin_l, cos_l = [], []
        for j in range(J):
            theta = jscal[j][2] * q_ref[j, c]              # (8, 128)
            if j == 0:
                theta0 = theta
            sin_l.append(jnp.sin(theta))
            cos_l.append(jnp.cos(theta))

        out = None                                          # top 3 rows of running chain
        for j in range(J):                                  # static unroll over the chain
            w, v, n_eff, _, _, _, _, _ = jscal[j]

            if out is None:
                # Chain is the identity: Twistls[:, 0, :] = twist_0; out = S_0.
                for i in range(3):
                    twl_ref[j * 6 + i, c] = jnp.broadcast_to(w[i], (sub, chunk))
                    twl_ref[j * 6 + 3 + i, c] = jnp.broadcast_to(v[i], (sub, chunk))
                out = make_S(j, theta0, sin_l[j], cos_l[j])
                continue

            # ---- Twistls[:, j, :] = inv_x(t2x(out)) @ twist = Ad_{out^{-1}} [w; v] ----
            p = [out[i][3] for i in range(3)]
            cxp = p[1] * w[2] - p[2] * w[1]                 # p x w
            cyp = p[2] * w[0] - p[0] * w[2]
            czp = p[0] * w[1] - p[1] * w[0]
            vm = [v[0] - cxp, v[1] - cyp, v[2] - czp]
            for i in range(3):
                wp = out[0][i] * w[0] + out[1][i] * w[1] + out[2][i] * w[2]      # (R^T w)_i
                vp = out[0][i] * vm[0] + out[1][i] * vm[1] + out[2][i] * vm[2]   # (R^T (v-pxw))_i
                twl_ref[j * 6 + i, c] = wp
                twl_ref[j * 6 + 3 + i, c] = vp

            # ---- out = out @ srodrigues(twist_j, q_j); bottom rows are [0,0,0,1] ----
            theta = n_eff * q_ref[j, c]                     # cheap recompute (1 vld + 1 vmul)
            S = make_S(j, theta, sin_l[j], cos_l[j])
            new = [[None] * 4 for _ in range(3)]
            for i in range(3):
                for k in range(3):
                    new[i][k] = (out[i][0] * S[0][k] + out[i][1] * S[1][k]
                                 + out[i][2] * S[2][k])
                new[i][3] = (out[i][0] * S[0][3] + out[i][1] * S[1][3]
                             + out[i][2] * S[2][3] + out[i][3])
            out = new

        if out is None:                                     # degenerate J == 0 safeguard
            one = jnp.ones((sub, chunk), jnp.float32)
            zero = jnp.zeros((sub, chunk), jnp.float32)
            out = [[one if i == k else zero for k in range(4)] for i in range(3)]

        # ---- out = out @ pr2t(init_p, init_rpy); only the 12 non-constant rows stored ----
        for i in range(3):
            for k in range(3):
                out_ref[i * 4 + k, c] = (out[i][0] * tin[0][k] + out[i][1] * tin[1][k]
                                         + out[i][2] * tin[2][k])
            out_ref[i * 4 + 3, c] = (out[i][0] * tin[0][3] + out[i][1] * tin[1][3]
                                     + out[i][2] * tin[2][3] + out[i][3])


# ----------------------------------- wrappers ----------------------------------------

def poe_forward_packed(q_value, twist, init_p, init_rpy, lane_tile=1024):
    """POELayer forward; returns packed batch-last slabs (the fast public output).

    Returns:
      out_packed: (12, B_pad) float32   rows = row-major top 3x4 of the final transform
      twl_packed: (J*6, B_pad) float32  rows = row-major (joint, 6) body-frame twists
    Batch element b lives at column b; columns >= B are padding.  Bottom row of
    the transform is the constant [0,0,0,1] and is intentionally not emitted.
    """
    q_value = jnp.asarray(q_value, jnp.float32)
    B, J = q_value.shape

    lane_tile = max(CHUNK, min(_round_up(int(lane_tile), CHUNK), 2048))
    lanes_for_b = _round_up(max(1, _ceil_div(B, SUB)), CHUNK)
    lb = min(lane_tile, lanes_for_b)
    # Prefer >= 2 grid steps so both TensorCores get work on dual-core chips (v7x).
    if _ceil_div(B, SUB * lb) < 2 and lb > CHUNK:
        lb = max(CHUNK, _round_up(_ceil_div(_ceil_div(B, 2), SUB), CHUNK))
    n_chunks = lb // CHUNK
    tile = SUB * lb
    n_tiles = max(1, _ceil_div(B, tile))
    b_pad = n_tiles * tile

    # Input relayout (tiny: J*B floats): (B, J) -> (J, B_pad) -> packed slabs.
    q_t = q_value.T
    if b_pad != B:
        q_t = jnp.pad(q_t, ((0, 0), (0, b_pad - B)))
    q_blk = q_t.reshape(J, n_tiles * n_chunks, SUB, CHUNK)

    scal = _prep_joint_scalars(twist)                       # (J, 25)  parameter glue
    tinit = pr2t(init_p, init_rpy).astype(jnp.float32)      # (4, 4)   parameter glue

    flops = (140 * J + 65) * b_pad
    transcendentals = 2 * J * b_pad
    bytes_accessed = 4 * (7 * J + 12) * b_pad

    out_blk, twl_blk = pl.pallas_call(
        _poe_kernel,
        out_shape=(
            jax.ShapeDtypeStruct((12, n_tiles * n_chunks, SUB, CHUNK), jnp.float32),
            jax.ShapeDtypeStruct((J * 6, n_tiles * n_chunks, SUB, CHUNK), jnp.float32),
        ),
        grid_spec=pltpu.PrefetchScalarGridSpec(
            num_scalar_prefetch=0,
            grid=(n_tiles,),
            in_specs=[
                pl.BlockSpec((J, n_chunks, SUB, CHUNK), lambda t: (0, t, 0, 0)),
                pl.BlockSpec(memory_space=pltpu.MemorySpace.SMEM),   # twist scalars
                pl.BlockSpec(memory_space=pltpu.MemorySpace.SMEM),   # init transform
            ],
            out_specs=[
                pl.BlockSpec((12, n_chunks, SUB, CHUNK), lambda t: (0, t, 0, 0)),
                pl.BlockSpec((J * 6, n_chunks, SUB, CHUNK), lambda t: (0, t, 0, 0)),
            ],
        ),
        compiler_params=pltpu.CompilerParams(
            dimension_semantics=("parallel",)),              # pipelined + megacore-shardable
        cost_estimate=pl.CostEstimate(
            flops=flops, transcendentals=transcendentals,
            bytes_accessed=bytes_accessed),
    )(q_blk, scal, tinit)

    return out_blk.reshape(12, b_pad), twl_blk.reshape(J * 6, b_pad)


def unpack_poe_outputs(out_packed, twl_packed, batch, n_joint):
    """Consumer-side layout glue reproducing PyTorch's (B,4,4)/(B,n_joint,6).

    This re-reads the outputs; performance-sensitive consumers should use the
    packed slabs from poe_forward_packed directly.
    """
    out_top = out_packed[:, :batch].reshape(3, 4, batch).transpose(2, 0, 1)
    bottom = jnp.broadcast_to(jnp.array([0.0, 0.0, 0.0, 1.0], jnp.float32),
                              (batch, 1, 4))
    out = jnp.concatenate([out_top, bottom], axis=1)
    twl = twl_packed[:, :batch].reshape(n_joint, 6, batch).transpose(2, 0, 1)
    return out, twl


def poe_forward(q_value, twist, init_p, init_rpy, lane_tile=1024):
    """Module-compatible wrapper: (B,4,4) transform and (B,n_joint,6) Twistls."""
    B, J = q_value.shape
    out_p, twl_p = poe_forward_packed(q_value, twist, init_p, init_rpy, lane_tile)
    return unpack_poe_outputs(out_p, twl_p, B, J)


# --------------------------- pure-JAX reference (for checking) ----------------------

def _srodrigues_ref(twist, q, eps=1e-8):
    w, v = twist[:3], twist[3:]
    n = jnp.linalg.norm(w)
    deg = n < eps
    n_eff = jnp.where(deg, 1.0, n)
    a = jnp.where(deg, jnp.zeros(3, jnp.float32), w / n_eff)
    u = jnp.where(deg, v, v / n_eff)
    A = skew(a)
    A2 = A @ A
    theta = n_eff * q                                          # (B,)
    s = jnp.sin(theta)
    c = jnp.cos(theta)
    I = jnp.eye(3, dtype=jnp.float32)
    R = I[None] + s[:, None, None] * A[None] + (1 - c)[:, None, None] * A2[None]
    p = (theta[:, None] * u[None]
         + (1 - c)[:, None] * (A @ u)[None]
         + (theta - s)[:, None] * (A2 @ u)[None])
    bottom = jnp.broadcast_to(jnp.array([0., 0., 0., 1.], jnp.float32),
                              (q.shape[0], 1, 4))
    return jnp.concatenate([jnp.concatenate([R, p[:, :, None]], axis=2), bottom], axis=1)


def _adjinv_apply_ref(T, twist):
    R = T[:, :3, :3]
    p = T[:, :3, 3]
    w, v = twist[:3], twist[3:]
    pxw = jnp.cross(p, jnp.broadcast_to(w, p.shape))
    wp = jnp.einsum("bji,j->bi", R, w)                         # R^T w
    vp = jnp.einsum("bji,bj->bi", R, v - pxw)                  # R^T (v - p x w)
    return jnp.concatenate([wp, vp], axis=1)


def poe_reference(q_value, twist, init_p, init_rpy):
    B, J = q_value.shape
    out = jnp.tile(jnp.eye(4, dtype=jnp.float32), (B, 1, 1))
    tw = []
    for j in range(J):
        tw.append(_adjinv_apply_ref(out, twist[j]))
        out = out @ _srodrigues_ref(twist[j], q_value[:, j])
    out = out @ pr2t(init_p, init_rpy)
    return out, jnp.stack(tw, axis=1)


# -------------------------------------- main -----------------------------------------

if __name__ == "__main__":
    key = jax.random.PRNGKey(0)
    k1, k2, k3, k4 = jax.random.split(key, 4)
    n_joint = 6
    batch = 8

    # Deterministic "uniform(-1, 1)" parameters (as in POELayer.__init__).
    twist = jax.random.uniform(k1, (n_joint, 6), jnp.float32, -1.0, 1.0)
    init_p = jax.random.uniform(k2, (1, 3), jnp.float32, -1.0, 1.0)
    init_rpy = jax.random.uniform(k3, (1, 3), jnp.float32, -1.0, 1.0)
    q_value = jax.random.uniform(k4, (batch, n_joint), jnp.float32,
                                 -jnp.pi, jnp.pi)

    out, twistls = jax.block_until_ready(
        poe_forward(q_value, twist, init_p, init_rpy))
    out_ref, twl_ref = poe_reference(q_value, twist, init_p, init_rpy)
    np.testing.assert_allclose(np.asarray(out), np.asarray(out_ref),
                               rtol=1e-4, atol=1e-4)
    np.testing.assert_allclose(np.asarray(twistls), np.asarray(twl_ref),
                               rtol=1e-4, atol=1e-4)

    # Second check exercising multi-tile + multi-stripe paths and batch padding.
    batch2 = 2100
    q2 = jax.random.uniform(jax.random.PRNGKey(1), (batch2, n_joint),
                            jnp.float32, -jnp.pi, jnp.pi)
    out2, twl2 = jax.block_until_ready(
        poe_forward(q2, twist, init_p, init_rpy, lane_tile=256))
    out2_ref, twl2_ref = poe_reference(q2, twist, init_p, init_rpy)
    np.testing.assert_allclose(np.asarray(out2), np.asarray(out2_ref),
                               rtol=1e-4, atol=1e-4)
    np.testing.assert_allclose(np.asarray(twl2), np.asarray(twl2_ref),
                               rtol=1e-4, atol=1e-4)

    print("KERNEL_OK")
</pallas_src>

<mosaic_0001>
module attributes {stable_mosaic.version = 11 : i64} {
  func.func @_poe_kernel(%arg0: i32, %arg1: memref<6x1x8x128xf32, #tpu.memory_space<vmem>>, %arg2: memref<6x25xf32, #tpu.memory_space<smem>>, %arg3: memref<4x4xf32, #tpu.memory_space<smem>>, %arg4: memref<12x1x8x128xf32, #tpu.memory_space<vmem>>, %arg5: memref<36x1x8x128xf32, #tpu.memory_space<vmem>>) attributes {dimension_semantics = [#tpu.dimension_semantics<parallel>], iteration_bounds = array<i64: 1>, scalar_prefetch = 0 : i64, scratch_operands = 0 : i64, tpu.core_type = #tpu.core_type<tc>, window_params = [{transform_indices = @transform_0, window_bounds = array<i64: 6, 1, 8, 128>}, {transform_indices = @transform_1, window_bounds = array<i64: 6, 25>}, {transform_indices = @transform_2, window_bounds = array<i64: 4, 4>}, {transform_indices = @transform_3, window_bounds = array<i64: 12, 1, 8, 128>}, {transform_indices = @transform_4, window_bounds = array<i64: 36, 1, 8, 128>}]} {
    %c0 = arith.constant 0 : index
    %c0_0 = arith.constant 0 : index
    %0 = memref.load %arg2[%c0, %c0_0] : memref<6x25xf32, #tpu.memory_space<smem>>
    %c0_1 = arith.constant 0 : index
    %c1 = arith.constant 1 : index
    %1 = memref.load %arg2[%c0_1, %c1] : memref<6x25xf32, #tpu.memory_space<smem>>
    %c0_2 = arith.constant 0 : index
    %c2 = arith.constant 2 : index
    %2 = memref.load %arg2[%c0_2, %c2] : memref<6x25xf32, #tpu.memory_space<smem>>
    %c0_3 = arith.constant 0 : index
    %c3 = arith.constant 3 : index
    %3 = memref.load %arg2[%c0_3, %c3] : memref<6x25xf32, #tpu.memory_space<smem>>
    %c0_4 = arith.constant 0 : index
    %c4 = arith.constant 4 : index
    %4 = memref.load %arg2[%c0_4, %c4] : memref<6x25xf32, #tpu.memory_space<smem>>
    %c0_5 = arith.constant 0 : index
    %c5 = arith.constant 5 : index
    %5 = memref.load %arg2[%c0_5, %c5] : memref<6x25xf32, #tpu.memory_space<smem>>
    %c0_6 = arith.constant 0 : index
    %c6 = arith.constant 6 : index
    %6 = memref.load %arg2[%c0_6, %c6] : memref<6x25xf32, #tpu.memory_space<smem>>
    %c0_7 = arith.constant 0 : index
    %c7 = arith.constant 7 : index
    %7 = memref.load %arg2[%c0_7, %c7] : memref<6x25xf32, #tpu.memory_space<smem>>
    %c0_8 = arith.constant 0 : index
    %c8 = arith.constant 8 : index
    %8 = memref.load %arg2[%c0_8, %c8] : memref<6x25xf32, #tpu.memory_space<smem>>
    %c0_9 = arith.constant 0 : index
    %c9 = arith.constant 9 : index
    %9 = memref.load %arg2[%c0_9, %c9] : memref<6x25xf32, #tpu.memory_space<smem>>
    %c0_10 = arith.constant 0 : index
    %c10 = arith.constant 10 : index
    %10 = memref.load %arg2[%c0_10, %c10] : memref<6x25xf32, #tpu.memory_space<smem>>
    %c0_11 = arith.constant 0 : index
    %c11 = arith.constant 11 : index
    %11 = memref.load %arg2[%c0_11, %c11] : memref<6x25xf32, #tpu.memory_space<smem>>
    %c0_12 = arith.constant 0 : index
    %c12 = arith.constant 12 : index
    %12 = memref.load %arg2[%c0_12, %c12] : memref<6x25xf32, #tpu.memory_space<smem>>
    %c0_13 = arith.constant 0 : index
    %c13 = arith.constant 13 : index
    %13 = memref.load %arg2[%c0_13, %c13] : memref<6x25xf32, #tpu.memory_space<smem>>
    %c0_14 = arith.constant 0 : index
    %c14 = arith.constant 14 : index
    %14 = memref.load %arg2[%c0_14, %c14] : memref<6x25xf32, #tpu.memory_space<smem>>
    %c0_15 = arith.constant 0 : index
    %c15 = arith.constant 15 : index
    %15 = memref.load %arg2[%c0_15, %c15] : memref<6x25xf32, #tpu.memory_space<smem>>
    %c0_16 = arith.constant 0 : index
    %c16 = arith.constant 16 : index
    %16 = memref.load %arg2[%c0_16, %c16] : memref<6x25xf32, #tpu.memory_space<smem>>
    %c0_17 = arith.constant 0 : index
    %c17 = arith.constant 17 : index
    %17 = memref.load %arg2[%c0_17, %c17] : memref<6x25xf32, #tpu.memory_space<smem>>
    %c0_18 = arith.constant 0 : index
    %c18 = arith.constant 18 : index
    %18 = memref.load %arg2[%c0_18, %c18] : memref<6x25xf32, #tpu.memory_space<smem>>
    %c0_19 = arith.constant 0 : index
    %c19 = arith.constant 19 : index
    %19 = memref.load %arg2[%c0_19, %c19] : memref<6x25xf32, #tpu.memory_space<smem>>
    %c0_20 = arith.constant 0 : index
    %c20 = arith.constant 20 : index
    %20 = memref.load %arg2[%c0_20, %c20] : memref<6x25xf32, #tpu.memory_space<smem>>
    %c0_21 = arith.constant 0 : index
    %c21 = arith.constant 21 : index
    %21 = memref.load %arg2[%c0_21, %c21] : memref<6x25xf32, #tpu.memory_space<smem>>
    %c0_22 = arith.constant 0 : index
    %c22 = arith.constant 22 : index
    %22 = memref.load %arg2[%c0_22, %c22] : memref<6x25xf32, #tpu.memory_space<smem>>
    %c0_23 = arith.constant 0 : index
    %c23 = arith.constant 23 : index
    %23 = memref.load %arg2[%c0_23, %c23] : memref<6x25xf32, #tpu.memory_space<smem>>
    %c0_24 = arith.constant 0 : index
    %c24 = arith.constant 24 : index
    %24 = memref.load %arg2[%c0_24, %c24] : memref<6x25xf32, #tpu.memory_space<smem>>
    %c1_25 = arith.constant 1 : index
    %c0_26 = arith.constant 0 : index
    %25 = memref.load %arg2[%c1_25, %c0_26] : memref<6x25xf32, #tpu.memory_space<smem>>
    %c1_27 = arith.constant 1 : index
    %c1_28 = arith.constant 1 : index
    %26 = memref.load %arg2[%c1_27, %c1_28] : memref<6x25xf32, #tpu.memory_space<smem>>
    %c1_29 = arith.constant 1 : index
    %c2_30 = arith.constant 2 : index
    %27 = memref.load %arg2[%c1_29, %c2_30] : memref<6x25xf32, #tpu.memory_space<smem>>
    %c1_31 = arith.constant 1 : index
    %c3_32 = arith.constant 3 : index
    %28 = memref.load %arg2[%c1_31, %c3_32] : memref<6x25xf32, #tpu.memory_space<smem>>
    %c1_33 = arith.constant 1 : index
    %c4_34 = arith.constant 4 : index
    %29 = memref.load %arg2[%c1_33, %c4_34] : memref<6x25xf32, #tpu.memory_space<smem>>
    %c1_35 = arith.constant 1 : index
    %c5_36 = arith.constant 5 : index
    %30 = memref.load %arg2[%c1_35, %c5_36] : memref<6x25xf32, #tpu.memory_space<smem>>
    %c1_37 = arith.constant 1 : index
    %c6_38 = arith.constant 6 : index
    %31 = memref.load %arg2[%c1_37, %c6_38] : memref<6x25xf32, #tpu.memory_space<smem>>
    %c1_39 = arith.constant 1 : index
    %c7_40 = arith.constant 7 : index
    %32 = memref.load %arg2[%c1_39, %c7_40] : memref<6x25xf32, #tpu.memory_space<smem>>
    %c1_41 = arith.constant 1 : index
    %c8_42 = arith.constant 8 : index
    %33 = memref.load %arg2[%c1_41, %c8_42] : memref<6x25xf32, #tpu.memory_space<smem>>
    %c1_43 = arith.constant 1 : index
    %c9_44 = arith.constant 9 : index
    %34 = memref.load %arg2[%c1_43, %c9_44] : memref<6x25xf32, #tpu.memory_space<smem>>
    %c1_45 = arith.constant 1 : index
    %c10_46 = arith.constant 10 : index
    %35 = memref.load %arg2[%c1_45, %c10_46] : memref<6x25xf32, #tpu.memory_space<smem>>
    %c1_47 = arith.constant 1 : index
    %c11_48 = arith.constant 11 : index
    %36 = memref.load %arg2[%c1_47, %c11_48] : memref<6x25xf32, #tpu.memory_space<smem>>
    %c1_49 = arith.constant 1 : index
    %c12_50 = arith.constant 12 : index
    %37 = memref.load %arg2[%c1_49, %c12_50] : memref<6x25xf32, #tpu.memory_space<smem>>
    %c1_51 = arith.constant 1 : index
    %c13_52 = arith.constant 13 : index
    %38 = memref.load %arg2[%c1_51, %c13_52] : memref<6x25xf32, #tpu.memory_space<smem>>
    %c1_53 = arith.constant 1 : index
    %c14_54 = arith.constant 14 : index
    %39 = memref.load %arg2[%c1_53, %c14_54] : memref<6x25xf32, #tpu.memory_space<smem>>
    %c1_55 = arith.constant 1 : index
    %c15_56 = arith.constant 15 : index
    %40 = memref.load %arg2[%c1_55, %c15_56] : memref<6x25xf32, #tpu.memory_space<smem>>
    %c1_57 = arith.constant 1 : index
    %c16_58 = arith.constant 16 : index
    %41 = memref.load %arg2[%c1_57, %c16_58] : memref<6x25xf32, #tpu.memory_space<smem>>
    %c1_59 = arith.constant 1 : index
    %c17_60 = arith.constant 17 : index
    %42 = memref.load %arg2[%c1_59, %c17_60] : memref<6x25xf32, #tpu.memory_space<smem>>
    %c1_61 = arith.constant 1 : index
    %c18_62 = arith.constant 18 : index
    %43 = memref.load %arg2[%c1_61, %c18_62] : memref<6x25xf32, #tpu.memory_space<smem>>
    %c1_63 = arith.constant 1 : index
    %c19_64 = arith.constant 19 : index
    %44 = memref.load %arg2[%c1_63, %c19_64] : memref<6x25xf32, #tpu.memory_space<smem>>
    %c1_65 = arith.constant 1 : index
    %c20_66 = arith.constant 20 : index
    %45 = memref.load %arg2[%c1_65, %c20_66] : memref<6x25xf32, #tpu.memory_space<smem>>
    %c1_67 = arith.constant 1 : index
    %c21_68 = arith.constant 21 : index
    %46 = memref.load %arg2[%c1_67, %c21_68] : memref<6x25xf32, #tpu.memory_space<smem>>
    %c1_69 = arith.constant 1 : index
    %c22_70 = arith.constant 22 : index
    %47 = memref.load %arg2[%c1_69, %c22_70] : memref<6x25xf32, #tpu.memory_space<smem>>
    %c1_71 = arith.constant 1 : index
    %c23_72 = arith.constant 23 : index
    %48 = memref.load %arg2[%c1_71, %c23_72] : memref<6x25xf32, #tpu.memory_space<smem>>
    %c1_73 = arith.constant 1 : index
    %c24_74 = arith.constant 24 : index
    %49 = memref.load %arg2[%c1_73, %c24_74] : memref<6x25xf32, #tpu.memory_space<smem>>
    %c2_75 = arith.constant 2 : index
    %c0_76 = arith.constant 0 : index
    %50 = memref.load %arg2[%c2_75, %c0_76] : memref<6x25xf32, #tpu.memory_space<smem>>
    %c2_77 = arith.constant 2 : index
    %c1_78 = arith.constant 1 : index
    %51 = memref.load %arg2[%c2_77, %c1_78] : memref<6x25xf32, #tpu.memory_space<smem>>
    %c2_79 = arith.constant 2 : index
    %c2_80 = arith.constant 2 : index
    %52 = memref.load %arg2[%c2_79, %c2_80] : memref<6x25xf32, #tpu.memory_space<smem>>
    %c2_81 = arith.constant 2 : index
    %c3_82 = arith.constant 3 : index
    %53 = memref.load %arg2[%c2_81, %c3_82] : memref<6x25xf32, #tpu.memory_space<smem>>
    %c2_83 = arith.constant 2 : index
    %c4_84 = arith.constant 4 : index
    %54 = memref.load %arg2[%c2_83, %c4_84] : memref<6x25xf32, #tpu.memory_space<smem>>
    %c2_85 = arith.constant 2 : index
    %c5_86 = arith.constant 5 : index
    %55 = memref.load %arg2[%c2_85, %c5_86] : memref<6x25xf32, #tpu.memory_space<smem>>
    %c2_87 = arith.constant 2 : index
    %c6_88 = arith.constant 6 : index
    %56 = memref.load %arg2[%c2_87, %c6_88] : memref<6x25xf32, #tpu.memory_space<smem>>
    %c2_89 = arith.constant 2 : index
    %c7_90 = arith.constant 7 : index
    %57 = memref.load %arg2[%c2_89, %c7_90] : memref<6x25xf32, #tpu.memory_space<smem>>
    %c2_91 = arith.constant 2 : index
    %c8_92 = arith.constant 8 : index
    %58 = memref.load %arg2[%c2_91, %c8_92] : memref<6x25xf32, #tpu.memory_space<smem>>
    %c2_93 = arith.constant 2 : index
    %c9_94 = arith.constant 9 : index
    %59 = memref.load %arg2[%c2_93, %c9_94] : memref<6x25xf32, #tpu.memory_space<smem>>
    %c2_95 = arith.constant 2 : index
    %c10_96 = arith.constant 10 : index
    %60 = memref.load %arg2[%c2_95, %c10_96] : memref<6x25xf32, #tpu.memory_space<smem>>
    %c2_97 = arith.constant 2 : index
    %c11_98 = arith.constant 11 : index
    %61 = memref.load %arg2[%c2_97, %c11_98] : memref<6x25xf32, #tpu.memory_space<smem>>
    %c2_99 = arith.constant 2 : index
    %c12_100 = arith.constant 12 : index
    %62 = memref.load %arg2[%c2_99, %c12_100] : memref<6x25xf32, #tpu.memory_space<smem>>
    %c2_101 = arith.constant 2 : index
    %c13_102 = arith.constant 13 : index
    %63 = memref.load %arg2[%c2_101, %c13_102] : memref<6x25xf32, #tpu.memory_space<smem>>
    %c2_103 = arith.constant 2 : index
    %c14_104 = arith.constant 14 : index
    %64 = memref.load %arg2[%c2_103, %c14_104] : memref<6x25xf32, #tpu.memory_space<smem>>
    %c2_105 = arith.constant 2 : index
    %c15_106 = arith.constant 15 : index
    %65 = memref.load %arg2[%c2_105, %c15_106] : memref<6x25xf32, #tpu.memory_space<smem>>
    %c2_107 = arith.constant 2 : index
    %c16_108 = arith.constant 16 : index
    %66 = memref.load %arg2[%c2_107, %c16_108] : memref<6x25xf32, #tpu.memory_space<smem>>
    %c2_109 = arith.constant 2 : index
    %c17_110 = arith.constant 17 : index
    %67 = memref.load %arg2[%c2_109, %c17_110] : memref<6x25xf32, #tpu.memory_space<smem>>
    %c2_111 = arith.constant 2 : index
    %c18_112 = arith.constant 18 : index
    %68 = memref.load %arg2[%c2_111, %c18_112] : memref<6x25xf32, #tpu.memory_space<smem>>
    %c2_113 = arith.constant 2 : index
    %c19_114 = arith.constant 19 : index
    %69 = memref.load %arg2[%c2_113, %c19_114] : memref<6x25xf32, #tpu.memory_space<smem>>
    %c2_115 = arith.constant 2 : index
    %c20_116 = arith.constant 20 : index
    %70 = memref.load %arg2[%c2_115, %c20_116] : memref<6x25xf32, #tpu.memory_space<smem>>
    %c2_117 = arith.constant 2 : index
    %c21_118 = arith.constant 21 : index
    %71 = memref.load %arg2[%c2_117, %c21_118] : memref<6x25xf32, #tpu.memory_space<smem>>
    %c2_119 = arith.constant 2 : index
    %c22_120 = arith.constant 22 : index
    %72 = memref.load %arg2[%c2_119, %c22_120] : memref<6x25xf32, #tpu.memory_space<smem>>
    %c2_121 = arith.constant 2 : index
    %c23_122 = arith.constant 23 : index
    %73 = memref.load %arg2[%c2_121, %c23_122] : memref<6x25xf32, #tpu.memory_space<smem>>
    %c2_123 = arith.constant 2 : index
    %c24_124 = arith.constant 24 : index
    %74 = memref.load %arg2[%c2_123, %c24_124] : memref<6x25xf32, #tpu.memory_space<smem>>
    %c3_125 = arith.constant 3 : index
    %c0_126 = arith.constant 0 : index
    %75 = memref.load %arg2[%c3_125, %c0_126] : memref<6x25xf32, #tpu.memory_space<smem>>
    %c3_127 = arith.constant 3 : index
    %c1_128 = arith.constant 1 : index
    %76 = memref.load %arg2[%c3_127, %c1_128] : memref<6x25xf32, #tpu.memory_space<smem>>
    %c3_129 = arith.constant 3 : index
    %c2_130 = arith.constant 2 : index
    %77 = memref.load %arg2[%c3_129, %c2_130] : memref<6x25xf32, #tpu.memory_space<smem>>
    %c3_131 = arith.constant 3 : index
    %c3_132 = arith.constant 3 : index
    %78 = memref.load %arg2[%c3_131, %c3_132] : memref<6x25xf32, #tpu.memory_space<smem>>
    %c3_133 = arith.constant 3 : index
    %c4_134 = arith.constant 4 : index
    %79 = memref.load %arg2[%c3_133, %c4_134] : memref<6x25xf32, #tpu.memory_space<smem>>
    %c3_135 = arith.constant 3 : index
    %c5_136 = arith.constant 5 : index
    %80 = memref.load %arg2[%c3_135, %c5_136] : memref<6x25xf32, #tpu.memory_space<smem>>
    %c3_137 = arith.constant 3 : index
    %c6_138 = arith.constant 6 : index
    %81 = memref.load %arg2[%c3_137, %c6_138] : memref<6x25xf32, #tpu.memory_space<smem>>
    %c3_139 = arith.constant 3 : index
    %c7_140 = arith.constant 7 : index
    %82 = memref.load %arg2[%c3_139, %c7_140] : memref<6x25xf32, #tpu.memory_space<smem>>
    %c3_141 = arith.constant 3 : index
    %c8_142 = arith.constant 8 : index
    %83 = memref.load %arg2[%c3_141, %c8_142] : memref<6x25xf32, #tpu.memory_space<smem>>
    %c3_143 = arith.constant 3 : index
    %c9_144 = arith.constant 9 : index
    %84 = memref.load %arg2[%c3_143, %c9_144] : memref<6x25xf32, #tpu.memory_space<smem>>
    %c3_145 = arith.constant 3 : index
    %c10_146 = arith.constant 10 : index
    %85 = memref.load %arg2[%c3_145, %c10_146] : memref<6x25xf32, #tpu.memory_space<smem>>
    %c3_147 = arith.constant 3 : index
    %c11_148 = arith.constant 11 : index
    %86 = memref.load %arg2[%c3_147, %c11_148] : memref<6x25xf32, #tpu.memory_space<smem>>
    %c3_149 = arith.constant 3 : index
    %c12_150 = arith.constant 12 : index
    %87 = memref.load %arg2[%c3_149, %c12_150] : memref<6x25xf32, #tpu.memory_space<smem>>
    %c3_151 = arith.constant 3 : index
    %c13_152 = arith.constant 13 : index
    %88 = memref.load %arg2[%c3_151, %c13_152] : memref<6x25xf32, #tpu.memory_space<smem>>
    %c3_153 = arith.constant 3 : index
    %c14_154 = arith.constant 14 : index
    %89 = memref.load %arg2[%c3_153, %c14_154] : memref<6x25xf32, #tpu.memory_space<smem>>
    %c3_155 = arith.constant 3 : index
    %c15_156 = arith.constant 15 : index
    %90 = memref.load %arg2[%c3_155, %c15_156] : memref<6x25xf32, #tpu.memory_space<smem>>
    %c3_157 = arith.constant 3 : index
    %c16_158 = arith.constant 16 : index
    %91 = memref.load %arg2[%c3_157, %c16_158] : memref<6x25xf32, #tpu.memory_space<smem>>
    %c3_159 = arith.constant 3 : index
    %c17_160 = arith.constant 17 : index
    %92 = memref.load %arg2[%c3_159, %c17_160] : memref<6x25xf32, #tpu.memory_space<smem>>
    %c3_161 = arith.constant 3 : index
    %c18_162 = arith.constant 18 : index
    %93 = memref.load %arg2[%c3_161, %c18_162] : memref<6x25xf32, #tpu.memory_space<smem>>
    %c3_163 = arith.constant 3 : index
    %c19_164 = arith.constant 19 : index
    %94 = memref.load %arg2[%c3_163, %c19_164] : memref<6x25xf32, #tpu.memory_space<smem>>
    %c3_165 = arith.constant 3 : index
    %c20_166 = arith.constant 20 : index
    %95 = memref.load %arg2[%c3_165, %c20_166] : memref<6x25xf32, #tpu.memory_space<smem>>
    %c3_167 = arith.constant 3 : index
    %c21_168 = arith.constant 21 : index
    %96 = memref.load %arg2[%c3_167, %c21_168] : memref<6x25xf32, #tpu.memory_space<smem>>
    %c3_169 = arith.constant 3 : index
    %c22_170 = arith.constant 22 : index
    %97 = memref.load %arg2[%c3_169, %c22_170] : memref<6x25xf32, #tpu.memory_space<smem>>
    %c3_171 = arith.constant 3 : index
    %c23_172 = arith.constant 23 : index
    %98 = memref.load %arg2[%c3_171, %c23_172] : memref<6x25xf32, #tpu.memory_space<smem>>
    %c3_173 = arith.constant 3 : index
    %c24_174 = arith.constant 24 : index
    %99 = memref.load %arg2[%c3_173, %c24_174] : memref<6x25xf32, #tpu.memory_space<smem>>
    %c4_175 = arith.constant 4 : index
    %c0_176 = arith.constant 0 : index
    %100 = memref.load %arg2[%c4_175, %c0_176] : memref<6x25xf32, #tpu.memory_space<smem>>
    %c4_177 = arith.constant 4 : index
    %c1_178 = arith.constant 1 : index
    %101 = memref.load %arg2[%c4_177, %c1_178] : memref<6x25xf32, #tpu.memory_space<smem>>
    %c4_179 = arith.constant 4 : index
    %c2_180 = arith.constant 2 : index
    %102 = memref.load %arg2[%c4_179, %c2_180] : memref<6x25xf32, #tpu.memory_space<smem>>
    %c4_181 = arith.constant 4 : index
    %c3_182 = arith.constant 3 : index
    %103 = memref.load %arg2[%c4_181, %c3_182] : memref<6x25xf32, #tpu.memory_space<smem>>
    %c4_183 = arith.constant 4 : index
    %c4_184 = arith.constant 4 : index
    %104 = memref.load %arg2[%c4_183, %c4_184] : memref<6x25xf32, #tpu.memory_space<smem>>
    %c4_185 = arith.constant 4 : index
    %c5_186 = arith.constant 5 : index
    %105 = memref.load %arg2[%c4_185, %c5_186] : memref<6x25xf32, #tpu.memory_space<smem>>
    %c4_187 = arith.constant 4 : index
    %c6_188 = arith.constant 6 : index
    %106 = memref.load %arg2[%c4_187, %c6_188] : memref<6x25xf32, #tpu.memory_space<smem>>
    %c4_189 = arith.constant 4 : index
    %c7_190 = arith.constant 7 : index
    %107 = memref.load %arg2[%c4_189, %c7_190] : memref<6x25xf32, #tpu.memory_space<smem>>
    %c4_191 = arith.constant 4 : index
    %c8_192 = arith.constant 8 : index
    %108 = memref.load %arg2[%c4_191, %c8_192] : memref<6x25xf32, #tpu.memory_space<smem>>
    %c4_193 = arith.constant 4 : index
    %c9_194 = arith.constant 9 : index
    %109 = memref.load %arg2[%c4_193, %c9_194] : memref<6x25xf32, #tpu.memory_space<smem>>
    %c4_195 = arith.constant 4 : index
    %c10_196 = arith.constant 10 : index
    %110 = memref.load %arg2[%c4_195, %c10_196] : memref<6x25xf32, #tpu.memory_space<smem>>
    %c4_197 = arith.constant 4 : index
    %c11_198 = arith.constant 11 : index
    %111 = memref.load %arg2[%c4_197, %c11_198] : memref<6x25xf32, #tpu.memory_space<smem>>
    %c4_199 = arith.constant 4 : index
    %c12_200 = arith.constant 12 : index
    %112 = memref.load %arg2[%c4_199, %c12_200] : memref<6x25xf32, #tpu.memory_space<smem>>
    %c4_201 = arith.constant 4 : index
    %c13_202 = arith.constant 13 : index
    %113 = memref.load %arg2[%c4_201, %c13_202] : memref<6x25xf32, #tpu.memory_space<smem>>
    %c4_203 = arith.constant 4 : index
    %c14_204 = arith.constant 14 : index
    %114 = memref.load %arg2[%c4_203, %c14_204] : memref<6x25xf32, #tpu.memory_space<smem>>
    %c4_205 = arith.constant 4 : index
    %c15_206 = arith.constant 15 : index
    %115 = memref.load %arg2[%c4_205, %c15_206] : memref<6x25xf32, #tpu.memory_space<smem>>
    %c4_207 = arith.constant 4 : index
    %c16_208 = arith.constant 16 : index
    %116 = memref.load %arg2[%c4_207, %c16_208] : memref<6x25xf32, #tpu.memory_space<smem>>
    %c4_209 = arith.constant 4 : index
    %c17_210 = arith.constant 17 : index
    %117 = memref.load %arg2[%c4_209, %c17_210] : memref<6x25xf32, #tpu.memory_space<smem>>
    %c4_211 = arith.constant 4 : index
    %c18_212 = arith.constant 18 : index
    %118 = memref.load %arg2[%c4_211, %c18_212] : memref<6x25xf32, #tpu.memory_space<smem>>
    %c4_213 = arith.constant 4 : index
    %c19_214 = arith.constant 19 : index
    %119 = memref.load %arg2[%c4_213, %c19_214] : memref<6x25xf32, #tpu.memory_space<smem>>
    %c4_215 = arith.constant 4 : index
    %c20_216 = arith.constant 20 : index
    %120 = memref.load %arg2[%c4_215, %c20_216] : memref<6x25xf32, #tpu.memory_space<smem>>
    %c4_217 = arith.constant 4 : index
    %c21_218 = arith.constant 21 : index
    %121 = memref.load %arg2[%c4_217, %c21_218] : memref<6x25xf32, #tpu.memory_space<smem>>
    %c4_219 = arith.constant 4 : index
    %c22_220 = arith.constant 22 : index
    %122 = memref.load %arg2[%c4_219, %c22_220] : memref<6x25xf32, #tpu.memory_space<smem>>
    %c4_221 = arith.constant 4 : index
    %c23_222 = arith.constant 23 : index
    %123 = memref.load %arg2[%c4_221, %c23_222] : memref<6x25xf32, #tpu.memory_space<smem>>
    %c4_223 = arith.constant 4 : index
    %c24_224 = arith.constant 24 : index
    %124 = memref.load %arg2[%c4_223, %c24_224] : memref<6x25xf32, #tpu.memory_space<smem>>
    %c5_225 = arith.constant 5 : index
    %c0_226 = arith.constant 0 : index
    %125 = memref.load %arg2[%c5_225, %c0_226] : memref<6x25xf32, #tpu.memory_space<smem>>
    %c5_227 = arith.constant 5 : index
    %c1_228 = arith.constant 1 : index
    %126 = memref.load %arg2[%c5_227, %c1_228] : memref<6x25xf32, #tpu.memory_space<smem>>
    %c5_229 = arith.constant 5 : index
    %c2_230 = arith.constant 2 : index
    %127 = memref.load %arg2[%c5_229, %c2_230] : memref<6x25xf32, #tpu.memory_space<smem>>
    %c5_231 = arith.constant 5 : index
    %c3_232 = arith.constant 3 : index
    %128 = memref.load %arg2[%c5_231, %c3_232] : memref<6x25xf32, #tpu.memory_space<smem>>
    %c5_233 = arith.constant 5 : index
    %c4_234 = arith.constant 4 : index
    %129 = memref.load %arg2[%c5_233, %c4_234] : memref<6x25xf32, #tpu.memory_space<smem>>
    %c5_235 = arith.constant 5 : index
    %c5_236 = arith.constant 5 : index
    %130 = memref.load %arg2[%c5_235, %c5_236] : memref<6x25xf32, #tpu.memory_space<smem>>
    %c5_237 = arith.constant 5 : index
    %c6_238 = arith.constant 6 : index
    %131 = memref.load %arg2[%c5_237, %c6_238] : memref<6x25xf32, #tpu.memory_space<smem>>
    %c5_239 = arith.constant 5 : index
    %c7_240 = arith.constant 7 : index
    %132 = memref.load %arg2[%c5_239, %c7_240] : memref<6x25xf32, #tpu.memory_space<smem>>
    %c5_241 = arith.constant 5 : index
    %c8_242 = arith.constant 8 : index
    %133 = memref.load %arg2[%c5_241, %c8_242] : memref<6x25xf32, #tpu.memory_space<smem>>
    %c5_243 = arith.constant 5 : index
    %c9_244 = arith.constant 9 : index
    %134 = memref.load %arg2[%c5_243, %c9_244] : memref<6x25xf32, #tpu.memory_space<smem>>
    %c5_245 = arith.constant 5 : index
    %c10_246 = arith.constant 10 : index
    %135 = memref.load %arg2[%c5_245, %c10_246] : memref<6x25xf32, #tpu.memory_space<smem>>
    %c5_247 = arith.constant 5 : index
    %c11_248 = arith.constant 11 : index
    %136 = memref.load %arg2[%c5_247, %c11_248] : memref<6x25xf32, #tpu.memory_space<smem>>
    %c5_249 = arith.constant 5 : index
    %c12_250 = arith.constant 12 : index
    %137 = memref.load %arg2[%c5_249, %c12_250] : memref<6x25xf32, #tpu.memory_space<smem>>
    %c5_251 = arith.constant 5 : index
    %c13_252 = arith.constant 13 : index
    %138 = memref.load %arg2[%c5_251, %c13_252] : memref<6x25xf32, #tpu.memory_space<smem>>
    %c5_253 = arith.constant 5 : index
    %c14_254 = arith.constant 14 : index
    %139 = memref.load %arg2[%c5_253, %c14_254] : memref<6x25xf32, #tpu.memory_space<smem>>
    %c5_255 = arith.constant 5 : index
    %c15_256 = arith.constant 15 : index
    %140 = memref.load %arg2[%c5_255, %c15_256] : memref<6x25xf32, #tpu.memory_space<smem>>
    %c5_257 = arith.constant 5 : index
    %c16_258 = arith.constant 16 : index
    %141 = memref.load %arg2[%c5_257, %c16_258] : memref<6x25xf32, #tpu.memory_space<smem>>
    %c5_259 = arith.constant 5 : index
    %c17_260 = arith.constant 17 : index
    %142 = memref.load %arg2[%c5_259, %c17_260] : memref<6x25xf32, #tpu.memory_space<smem>>
    %c5_261 = arith.constant 5 : index
    %c18_262 = arith.constant 18 : index
    %143 = memref.load %arg2[%c5_261, %c18_262] : memref<6x25xf32, #tpu.memory_space<smem>>
    %c5_263 = arith.constant 5 : index
    %c19_264 = arith.constant 19 : index
    %144 = memref.load %arg2[%c5_263, %c19_264] : memref<6x25xf32, #tpu.memory_space<smem>>
    %c5_265 = arith.constant 5 : index
    %c20_266 = arith.constant 20 : index
    %145 = memref.load %arg2[%c5_265, %c20_266] : memref<6x25xf32, #tpu.memory_space<smem>>
    %c5_267 = arith.constant 5 : index
    %c21_268 = arith.constant 21 : index
    %146 = memref.load %arg2[%c5_267, %c21_268] : memref<6x25xf32, #tpu.memory_space<smem>>
    %c5_269 = arith.constant 5 : index
    %c22_270 = arith.constant 22 : index
    %147 = memref.load %arg2[%c5_269, %c22_270] : memref<6x25xf32, #tpu.memory_space<smem>>
    %c5_271 = arith.constant 5 : index
    %c23_272 = arith.constant 23 : index
    %148 = memref.load %arg2[%c5_271, %c23_272] : memref<6x25xf32, #tpu.memory_space<smem>>
    %c5_273 = arith.constant 5 : index
    %c24_274 = arith.constant 24 : index
    %149 = memref.load %arg2[%c5_273, %c24_274] : memref<6x25xf32, #tpu.memory_space<smem>>
    %c0_275 = arith.constant 0 : index
    %c0_276 = arith.constant 0 : index
    %150 = memref.load %arg3[%c0_275, %c0_276] : memref<4x4xf32, #tpu.memory_space<smem>>
    %c0_277 = arith.constant 0 : index
    %c1_278 = arith.constant 1 : index
    %151 = memref.load %arg3[%c0_277, %c1_278] : memref<4x4xf32, #tpu.memory_space<smem>>
    %c0_279 = arith.constant 0 : index
    %c2_280 = arith.constant 2 : index
    %152 = memref.load %arg3[%c0_279, %c2_280] : memref<4x4xf32, #tpu.memory_space<smem>>
    %c0_281 = arith.constant 0 : index
    %c3_282 = arith.constant 3 : index
    %153 = memref.load %arg3[%c0_281, %c3_282] : memref<4x4xf32, #tpu.memory_space<smem>>
    %c1_283 = arith.constant 1 : index
    %c0_284 = arith.constant 0 : index
    %154 = memref.load %arg3[%c1_283, %c0_284] : memref<4x4xf32, #tpu.memory_space<smem>>
    %c1_285 = arith.constant 1 : index
    %c1_286 = arith.constant 1 : index
    %155 = memref.load %arg3[%c1_285, %c1_286] : memref<4x4xf32, #tpu.memory_space<smem>>
    %c1_287 = arith.constant 1 : index
    %c2_288 = arith.constant 2 : index
    %156 = memref.load %arg3[%c1_287, %c2_288] : memref<4x4xf32, #tpu.memory_space<smem>>
    %c1_289 = arith.constant 1 : index
    %c3_290 = arith.constant 3 : index
    %157 = memref.load %arg3[%c1_289, %c3_290] : memref<4x4xf32, #tpu.memory_space<smem>>
    %c2_291 = arith.constant 2 : index
    %c0_292 = arith.constant 0 : index
    %158 = memref.load %arg3[%c2_291, %c0_292] : memref<4x4xf32, #tpu.memory_space<smem>>
    %c2_293 = arith.constant 2 : index
    %c1_294 = arith.constant 1 : index
    %159 = memref.load %arg3[%c2_293, %c1_294] : memref<4x4xf32, #tpu.memory_space<smem>>
    %c2_295 = arith.constant 2 : index
    %c2_296 = arith.constant 2 : index
    %160 = memref.load %arg3[%c2_295, %c2_296] : memref<4x4xf32, #tpu.memory_space<smem>>
    %c2_297 = arith.constant 2 : index
    %c3_298 = arith.constant 3 : index
    %161 = memref.load %arg3[%c2_297, %c3_298] : memref<4x4xf32, #tpu.memory_space<smem>>
    %c0_i32 = arith.constant 0 : i32
    %c1_i32 = arith.constant 1 : i32
    %162 = arith.muli %c0_i32, %c1_i32 : i32
    %c0_i32_299 = arith.constant 0 : i32
    %163 = arith.addi %c0_i32_299, %162 : i32
    %c0_300 = arith.constant 0 : index
    %164 = arith.index_cast %163 : i32 to index
    %c0_301 = arith.constant 0 : index
    %c0_302 = arith.constant 0 : index
    %165 = vector.load %arg1[%c0_300, %164, %c0_301, %c0_302] : memref<6x1x8x128xf32, #tpu.memory_space<vmem>>, vector<1x1x8x128xf32>
    %166 = vector.shape_cast %165 : vector<1x1x8x128xf32> to vector<8x128xf32>
    %167 = vector.broadcast %6 : f32 to vector<8x128xf32>
    %168 = arith.mulf %167, %166 : vector<8x128xf32>
    %169 = math.sin %168 : vector<8x128xf32>
    %170 = math.cos %168 : vector<8x128xf32>
    %c1_303 = arith.constant 1 : index
    %171 = arith.index_cast %163 : i32 to index
    %c0_304 = arith.constant 0 : index
    %c0_305 = arith.constant 0 : index
    %172 = vector.load %arg1[%c1_303, %171, %c0_304, %c0_305] : memref<6x1x8x128xf32, #tpu.memory_space<vmem>>, vector<1x1x8x128xf32>
    %173 = vector.shape_cast %172 : vector<1x1x8x128xf32> to vector<8x128xf32>
    %174 = vector.broadcast %31 : f32 to vector<8x128xf32>
    %175 = arith.mulf %174, %173 : vector<8x128xf32>
    %176 = math.sin %175 : vector<8x128xf32>
    %177 = math.cos %175 : vector<8x128xf32>
    %c2_306 = arith.constant 2 : index
    %178 = arith.index_cast %163 : i32 to index
    %c0_307 = arith.constant 0 : index
    %c0_308 = arith.constant 0 : index
    %179 = vector.load %arg1[%c2_306, %178, %c0_307, %c0_308] : memref<6x1x8x128xf32, #tpu.memory_space<vmem>>, vector<1x1x8x128xf32>
    %180 = vector.shape_cast %179 : vector<1x1x8x128xf32> to vector<8x128xf32>
    %181 = vector.broadcast %56 : f32 to vector<8x128xf32>
    %182 = arith.mulf %181, %180 : vector<8x128xf32>
    %183 = math.sin %182 : vector<8x128xf32>
    %184 = math.cos %182 : vector<8x128xf32>
    %c3_309 = arith.constant 3 : index
    %185 = arith.index_cast %163 : i32 to index
    %c0_310 = arith.constant 0 : index
    %c0_311 = arith.constant 0 : index
    %186 = vector.load %arg1[%c3_309, %185, %c0_310, %c0_311] : memref<6x1x8x128xf32, #tpu.memory_space<vmem>>, vector<1x1x8x128xf32>
    %187 = vector.shape_cast %186 : vector<1x1x8x128xf32> to vector<8x128xf32>
    %188 = vector.broadcast %81 : f32 to vector<8x128xf32>
    %189 = arith.mulf %188, %187 : vector<8x128xf32>
    %190 = math.sin %189 : vector<8x128xf32>
    %191 = math.cos %189 : vector<8x128xf32>
    %c4_312 = arith.constant 4 : index
    %192 = arith.index_cast %163 : i32 to index
    %c0_313 = arith.constant 0 : index
    %c0_314 = arith.constant 0 : index
    %193 = vector.load %arg1[%c4_312, %192, %c0_313, %c0_314] : memref<6x1x8x128xf32, #tpu.memory_space<vmem>>, vector<1x1x8x128xf32>
    %194 = vector.shape_cast %193 : vector<1x1x8x128xf32> to vector<8x128xf32>
    %195 = vector.broadcast %106 : f32 to vector<8x128xf32>
    %196 = arith.mulf %195, %194 : vector<8x128xf32>
    %197 = math.sin %196 : vector<8x128xf32>
    %198 = math.cos %196 : vector<8x128xf32>
    %c5_315 = arith.constant 5 : index
    %199 = arith.index_cast %163 : i32 to index
    %c0_316 = arith.constant 0 : index
    %c0_317 = arith.constant 0 : index
    %200 = vector.load %arg1[%c5_315, %199, %c0_316, %c0_317] : memref<6x1x8x128xf32, #tpu.memory_space<vmem>>, vector<1x1x8x128xf32>
    %201 = vector.shape_cast %200 : vector<1x1x8x128xf32> to vector<8x128xf32>
    %202 = vector.broadcast %131 : f32 to vector<8x128xf32>
    %203 = arith.mulf %202, %201 : vector<8x128xf32>
    %204 = math.sin %203 : vector<8x128xf32>
    %205 = math.cos %203 : vector<8x128xf32>
    %206 = vector.broadcast %0 : f32 to vector<8x128xf32>
    %c0_318 = arith.constant 0 : index
    %207 = arith.index_cast %163 : i32 to index
    %c0_319 = arith.constant 0 : index
    %c0_320 = arith.constant 0 : index
    %208 = vector.load %arg5[%c0_318, %207, %c0_319, %c0_320] : memref<36x1x8x128xf32, #tpu.memory_space<vmem>>, vector<1x1x8x128xf32>
    %209 = vector.shape_cast %208 : vector<1x1x8x128xf32> to vector<8x128xf32>
    %210 = vector.shape_cast %206 : vector<8x128xf32> to vector<1x1x8x128xf32>
    tpu.vector_store %arg5[%c0_318, %207, %c0_319, %c0_320], %210 {strides = array<i32>} : memref<36x1x8x128xf32, #tpu.memory_space<vmem>>, vector<1x1x8x128xf32>,
    %211 = vector.broadcast %3 : f32 to vector<8x128xf32>
    %c3_321 = arith.constant 3 : index
    %212 = arith.index_cast %163 : i32 to index
    %c0_322 = arith.constant 0 : index
    %c0_323 = arith.constant 0 : index
    %213 = vector.load %arg5[%c3_321, %212, %c0_322, %c0_323] : memref<36x1x8x128xf32, #tpu.memory_space<vmem>>, vector<1x1x8x128xf32>
    %214 = vector.shape_cast %213 : vector<1x1x8x128xf32> to vector<8x128xf32>
    %215 = vector.shape_cast %211 : vector<8x128xf32> to vector<1x1x8x128xf32>
    tpu.vector_store %arg5[%c3_321, %212, %c0_322, %c0_323], %215 {strides = array<i32>} : memref<36x1x8x128xf32, #tpu.memory_space<vmem>>, vector<1x1x8x128xf32>,
    %216 = vector.broadcast %1 : f32 to vector<8x128xf32>
    %c1_324 = arith.constant 1 : index
    %217 = arith.index_cast %163 : i32 to index
    %c0_325 = arith.constant 0 : index
    %c0_326 = arith.constant 0 : index
    %218 = vector.load %arg5[%c1_324, %217, %c0_325, %c0_326] : memref<36x1x8x128xf32, #tpu.memory_space<vmem>>, vector<1x1x8x128xf32>
    %219 = vector.shape_cast %218 : vector<1x1x8x128xf32> to vector<8x128xf32>
    %220 = vector.shape_cast %216 : vector<8x128xf32> to vector<1x1x8x128xf32>
    tpu.vector_store %arg5[%c1_324, %217, %c0_325, %c0_326], %220 {strides = array<i32>} : memref<36x1x8x128xf32, #tpu.memory_space<vmem>>, vector<1x1x8x128xf32>,
    %221 = vector.broadcast %4 : f32 to vector<8x128xf32>
    %c4_327 = arith.constant 4 : index
    %222 = arith.index_cast %163 : i32 to index
    %c0_328 = arith.constant 0 : index
    %c0_329 = arith.constant 0 : index
    %223 = vector.load %arg5[%c4_327, %222, %c0_328, %c0_329] : memref<36x1x8x128xf32, #tpu.memory_space<vmem>>, vector<1x1x8x128xf32>
    %224 = vector.shape_cast %223 : vector<1x1x8x128xf32> to vector<8x128xf32>
    %225 = vector.shape_cast %221 : vector<8x128xf32> to vector<1x1x8x128xf32>
    tpu.vector_store %arg5[%c4_327, %222, %c0_328, %c0_329], %225 {strides = array<i32>} : memref<36x1x8x128xf32, #tpu.memory_space<vmem>>, vector<1x1x8x128xf32>,
    %226 = vector.broadcast %2 : f32 to vector<8x128xf32>
    %c2_330 = arith.constant 2 : index
    %227 = arith.index_cast %163 : i32 to index
    %c0_331 = arith.constant 0 : index
    %c0_332 = arith.constant 0 : index
    %228 = vector.load %arg5[%c2_330, %227, %c0_331, %c0_332] : memref<36x1x8x128xf32, #tpu.memory_space<vmem>>, vector<1x1x8x128xf32>
    %229 = vector.shape_cast %228 : vector<1x1x8x128xf32> to vector<8x128xf32>
    %230 = vector.shape_cast %226 : vector<8x128xf32> to vector<1x1x8x128xf32>
    tpu.vector_store %arg5[%c2_330, %227, %c0_331, %c0_332], %230 {strides = array<i32>} : memref<36x1x8x128xf32, #tpu.memory_space<vmem>>, vector<1x1x8x128xf32>,
    %231 = vector.broadcast %5 : f32 to vector<8x128xf32>
    %c5_333 = arith.constant 5 : index
    %232 = arith.index_cast %163 : i32 to index
    %c0_334 = arith.constant 0 : index
    %c0_335 = arith.constant 0 : index
    %233 = vector.load %arg5[%c5_333, %232, %c0_334, %c0_335] : memref<36x1x8x128xf32, #tpu.memory_space<vmem>>, vector<1x1x8x128xf32>
    %234 = vector.shape_cast %233 : vector<1x1x8x128xf32> to vector<8x128xf32>
    %235 = vector.shape_cast %231 : vector<8x128xf32> to vector<1x1x8x128xf32>
    tpu.vector_store %arg5[%c5_333, %232, %c0_334, %c0_335], %235 {strides = array<i32>} : memref<36x1x8x128xf32, #tpu.memory_space<vmem>>, vector<1x1x8x128xf32>,
    %cst = arith.constant 1.000000e+00 : f32
    %236 = vector.broadcast %cst : f32 to vector<8x128xf32>
    %237 = arith.subf %236, %170 : vector<8x128xf32>
    %238 = arith.subf %168, %169 : vector<8x128xf32>
    %239 = vector.broadcast %7 : f32 to vector<8x128xf32>
    %240 = arith.mulf %169, %239 : vector<8x128xf32>
    %241 = vector.broadcast %8 : f32 to vector<8x128xf32>
    %242 = arith.mulf %169, %241 : vector<8x128xf32>
    %243 = vector.broadcast %9 : f32 to vector<8x128xf32>
    %244 = arith.mulf %169, %243 : vector<8x128xf32>
    %245 = vector.broadcast %10 : f32 to vector<8x128xf32>
    %246 = arith.mulf %237, %245 : vector<8x128xf32>
    %247 = vector.broadcast %11 : f32 to vector<8x128xf32>
    %248 = arith.mulf %237, %247 : vector<8x128xf32>
    %249 = vector.broadcast %12 : f32 to vector<8x128xf32>
    %250 = arith.mulf %237, %249 : vector<8x128xf32>
    %251 = vector.broadcast %13 : f32 to vector<8x128xf32>
    %252 = arith.mulf %237, %251 : vector<8x128xf32>
    %253 = vector.broadcast %14 : f32 to vector<8x128xf32>
    %254 = arith.mulf %237, %253 : vector<8x128xf32>
    %255 = vector.broadcast %15 : f32 to vector<8x128xf32>
    %256 = arith.mulf %237, %255 : vector<8x128xf32>
    %cst_336 = arith.constant 1.000000e+00 : f32
    %257 = vector.broadcast %cst_336 : f32 to vector<8x128xf32>
    %258 = arith.addf %257, %246 : vector<8x128xf32>
    %cst_337 = arith.constant 1.000000e+00 : f32
    %259 = vector.broadcast %cst_337 : f32 to vector<8x128xf32>
    %260 = arith.addf %259, %252 : vector<8x128xf32>
    %cst_338 = arith.constant 1.000000e+00 : f32
    %261 = vector.broadcast %cst_338 : f32 to vector<8x128xf32>
    %262 = arith.addf %261, %256 : vector<8x128xf32>
    %263 = arith.subf %248, %244 : vector<8x128xf32>
    %264 = arith.addf %248, %244 : vector<8x128xf32>
    %265 = arith.addf %250, %242 : vector<8x128xf32>
    %266 = arith.subf %250, %242 : vector<8x128xf32>
    %267 = arith.subf %254, %240 : vector<8x128xf32>
    %268 = arith.addf %254, %240 : vector<8x128xf32>
    %269 = vector.broadcast %16 : f32 to vector<8x128xf32>
    %270 = arith.mulf %168, %269 : vector<8x128xf32>
    %271 = vector.broadcast %19 : f32 to vector<8x128xf32>
    %272 = arith.mulf %237, %271 : vector<8x128xf32>
    %273 = arith.addf %270, %272 : vector<8x128xf32>
    %274 = vector.broadcast %22 : f32 to vector<8x128xf32>
    %275 = arith.mulf %238, %274 : vector<8x128xf32>
    %276 = arith.addf %273, %275 : vector<8x128xf32>
    %277 = vector.broadcast %17 : f32 to vector<8x128xf32>
    %278 = arith.mulf %168, %277 : vector<8x128xf32>
    %279 = vector.broadcast %20 : f32 to vector<8x128xf32>
    %280 = arith.mulf %237, %279 : vector<8x128xf32>
    %281 = arith.addf %278, %280 : vector<8x128xf32>
    %282 = vector.broadcast %23 : f32 to vector<8x128xf32>
    %283 = arith.mulf %238, %282 : vector<8x128xf32>
    %284 = arith.addf %281, %283 : vector<8x128xf32>
    %285 = vector.broadcast %18 : f32 to vector<8x128xf32>
    %286 = arith.mulf %168, %285 : vector<8x128xf32>
    %287 = vector.broadcast %21 : f32 to vector<8x128xf32>
    %288 = arith.mulf %237, %287 : vector<8x128xf32>
    %289 = arith.addf %286, %288 : vector<8x128xf32>
    %290 = vector.broadcast %24 : f32 to vector<8x128xf32>
    %291 = arith.mulf %238, %290 : vector<8x128xf32>
    %292 = arith.addf %289, %291 : vector<8x128xf32>
    %293 = vector.broadcast %27 : f32 to vector<8x128xf32>
    %294 = arith.mulf %284, %293 : vector<8x128xf32>
    %295 = vector.broadcast %26 : f32 to vector<8x128xf32>
    %296 = arith.mulf %292, %295 : vector<8x128xf32>
    %297 = arith.subf %294, %296 : vector<8x128xf32>
    %298 = vector.broadcast %25 : f32 to vector<8x128xf32>
    %299 = arith.mulf %292, %298 : vector<8x128xf32>
    %300 = vector.broadcast %27 : f32 to vector<8x128xf32>
    %301 = arith.mulf %276, %300 : vector<8x128xf32>
    %302 = arith.subf %299, %301 : vector<8x128xf32>
    %303 = vector.broadcast %26 : f32 to vector<8x128xf32>
    %304 = arith.mulf %276, %303 : vector<8x128xf32>
    %305 = vector.broadcast %25 : f32 to vector<8x128xf32>
    %306 = arith.mulf %284, %305 : vector<8x128xf32>
    %307 = arith.subf %304, %306 : vector<8x128xf32>
    %308 = vector.broadcast %28 : f32 to vector<8x128xf32>
    %309 = arith.subf %308, %297 : vector<8x128xf32>
    %310 = vector.broadcast %29 : f32 to vector<8x128xf32>
    %311 = arith.subf %310, %302 : vector<8x128xf32>
    %312 = vector.broadcast %30 : f32 to vector<8x128xf32>
    %313 = arith.subf %312, %307 : vector<8x128xf32>
    %314 = vector.broadcast %25 : f32 to vector<8x128xf32>
    %315 = arith.mulf %258, %314 : vector<8x128xf32>
    %316 = vector.broadcast %26 : f32 to vector<8x128xf32>
    %317 = arith.mulf %264, %316 : vector<8x128xf32>
    %318 = arith.addf %315, %317 : vector<8x128xf32>
    %319 = vector.broadcast %27 : f32 to vector<8x128xf32>
    %320 = arith.mulf %266, %319 : vector<8x128xf32>
    %321 = arith.addf %318, %320 : vector<8x128xf32>
    %322 = arith.mulf %258, %309 : vector<8x128xf32>
    %323 = arith.mulf %264, %311 : vector<8x128xf32>
    %324 = arith.addf %322, %323 : vector<8x128xf32>
    %325 = arith.mulf %266, %313 : vector<8x128xf32>
    %326 = arith.addf %324, %325 : vector<8x128xf32>
    %c6_339 = arith.constant 6 : index
    %327 = arith.index_cast %163 : i32 to index
    %c0_340 = arith.constant 0 : index
    %c0_341 = arith.constant 0 : index
    %328 = vector.load %arg5[%c6_339, %327, %c0_340, %c0_341] : memref<36x1x8x128xf32, #tpu.memory_space<vmem>>, vector<1x1x8x128xf32>
    %329 = vector.shape_cast %328 : vector<1x1x8x128xf32> to vector<8x128xf32>
    %330 = vector.shape_cast %321 : vector<8x128xf32> to vector<1x1x8x128xf32>
    tpu.vector_store %arg5[%c6_339, %327, %c0_340, %c0_341], %330 {strides = array<i32>} : memref<36x1x8x128xf32, #tpu.memory_space<vmem>>, vector<1x1x8x128xf32>,
    %c9_342 = arith.constant 9 : index
    %331 = arith.index_cast %163 : i32 to index
    %c0_343 = arith.constant 0 : index
    %c0_344 = arith.constant 0 : index
    %332 = vector.load %arg5[%c9_342, %331, %c0_343, %c0_344] : memref<36x1x8x128xf32, #tpu.memory_space<vmem>>, vector<1x1x8x128xf32>
    %333 = vector.shape_cast %332 : vector<1x1x8x128xf32> to vector<8x128xf32>
    %334 = vector.shape_cast %326 : vector<8x128xf32> to vector<1x1x8x128xf32>
    tpu.vector_store %arg5[%c9_342, %331, %c0_343, %c0_344], %334 {strides = array<i32>} : memref<36x1x8x128xf32, #tpu.memory_space<vmem>>, vector<1x1x8x128xf32>,
    %335 = vector.broadcast %25 : f32 to vector<8x128xf32>
    %336 = arith.mulf %263, %335 : vector<8x128xf32>
    %337 = vector.broadcast %26 : f32 to vector<8x128xf32>
    %338 = arith.mulf %260, %337 : vector<8x128xf32>
    %339 = arith.addf %336, %338 : vector<8x128xf32>
    %340 = vector.broadcast %27 : f32 to vector<8x128xf32>
    %341 = arith.mulf %268, %340 : vector<8x128xf32>
    %342 = arith.addf %339, %341 : vector<8x128xf32>
    %343 = arith.mulf %263, %309 : vector<8x128xf32>
    %344 = arith.mulf %260, %311 : vector<8x128xf32>
    %345 = arith.addf %343, %344 : vector<8x128xf32>
    %346 = arith.mulf %268, %313 : vector<8x128xf32>
    %347 = arith.addf %345, %346 : vector<8x128xf32>
    %c7_345 = arith.constant 7 : index
    %348 = arith.index_cast %163 : i32 to index
    %c0_346 = arith.constant 0 : index
    %c0_347 = arith.constant 0 : index
    %349 = vector.load %arg5[%c7_345, %348, %c0_346, %c0_347] : memref<36x1x8x128xf32, #tpu.memory_space<vmem>>, vector<1x1x8x128xf32>
    %350 = vector.shape_cast %349 : vector<1x1x8x128xf32> to vector<8x128xf32>
    %351 = vector.shape_cast %342 : vector<8x128xf32> to vector<1x1x8x128xf32>
    tpu.vector_store %arg5[%c7_345, %348, %c0_346, %c0_347], %351 {strides = array<i32>} : memref<36x1x8x128xf32, #tpu.memory_space<vmem>>, vector<1x1x8x128xf32>,
    %c10_348 = arith.constant 10 : index
    %352 = arith.index_cast %163 : i32 to index
    %c0_349 = arith.constant 0 : index
    %c0_350 = arith.constant 0 : index
    %353 = vector.load %arg5[%c10_348, %352, %c0_349, %c0_350] : memref<36x1x8x128xf32, #tpu.memory_space<vmem>>, vector<1x1x8x128xf32>
    %354 = vector.shape_cast %353 : vector<1x1x8x128xf32> to vector<8x128xf32>
    %355 = vector.shape_cast %347 : vector<8x128xf32> to vector<1x1x8x128xf32>
    tpu.vector_store %arg5[%c10_348, %352, %c0_349, %c0_350], %355 {strides = array<i32>} : memref<36x1x8x128xf32, #tpu.memory_space<vmem>>, vector<1x1x8x128xf32>,
    %356 = vector.broadcast %25 : f32 to vector<8x128xf32>
    %357 = arith.mulf %265, %356 : vector<8x128xf32>
    %358 = vector.broadcast %26 : f32 to vector<8x128xf32>
    %359 = arith.mulf %267, %358 : vector<8x128xf32>
    %360 = arith.addf %357, %359 : vector<8x128xf32>
    %361 = vector.broadcast %27 : f32 to vector<8x128xf32>
    %362 = arith.mulf %262, %361 : vector<8x128xf32>
    %363 = arith.addf %360, %362 : vector<8x128xf32>
    %364 = arith.mulf %265, %309 : vector<8x128xf32>
    %365 = arith.mulf %267, %311 : vector<8x128xf32>
    %366 = arith.addf %364, %365 : vector<8x128xf32>
    %367 = arith.mulf %262, %313 : vector<8x128xf32>
    %368 = arith.addf %366, %367 : vector<8x128xf32>
    %c8_351 = arith.constant 8 : index
    %369 = arith.index_cast %163 : i32 to index
    %c0_352 = arith.constant 0 : index
    %c0_353 = arith.constant 0 : index
    %370 = vector.load %arg5[%c8_351, %369, %c0_352, %c0_353] : memref<36x1x8x128xf32, #tpu.memory_space<vmem>>, vector<1x1x8x128xf32>
    %371 = vector.shape_cast %370 : vector<1x1x8x128xf32> to vector<8x128xf32>
    %372 = vector.shape_cast %363 : vector<8x128xf32> to vector<1x1x8x128xf32>
    tpu.vector_store %arg5[%c8_351, %369, %c0_352, %c0_353], %372 {strides = array<i32>} : memref<36x1x8x128xf32, #tpu.memory_space<vmem>>, vector<1x1x8x128xf32>,
    %c11_354 = arith.constant 11 : index
    %373 = arith.index_cast %163 : i32 to index
    %c0_355 = arith.constant 0 : index
    %c0_356 = arith.constant 0 : index
    %374 = vector.load %arg5[%c11_354, %373, %c0_355, %c0_356] : memref<36x1x8x128xf32, #tpu.memory_space<vmem>>, vector<1x1x8x128xf32>
    %375 = vector.shape_cast %374 : vector<1x1x8x128xf32> to vector<8x128xf32>
    %376 = vector.shape_cast %368 : vector<8x128xf32> to vector<1x1x8x128xf32>
    tpu.vector_store %arg5[%c11_354, %373, %c0_355, %c0_356], %376 {strides = array<i32>} : memref<36x1x8x128xf32, #tpu.memory_space<vmem>>, vector<1x1x8x128xf32>,
    %c1_357 = arith.constant 1 : index
    %377 = arith.index_cast %163 : i32 to index
    %c0_358 = arith.constant 0 : index
    %c0_359 = arith.constant 0 : index
    %378 = vector.load %arg1[%c1_357, %377, %c0_358, %c0_359] : memref<6x1x8x128xf32, #tpu.memory_space<vmem>>, vector<1x1x8x128xf32>
    %379 = vector.shape_cast %378 : vector<1x1x8x128xf32> to vector<8x128xf32>
    %380 = vector.broadcast %31 : f32 to vector<8x128xf32>
    %381 = arith.mulf %380, %379 : vector<8x128xf32>
    %cst_360 = arith.constant 1.000000e+00 : f32
    %382 = vector.broadcast %cst_360 : f32 to vector<8x128xf32>
    %383 = arith.subf %382, %177 : vector<8x128xf32>
    %384 = arith.subf %381, %176 : vector<8x128xf32>
    %385 = vector.broadcast %32 : f32 to vector<8x128xf32>
    %386 = arith.mulf %176, %385 : vector<8x128xf32>
    %387 = vector.broadcast %33 : f32 to vector<8x128xf32>
    %388 = arith.mulf %176, %387 : vector<8x128xf32>
    %389 = vector.broadcast %34 : f32 to vector<8x128xf32>
    %390 = arith.mulf %176, %389 : vector<8x128xf32>
    %391 = vector.broadcast %35 : f32 to vector<8x128xf32>
    %392 = arith.mulf %383, %391 : vector<8x128xf32>
    %393 = vector.broadcast %36 : f32 to vector<8x128xf32>
    %394 = arith.mulf %383, %393 : vector<8x128xf32>
    %395 = vector.broadcast %37 : f32 to vector<8x128xf32>
    %396 = arith.mulf %383, %395 : vector<8x128xf32>
    %397 = vector.broadcast %38 : f32 to vector<8x128xf32>
    %398 = arith.mulf %383, %397 : vector<8x128xf32>
    %399 = vector.broadcast %39 : f32 to vector<8x128xf32>
    %400 = arith.mulf %383, %399 : vector<8x128xf32>
    %401 = vector.broadcast %40 : f32 to vector<8x128xf32>
    %402 = arith.mulf %383, %401 : vector<8x128xf32>
    %cst_361 = arith.constant 1.000000e+00 : f32
    %403 = vector.broadcast %cst_361 : f32 to vector<8x128xf32>
    %404 = arith.addf %403, %392 : vector<8x128xf32>
    %cst_362 = arith.constant 1.000000e+00 : f32
    %405 = vector.broadcast %cst_362 : f32 to vector<8x128xf32>
    %406 = arith.addf %405, %398 : vector<8x128xf32>
    %cst_363 = arith.constant 1.000000e+00 : f32
    %407 = vector.broadcast %cst_363 : f32 to vector<8x128xf32>
    %408 = arith.addf %407, %402 : vector<8x128xf32>
    %409 = arith.subf %394, %390 : vector<8x128xf32>
    %410 = arith.addf %394, %390 : vector<8x128xf32>
    %411 = arith.addf %396, %388 : vector<8x128xf32>
    %412 = arith.subf %396, %388 : vector<8x128xf32>
    %413 = arith.subf %400, %386 : vector<8x128xf32>
    %414 = arith.addf %400, %386 : vector<8x128xf32>
    %415 = vector.broadcast %41 : f32 to vector<8x128xf32>
    %416 = arith.mulf %381, %415 : vector<8x128xf32>
    %417 = vector.broadcast %44 : f32 to vector<8x128xf32>
    %418 = arith.mulf %383, %417 : vector<8x128xf32>
    %419 = arith.addf %416, %418 : vector<8x128xf32>
    %420 = vector.broadcast %47 : f32 to vector<8x128xf32>
    %421 = arith.mulf %384, %420 : vector<8x128xf32>
    %422 = arith.addf %419, %421 : vector<8x128xf32>
    %423 = vector.broadcast %42 : f32 to vector<8x128xf32>
    %424 = arith.mulf %381, %423 : vector<8x128xf32>
    %425 = vector.broadcast %45 : f32 to vector<8x128xf32>
    %426 = arith.mulf %383, %425 : vector<8x128xf32>
    %427 = arith.addf %424, %426 : vector<8x128xf32>
    %428 = vector.broadcast %48 : f32 to vector<8x128xf32>
    %429 = arith.mulf %384, %428 : vector<8x128xf32>
    %430 = arith.addf %427, %429 : vector<8x128xf32>
    %431 = vector.broadcast %43 : f32 to vector<8x128xf32>
    %432 = arith.mulf %381, %431 : vector<8x128xf32>
    %433 = vector.broadcast %46 : f32 to vector<8x128xf32>
    %434 = arith.mulf %383, %433 : vector<8x128xf32>
    %435 = arith.addf %432, %434 : vector<8x128xf32>
    %436 = vector.broadcast %49 : f32 to vector<8x128xf32>
    %437 = arith.mulf %384, %436 : vector<8x128xf32>
    %438 = arith.addf %435, %437 : vector<8x128xf32>
    %439 = arith.mulf %258, %404 : vector<8x128xf32>
    %440 = arith.mulf %263, %410 : vector<8x128xf32>
    %441 = arith.addf %439, %440 : vector<8x128xf32>
    %442 = arith.mulf %265, %412 : vector<8x128xf32>
    %443 = arith.addf %441, %442 : vector<8x128xf32>
    %444 = arith.mulf %258, %409 : vector<8x128xf32>
    %445 = arith.mulf %263, %406 : vector<8x128xf32>
    %446 = arith.addf %444, %445 : vector<8x128xf32>
    %447 = arith.mulf %265, %414 : vector<8x128xf32>
    %448 = arith.addf %446, %447 : vector<8x128xf32>
    %449 = arith.mulf %258, %411 : vector<8x128xf32>
    %450 = arith.mulf %263, %413 : vector<8x128xf32>
    %451 = arith.addf %449, %450 : vector<8x128xf32>
    %452 = arith.mulf %265, %408 : vector<8x128xf32>
    %453 = arith.addf %451, %452 : vector<8x128xf32>
    %454 = arith.mulf %258, %422 : vector<8x128xf32>
    %455 = arith.mulf %263, %430 : vector<8x128xf32>
    %456 = arith.addf %454, %455 : vector<8x128xf32>
    %457 = arith.mulf %265, %438 : vector<8x128xf32>
    %458 = arith.addf %456, %457 : vector<8x128xf32>
    %459 = arith.addf %458, %276 : vector<8x128xf32>
    %460 = arith.mulf %264, %404 : vector<8x128xf32>
    %461 = arith.mulf %260, %410 : vector<8x128xf32>
    %462 = arith.addf %460, %461 : vector<8x128xf32>
    %463 = arith.mulf %267, %412 : vector<8x128xf32>
    %464 = arith.addf %462, %463 : vector<8x128xf32>
    %465 = arith.mulf %264, %409 : vector<8x128xf32>
    %466 = arith.mulf %260, %406 : vector<8x128xf32>
    %467 = arith.addf %465, %466 : vector<8x128xf32>
    %468 = arith.mulf %267, %414 : vector<8x128xf32>
    %469 = arith.addf %467, %468 : vector<8x128xf32>
    %470 = arith.mulf %264, %411 : vector<8x128xf32>
    %471 = arith.mulf %260, %413 : vector<8x128xf32>
    %472 = arith.addf %470, %471 : vector<8x128xf32>
    %473 = arith.mulf %267, %408 : vector<8x128xf32>
    %474 = arith.addf %472, %473 : vector<8x128xf32>
    %475 = arith.mulf %264, %422 : vector<8x128xf32>
    %476 = arith.mulf %260, %430 : vector<8x128xf32>
    %477 = arith.addf %475, %476 : vector<8x128xf32>
    %478 = arith.mulf %267, %438 : vector<8x128xf32>
    %479 = arith.addf %477, %478 : vector<8x128xf32>
    %480 = arith.addf %479, %284 : vector<8x128xf32>
    %481 = arith.mulf %266, %404 : vector<8x128xf32>
    %482 = arith.mulf %268, %410 : vector<8x128xf32>
    %483 = arith.addf %481, %482 : vector<8x128xf32>
    %484 = arith.mulf %262, %412 : vector<8x128xf32>
    %485 = arith.addf %483, %484 : vector<8x128xf32>
    %486 = arith.mulf %266, %409 : vector<8x128xf32>
    %487 = arith.mulf %268, %406 : vector<8x128xf32>
    %488 = arith.addf %486, %487 : vector<8x128xf32>
    %489 = arith.mulf %262, %414 : vector<8x128xf32>
    %490 = arith.addf %488, %489 : vector<8x128xf32>
    %491 = arith.mulf %266, %411 : vector<8x128xf32>
    %492 = arith.mulf %268, %413 : vector<8x128xf32>
    %493 = arith.addf %491, %492 : vector<8x128xf32>
    %494 = arith.mulf %262, %408 : vector<8x128xf32>
    %495 = arith.addf %493, %494 : vector<8x128xf32>
    %496 = arith.mulf %266, %422 : vector<8x128xf32>
    %497 = arith.mulf %268, %430 : vector<8x128xf32>
    %498 = arith.addf %496, %497 : vector<8x128xf32>
    %499 = arith.mulf %262, %438 : vector<8x128xf32>
    %500 = arith.addf %498, %499 : vector<8x128xf32>
    %501 = arith.addf %500, %292 : vector<8x128xf32>
    %502 = vector.broadcast %52 : f32 to vector<8x128xf32>
    %503 = arith.mulf %480, %502 : vector<8x128xf32>
    %504 = vector.broadcast %51 : f32 to vector<8x128xf32>
    %505 = arith.mulf %501, %504 : vector<8x128xf32>
    %506 = arith.subf %503, %505 : vector<8x128xf32>
    %507 = vector.broadcast %50 : f32 to vector<8x128xf32>
    %508 = arith.mulf %501, %507 : vector<8x128xf32>
    %509 = vector.broadcast %52 : f32 to vector<8x128xf32>
    %510 = arith.mulf %459, %509 : vector<8x128xf32>
    %511 = arith.subf %508, %510 : vector<8x128xf32>
    %512 = vector.broadcast %51 : f32 to vector<8x128xf32>
    %513 = arith.mulf %459, %512 : vector<8x128xf32>
    %514 = vector.broadcast %50 : f32 to vector<8x128xf32>
    %515 = arith.mulf %480, %514 : vector<8x128xf32>
    %516 = arith.subf %513, %515 : vector<8x128xf32>
    %517 = vector.broadcast %53 : f32 to vector<8x128xf32>
    %518 = arith.subf %517, %506 : vector<8x128xf32>
    %519 = vector.broadcast %54 : f32 to vector<8x128xf32>
    %520 = arith.subf %519, %511 : vector<8x128xf32>
    %521 = vector.broadcast %55 : f32 to vector<8x128xf32>
    %522 = arith.subf %521, %516 : vector<8x128xf32>
    %523 = vector.broadcast %50 : f32 to vector<8x128xf32>
    %524 = arith.mulf %443, %523 : vector<8x128xf32>
    %525 = vector.broadcast %51 : f32 to vector<8x128xf32>
    %526 = arith.mulf %464, %525 : vector<8x128xf32>
    %527 = arith.addf %524, %526 : vector<8x128xf32>
    %528 = vector.broadcast %52 : f32 to vector<8x128xf32>
    %529 = arith.mulf %485, %528 : vector<8x128xf32>
    %530 = arith.addf %527, %529 : vector<8x128xf32>
    %531 = arith.mulf %443, %518 : vector<8x128xf32>
    %532 = arith.mulf %464, %520 : vector<8x128xf32>
    %533 = arith.addf %531, %532 : vector<8x128xf32>
    %534 = arith.mulf %485, %522 : vector<8x128xf32>
    %535 = arith.addf %533, %534 : vector<8x128xf32>
    %c12_364 = arith.constant 12 : index
    %536 = arith.index_cast %163 : i32 to index
    %c0_365 = arith.constant 0 : index
    %c0_366 = arith.constant 0 : index
    %537 = vector.load %arg5[%c12_364, %536, %c0_365, %c0_366] : memref<36x1x8x128xf32, #tpu.memory_space<vmem>>, vector<1x1x8x128xf32>
    %538 = vector.shape_cast %537 : vector<1x1x8x128xf32> to vector<8x128xf32>
    %539 = vector.shape_cast %530 : vector<8x128xf32> to vector<1x1x8x128xf32>
    tpu.vector_store %arg5[%c12_364, %536, %c0_365, %c0_366], %539 {strides = array<i32>} : memref<36x1x8x128xf32, #tpu.memory_space<vmem>>, vector<1x1x8x128xf32>,
    %c15_367 = arith.constant 15 : index
    %540 = arith.index_cast %163 : i32 to index
    %c0_368 = arith.constant 0 : index
    %c0_369 = arith.constant 0 : index
    %541 = vector.load %arg5[%c15_367, %540, %c0_368, %c0_369] : memref<36x1x8x128xf32, #tpu.memory_space<vmem>>, vector<1x1x8x128xf32>
    %542 = vector.shape_cast %541 : vector<1x1x8x128xf32> to vector<8x128xf32>
    %543 = vector.shape_cast %535 : vector<8x128xf32> to vector<1x1x8x128xf32>
    tpu.vector_store %arg5[%c15_367, %540, %c0_368, %c0_369], %543 {strides = array<i32>} : memref<36x1x8x128xf32, #tpu.memory_space<vmem>>, vector<1x1x8x128xf32>,
    %544 = vector.broadcast %50 : f32 to vector<8x128xf32>
    %545 = arith.mulf %448, %544 : vector<8x128xf32>
    %546 = vector.broadcast %51 : f32 to vector<8x128xf32>
    %547 = arith.mulf %469, %546 : vector<8x128xf32>
    %548 = arith.addf %545, %547 : vector<8x128xf32>
    %549 = vector.broadcast %52 : f32 to vector<8x128xf32>
    %550 = arith.mulf %490, %549 : vector<8x128xf32>
    %551 = arith.addf %548, %550 : vector<8x128xf32>
    %552 = arith.mulf %448, %518 : vector<8x128xf32>
    %553 = arith.mulf %469, %520 : vector<8x128xf32>
    %554 = arith.addf %552, %553 : vector<8x128xf32>
    %555 = arith.mulf %490, %522 : vector<8x128xf32>
    %556 = arith.addf %554, %555 : vector<8x128xf32>
    %c13_370 = arith.constant 13 : index
    %557 = arith.index_cast %163 : i32 to index
    %c0_371 = arith.constant 0 : index
    %c0_372 = arith.constant 0 : index
    %558 = vector.load %arg5[%c13_370, %557, %c0_371, %c0_372] : memref<36x1x8x128xf32, #tpu.memory_space<vmem>>, vector<1x1x8x128xf32>
    %559 = vector.shape_cast %558 : vector<1x1x8x128xf32> to vector<8x128xf32>
    %560 = vector.shape_cast %551 : vector<8x128xf32> to vector<1x1x8x128xf32>
    tpu.vector_store %arg5[%c13_370, %557, %c0_371, %c0_372], %560 {strides = array<i32>} : memref<36x1x8x128xf32, #tpu.memory_space<vmem>>, vector<1x1x8x128xf32>,
    %c16_373 = arith.constant 16 : index
    %561 = arith.index_cast %163 : i32 to index
    %c0_374 = arith.constant 0 : index
    %c0_375 = arith.constant 0 : index
    %562 = vector.load %arg5[%c16_373, %561, %c0_374, %c0_375] : memref<36x1x8x128xf32, #tpu.memory_space<vmem>>, vector<1x1x8x128xf32>
    %563 = vector.shape_cast %562 : vector<1x1x8x128xf32> to vector<8x128xf32>
    %564 = vector.shape_cast %556 : vector<8x128xf32> to vector<1x1x8x128xf32>
    tpu.vector_store %arg5[%c16_373, %561, %c0_374, %c0_375], %564 {strides = array<i32>} : memref<36x1x8x128xf32, #tpu.memory_space<vmem>>, vector<1x1x8x128xf32>,
    %565 = vector.broadcast %50 : f32 to vector<8x128xf32>
    %566 = arith.mulf %453, %565 : vector<8x128xf32>
    %567 = vector.broadcast %51 : f32 to vector<8x128xf32>
    %568 = arith.mulf %474, %567 : vector<8x128xf32>
    %569 = arith.addf %566, %568 : vector<8x128xf32>
    %570 = vector.broadcast %52 : f32 to vector<8x128xf32>
    %571 = arith.mulf %495, %570 : vector<8x128xf32>
    %572 = arith.addf %569, %571 : vector<8x128xf32>
    %573 = arith.mulf %453, %518 : vector<8x128xf32>
    %574 = arith.mulf %474, %520 : vector<8x128xf32>
    %575 = arith.addf %573, %574 : vector<8x128xf32>
    %576 = arith.mulf %495, %522 : vector<8x128xf32>
    %577 = arith.addf %575, %576 : vector<8x128xf32>
    %c14_376 = arith.constant 14 : index
    %578 = arith.index_cast %163 : i32 to index
    %c0_377 = arith.constant 0 : index
    %c0_378 = arith.constant 0 : index
    %579 = vector.load %arg5[%c14_376, %578, %c0_377, %c0_378] : memref<36x1x8x128xf32, #tpu.memory_space<vmem>>, vector<1x1x8x128xf32>
    %580 = vector.shape_cast %579 : vector<1x1x8x128xf32> to vector<8x128xf32>
    %581 = vector.shape_cast %572 : vector<8x128xf32> to vector<1x1x8x128xf32>
    tpu.vector_store %arg5[%c14_376, %578, %c0_377, %c0_378], %581 {strides = array<i32>} : memref<36x1x8x128xf32, #tpu.memory_space<vmem>>, vector<1x1x8x128xf32>,
    %c17_379 = arith.constant 17 : index
    %582 = arith.index_cast %163 : i32 to index
    %c0_380 = arith.constant 0 : index
    %c0_381 = arith.constant 0 : index
    %583 = vector.load %arg5[%c17_379, %582, %c0_380, %c0_381] : memref<36x1x8x128xf32, #tpu.memory_space<vmem>>, vector<1x1x8x128xf32>
    %584 = vector.shape_cast %583 : vector<1x1x8x128xf32> to vector<8x128xf32>
    %585 = vector.shape_cast %577 : vector<8x128xf32> to vector<1x1x8x128xf32>
    tpu.vector_store %arg5[%c17_379, %582, %c0_380, %c0_381], %585 {strides = array<i32>} : memref<36x1x8x128xf32, #tpu.memory_space<vmem>>, vector<1x1x8x128xf32>,
    %c2_382 = arith.constant 2 : index
    %586 = arith.index_cast %163 : i32 to index
    %c0_383 = arith.constant 0 : index
    %c0_384 = arith.constant 0 : index
    %587 = vector.load %arg1[%c2_382, %586, %c0_383, %c0_384] : memref<6x1x8x128xf32, #tpu.memory_space<vmem>>, vector<1x1x8x128xf32>
    %588 = vector.shape_cast %587 : vector<1x1x8x128xf32> to vector<8x128xf32>
    %589 = vector.broadcast %56 : f32 to vector<8x128xf32>
    %590 = arith.mulf %589, %588 : vector<8x128xf32>
    %cst_385 = arith.constant 1.000000e+00 : f32
    %591 = vector.broadcast %cst_385 : f32 to vector<8x128xf32>
    %592 = arith.subf %591, %184 : vector<8x128xf32>
    %593 = arith.subf %590, %183 : vector<8x128xf32>
    %594 = vector.broadcast %57 : f32 to vector<8x128xf32>
    %595 = arith.mulf %183, %594 : vector<8x128xf32>
    %596 = vector.broadcast %58 : f32 to vector<8x128xf32>
    %597 = arith.mulf %183, %596 : vector<8x128xf32>
    %598 = vector.broadcast %59 : f32 to vector<8x128xf32>
    %599 = arith.mulf %183, %598 : vector<8x128xf32>
    %600 = vector.broadcast %60 : f32 to vector<8x128xf32>
    %601 = arith.mulf %592, %600 : vector<8x128xf32>
    %602 = vector.broadcast %61 : f32 to vector<8x128xf32>
    %603 = arith.mulf %592, %602 : vector<8x128xf32>
    %604 = vector.broadcast %62 : f32 to vector<8x128xf32>
    %605 = arith.mulf %592, %604 : vector<8x128xf32>
    %606 = vector.broadcast %63 : f32 to vector<8x128xf32>
    %607 = arith.mulf %592, %606 : vector<8x128xf32>
    %608 = vector.broadcast %64 : f32 to vector<8x128xf32>
    %609 = arith.mulf %592, %608 : vector<8x128xf32>
    %610 = vector.broadcast %65 : f32 to vector<8x128xf32>
    %611 = arith.mulf %592, %610 : vector<8x128xf32>
    %cst_386 = arith.constant 1.000000e+00 : f32
    %612 = vector.broadcast %cst_386 : f32 to vector<8x128xf32>
    %613 = arith.addf %612, %601 : vector<8x128xf32>
    %cst_387 = arith.constant 1.000000e+00 : f32
    %614 = vector.broadcast %cst_387 : f32 to vector<8x128xf32>
    %615 = arith.addf %614, %607 : vector<8x128xf32>
    %cst_388 = arith.constant 1.000000e+00 : f32
    %616 = vector.broadcast %cst_388 : f32 to vector<8x128xf32>
    %617 = arith.addf %616, %611 : vector<8x128xf32>
    %618 = arith.subf %603, %599 : vector<8x128xf32>
    %619 = arith.addf %603, %599 : vector<8x128xf32>
    %620 = arith.addf %605, %597 : vector<8x128xf32>
    %621 = arith.subf %605, %597 : vector<8x128xf32>
    %622 = arith.subf %609, %595 : vector<8x128xf32>
    %623 = arith.addf %609, %595 : vector<8x128xf32>
    %624 = vector.broadcast %66 : f32 to vector<8x128xf32>
    %625 = arith.mulf %590, %624 : vector<8x128xf32>
    %626 = vector.broadcast %69 : f32 to vector<8x128xf32>
    %627 = arith.mulf %592, %626 : vector<8x128xf32>
    %628 = arith.addf %625, %627 : vector<8x128xf32>
    %629 = vector.broadcast %72 : f32 to vector<8x128xf32>
    %630 = arith.mulf %593, %629 : vector<8x128xf32>
    %631 = arith.addf %628, %630 : vector<8x128xf32>
    %632 = vector.broadcast %67 : f32 to vector<8x128xf32>
    %633 = arith.mulf %590, %632 : vector<8x128xf32>
    %634 = vector.broadcast %70 : f32 to vector<8x128xf32>
    %635 = arith.mulf %592, %634 : vector<8x128xf32>
    %636 = arith.addf %633, %635 : vector<8x128xf32>
    %637 = vector.broadcast %73 : f32 to vector<8x128xf32>
    %638 = arith.mulf %593, %637 : vector<8x128xf32>
    %639 = arith.addf %636, %638 : vector<8x128xf32>
    %640 = vector.broadcast %68 : f32 to vector<8x128xf32>
    %641 = arith.mulf %590, %640 : vector<8x128xf32>
    %642 = vector.broadcast %71 : f32 to vector<8x128xf32>
    %643 = arith.mulf %592, %642 : vector<8x128xf32>
    %644 = arith.addf %641, %643 : vector<8x128xf32>
    %645 = vector.broadcast %74 : f32 to vector<8x128xf32>
    %646 = arith.mulf %593, %645 : vector<8x128xf32>
    %647 = arith.addf %644, %646 : vector<8x128xf32>
    %648 = arith.mulf %443, %613 : vector<8x128xf32>
    %649 = arith.mulf %448, %619 : vector<8x128xf32>
    %650 = arith.addf %648, %649 : vector<8x128xf32>
    %651 = arith.mulf %453, %621 : vector<8x128xf32>
    %652 = arith.addf %650, %651 : vector<8x128xf32>
    %653 = arith.mulf %443, %618 : vector<8x128xf32>
    %654 = arith.mulf %448, %615 : vector<8x128xf32>
    %655 = arith.addf %653, %654 : vector<8x128xf32>
    %656 = arith.mulf %453, %623 : vector<8x128xf32>
    %657 = arith.addf %655, %656 : vector<8x128xf32>
    %658 = arith.mulf %443, %620 : vector<8x128xf32>
    %659 = arith.mulf %448, %622 : vector<8x128xf32>
    %660 = arith.addf %658, %659 : vector<8x128xf32>
    %661 = arith.mulf %453, %617 : vector<8x128xf32>
    %662 = arith.addf %660, %661 : vector<8x128xf32>
    %663 = arith.mulf %443, %631 : vector<8x128xf32>
    %664 = arith.mulf %448, %639 : vector<8x128xf32>
    %665 = arith.addf %663, %664 : vector<8x128xf32>
    %666 = arith.mulf %453, %647 : vector<8x128xf32>
    %667 = arith.addf %665, %666 : vector<8x128xf32>
    %668 = arith.addf %667, %459 : vector<8x128xf32>
    %669 = arith.mulf %464, %613 : vector<8x128xf32>
    %670 = arith.mulf %469, %619 : vector<8x128xf32>
    %671 = arith.addf %669, %670 : vector<8x128xf32>
    %672 = arith.mulf %474, %621 : vector<8x128xf32>
    %673 = arith.addf %671, %672 : vector<8x128xf32>
    %674 = arith.mulf %464, %618 : vector<8x128xf32>
    %675 = arith.mulf %469, %615 : vector<8x128xf32>
    %676 = arith.addf %674, %675 : vector<8x128xf32>
    %677 = arith.mulf %474, %623 : vector<8x128xf32>
    %678 = arith.addf %676, %677 : vector<8x128xf32>
    %679 = arith.mulf %464, %620 : vector<8x128xf32>
    %680 = arith.mulf %469, %622 : vector<8x128xf32>
    %681 = arith.addf %679, %680 : vector<8x128xf32>
    %682 = arith.mulf %474, %617 : vector<8x128xf32>
    %683 = arith.addf %681, %682 : vector<8x128xf32>
    %684 = arith.mulf %464, %631 : vector<8x128xf32>
    %685 = arith.mulf %469, %639 : vector<8x128xf32>
    %686 = arith.addf %684, %685 : vector<8x128xf32>
    %687 = arith.mulf %474, %647 : vector<8x128xf32>
    %688 = arith.addf %686, %687 : vector<8x128xf32>
    %689 = arith.addf %688, %480 : vector<8x128xf32>
    %690 = arith.mulf %485, %613 : vector<8x128xf32>
    %691 = arith.mulf %490, %619 : vector<8x128xf32>
    %692 = arith.addf %690, %691 : vector<8x128xf32>
    %693 = arith.mulf %495, %621 : vector<8x128xf32>
    %694 = arith.addf %692, %693 : vector<8x128xf32>
    %695 = arith.mulf %485, %618 : vector<8x128xf32>
    %696 = arith.mulf %490, %615 : vector<8x128xf32>
    %697 = arith.addf %695, %696 : vector<8x128xf32>
    %698 = arith.mulf %495, %623 : vector<8x128xf32>
    %699 = arith.addf %697, %698 : vector<8x128xf32>
    %700 = arith.mulf %485, %620 : vector<8x128xf32>
    %701 = arith.mulf %490, %622 : vector<8x128xf32>
    %702 = arith.addf %700, %701 : vector<8x128xf32>
    %703 = arith.mulf %495, %617 : vector<8x128xf32>
    %704 = arith.addf %702, %703 : vector<8x128xf32>
    %705 = arith.mulf %485, %631 : vector<8x128xf32>
    %706 = arith.mulf %490, %639 : vector<8x128xf32>
    %707 = arith.addf %705, %706 : vector<8x128xf32>
    %708 = arith.mulf %495, %647 : vector<8x128xf32>
    %709 = arith.addf %707, %708 : vector<8x128xf32>
    %710 = arith.addf %709, %501 : vector<8x128xf32>
    %711 = vector.broadcast %77 : f32 to vector<8x128xf32>
    %712 = arith.mulf %689, %711 : vector<8x128xf32>
    %713 = vector.broadcast %76 : f32 to vector<8x128xf32>
    %714 = arith.mulf %710, %713 : vector<8x128xf32>
    %715 = arith.subf %712, %714 : vector<8x128xf32>
    %716 = vector.broadcast %75 : f32 to vector<8x128xf32>
    %717 = arith.mulf %710, %716 : vector<8x128xf32>
    %718 = vector.broadcast %77 : f32 to vector<8x128xf32>
    %719 = arith.mulf %668, %718 : vector<8x128xf32>
    %720 = arith.subf %717, %719 : vector<8x128xf32>
    %721 = vector.broadcast %76 : f32 to vector<8x128xf32>
    %722 = arith.mulf %668, %721 : vector<8x128xf32>
    %723 = vector.broadcast %75 : f32 to vector<8x128xf32>
    %724 = arith.mulf %689, %723 : vector<8x128xf32>
    %725 = arith.subf %722, %724 : vector<8x128xf32>
    %726 = vector.broadcast %78 : f32 to vector<8x128xf32>
    %727 = arith.subf %726, %715 : vector<8x128xf32>
    %728 = vector.broadcast %79 : f32 to vector<8x128xf32>
    %729 = arith.subf %728, %720 : vector<8x128xf32>
    %730 = vector.broadcast %80 : f32 to vector<8x128xf32>
    %731 = arith.subf %730, %725 : vector<8x128xf32>
    %732 = vector.broadcast %75 : f32 to vector<8x128xf32>
    %733 = arith.mulf %652, %732 : vector<8x128xf32>
    %734 = vector.broadcast %76 : f32 to vector<8x128xf32>
    %735 = arith.mulf %673, %734 : vector<8x128xf32>
    %736 = arith.addf %733, %735 : vector<8x128xf32>
    %737 = vector.broadcast %77 : f32 to vector<8x128xf32>
    %738 = arith.mulf %694, %737 : vector<8x128xf32>
    %739 = arith.addf %736, %738 : vector<8x128xf32>
    %740 = arith.mulf %652, %727 : vector<8x128xf32>
    %741 = arith.mulf %673, %729 : vector<8x128xf32>
    %742 = arith.addf %740, %741 : vector<8x128xf32>
    %743 = arith.mulf %694, %731 : vector<8x128xf32>
    %744 = arith.addf %742, %743 : vector<8x128xf32>
    %c18_389 = arith.constant 18 : index
    %745 = arith.index_cast %163 : i32 to index
    %c0_390 = arith.constant 0 : index
    %c0_391 = arith.constant 0 : index
    %746 = vector.load %arg5[%c18_389, %745, %c0_390, %c0_391] : memref<36x1x8x128xf32, #tpu.memory_space<vmem>>, vector<1x1x8x128xf32>
    %747 = vector.shape_cast %746 : vector<1x1x8x128xf32> to vector<8x128xf32>
    %748 = vector.shape_cast %739 : vector<8x128xf32> to vector<1x1x8x128xf32>
    tpu.vector_store %arg5[%c18_389, %745, %c0_390, %c0_391], %748 {strides = array<i32>} : memref<36x1x8x128xf32, #tpu.memory_space<vmem>>, vector<1x1x8x128xf32>,
    %c21_392 = arith.constant 21 : index
    %749 = arith.index_cast %163 : i32 to index
    %c0_393 = arith.constant 0 : index
    %c0_394 = arith.constant 0 : index
    %750 = vector.load %arg5[%c21_392, %749, %c0_393, %c0_394] : memref<36x1x8x128xf32, #tpu.memory_space<vmem>>, vector<1x1x8x128xf32>
    %751 = vector.shape_cast %750 : vector<1x1x8x128xf32> to vector<8x128xf32>
    %752 = vector.shape_cast %744 : vector<8x128xf32> to vector<1x1x8x128xf32>
    tpu.vector_store %arg5[%c21_392, %749, %c0_393, %c0_394], %752 {strides = array<i32>} : memref<36x1x8x128xf32, #tpu.memory_space<vmem>>, vector<1x1x8x128xf32>,
    %753 = vector.broadcast %75 : f32 to vector<8x128xf32>
    %754 = arith.mulf %657, %753 : vector<8x128xf32>
    %755 = vector.broadcast %76 : f32 to vector<8x128xf32>
    %756 = arith.mulf %678, %755 : vector<8x128xf32>
    %757 = arith.addf %754, %756 : vector<8x128xf32>
    %758 = vector.broadcast %77 : f32 to vector<8x128xf32>
    %759 = arith.mulf %699, %758 : vector<8x128xf32>
    %760 = arith.addf %757, %759 : vector<8x128xf32>
    %761 = arith.mulf %657, %727 : vector<8x128xf32>
    %762 = arith.mulf %678, %729 : vector<8x128xf32>
    %763 = arith.addf %761, %762 : vector<8x128xf32>
    %764 = arith.mulf %699, %731 : vector<8x128xf32>
    %765 = arith.addf %763, %764 : vector<8x128xf32>
    %c19_395 = arith.constant 19 : index
    %766 = arith.index_cast %163 : i32 to index
    %c0_396 = arith.constant 0 : index
    %c0_397 = arith.constant 0 : index
    %767 = vector.load %arg5[%c19_395, %766, %c0_396, %c0_397] : memref<36x1x8x128xf32, #tpu.memory_space<vmem>>, vector<1x1x8x128xf32>
    %768 = vector.shape_cast %767 : vector<1x1x8x128xf32> to vector<8x128xf32>
    %769 = vector.shape_cast %760 : vector<8x128xf32> to vector<1x1x8x128xf32>
    tpu.vector_store %arg5[%c19_395, %766, %c0_396, %c0_397], %769 {strides = array<i32>} : memref<36x1x8x128xf32, #tpu.memory_space<vmem>>, vector<1x1x8x128xf32>,
    %c22_398 = arith.constant 22 : index
    %770 = arith.index_cast %163 : i32 to index
    %c0_399 = arith.constant 0 : index
    %c0_400 = arith.constant 0 : index
    %771 = vector.load %arg5[%c22_398, %770, %c0_399, %c0_400] : memref<36x1x8x128xf32, #tpu.memory_space<vmem>>, vector<1x1x8x128xf32>
    %772 = vector.shape_cast %771 : vector<1x1x8x128xf32> to vector<8x128xf32>
    %773 = vector.shape_cast %765 : vector<8x128xf32> to vector<1x1x8x128xf32>
    tpu.vector_store %arg5[%c22_398, %770, %c0_399, %c0_400], %773 {strides = array<i32>} : memref<36x1x8x128xf32, #tpu.memory_space<vmem>>, vector<1x1x8x128xf32>,
    %774 = vector.broadcast %75 : f32 to vector<8x128xf32>
    %775 = arith.mulf %662, %774 : vector<8x128xf32>
    %776 = vector.broadcast %76 : f32 to vector<8x128xf32>
    %777 = arith.mulf %683, %776 : vector<8x128xf32>
    %778 = arith.addf %775, %777 : vector<8x128xf32>
    %779 = vector.broadcast %77 : f32 to vector<8x128xf32>
    %780 = arith.mulf %704, %779 : vector<8x128xf32>
    %781 = arith.addf %778, %780 : vector<8x128xf32>
    %782 = arith.mulf %662, %727 : vector<8x128xf32>
    %783 = arith.mulf %683, %729 : vector<8x128xf32>
    %784 = arith.addf %782, %783 : vector<8x128xf32>
    %785 = arith.mulf %704, %731 : vector<8x128xf32>
    %786 = arith.addf %784, %785 : vector<8x128xf32>
    %c20_401 = arith.constant 20 : index
    %787 = arith.index_cast %163 : i32 to index
    %c0_402 = arith.constant 0 : index
    %c0_403 = arith.constant 0 : index
    %788 = vector.load %arg5[%c20_401, %787, %c0_402, %c0_403] : memref<36x1x8x128xf32, #tpu.memory_space<vmem>>, vector<1x1x8x128xf32>
    %789 = vector.shape_cast %788 : vector<1x1x8x128xf32> to vector<8x128xf32>
    %790 = vector.shape_cast %781 : vector<8x128xf32> to vector<1x1x8x128xf32>
    tpu.vector_store %arg5[%c20_401, %787, %c0_402, %c0_403], %790 {strides = array<i32>} : memref<36x1x8x128xf32, #tpu.memory_space<vmem>>, vector<1x1x8x128xf32>,
    %c23_404 = arith.constant 23 : index
    %791 = arith.index_cast %163 : i32 to index
    %c0_405 = arith.constant 0 : index
    %c0_406 = arith.constant 0 : index
    %792 = vector.load %arg5[%c23_404, %791, %c0_405, %c0_406] : memref<36x1x8x128xf32, #tpu.memory_space<vmem>>, vector<1x1x8x128xf32>
    %793 = vector.shape_cast %792 : vector<1x1x8x128xf32> to vector<8x128xf32>
    %794 = vector.shape_cast %786 : vector<8x128xf32> to vector<1x1x8x128xf32>
    tpu.vector_store %arg5[%c23_404, %791, %c0_405, %c0_406], %794 {strides = array<i32>} : memref<36x1x8x128xf32, #tpu.memory_space<vmem>>, vector<1x1x8x128xf32>,
    %c3_407 = arith.constant 3 : index
    %795 = arith.index_cast %163 : i32 to index
    %c0_408 = arith.constant 0 : index
    %c0_409 = arith.constant 0 : index
    %796 = vector.load %arg1[%c3_407, %795, %c0_408, %c0_409] : memref<6x1x8x128xf32, #tpu.memory_space<vmem>>, vector<1x1x8x128xf32>
    %797 = vector.shape_cast %796 : vector<1x1x8x128xf32> to vector<8x128xf32>
    %798 = vector.broadcast %81 : f32 to vector<8x128xf32>
    %799 = arith.mulf %798, %797 : vector<8x128xf32>
    %cst_410 = arith.constant 1.000000e+00 : f32
    %800 = vector.broadcast %cst_410 : f32 to vector<8x128xf32>
    %801 = arith.subf %800, %191 : vector<8x128xf32>
    %802 = arith.subf %799, %190 : vector<8x128xf32>
    %803 = vector.broadcast %82 : f32 to vector<8x128xf32>
    %804 = arith.mulf %190, %803 : vector<8x128xf32>
    %805 = vector.broadcast %83 : f32 to vector<8x128xf32>
    %806 = arith.mulf %190, %805 : vector<8x128xf32>
    %807 = vector.broadcast %84 : f32 to vector<8x128xf32>
    %808 = arith.mulf %190, %807 : vector<8x128xf32>
    %809 = vector.broadcast %85 : f32 to vector<8x128xf32>
    %810 = arith.mulf %801, %809 : vector<8x128xf32>
    %811 = vector.broadcast %86 : f32 to vector<8x128xf32>
    %812 = arith.mulf %801, %811 : vector<8x128xf32>
    %813 = vector.broadcast %87 : f32 to vector<8x128xf32>
    %814 = arith.mulf %801, %813 : vector<8x128xf32>
    %815 = vector.broadcast %88 : f32 to vector<8x128xf32>
    %816 = arith.mulf %801, %815 : vector<8x128xf32>
    %817 = vector.broadcast %89 : f32 to vector<8x128xf32>
    %818 = arith.mulf %801, %817 : vector<8x128xf32>
    %819 = vector.broadcast %90 : f32 to vector<8x128xf32>
    %820 = arith.mulf %801, %819 : vector<8x128xf32>
    %cst_411 = arith.constant 1.000000e+00 : f32
    %821 = vector.broadcast %cst_411 : f32 to vector<8x128xf32>
    %822 = arith.addf %821, %810 : vector<8x128xf32>
    %cst_412 = arith.constant 1.000000e+00 : f32
    %823 = vector.broadcast %cst_412 : f32 to vector<8x128xf32>
    %824 = arith.addf %823, %816 : vector<8x128xf32>
    %cst_413 = arith.constant 1.000000e+00 : f32
    %825 = vector.broadcast %cst_413 : f32 to vector<8x128xf32>
    %826 = arith.addf %825, %820 : vector<8x128xf32>
    %827 = arith.subf %812, %808 : vector<8x128xf32>
    %828 = arith.addf %812, %808 : vector<8x128xf32>
    %829 = arith.addf %814, %806 : vector<8x128xf32>
    %830 = arith.subf %814, %806 : vector<8x128xf32>
    %831 = arith.subf %818, %804 : vector<8x128xf32>
    %832 = arith.addf %818, %804 : vector<8x128xf32>
    %833 = vector.broadcast %91 : f32 to vector<8x128xf32>
    %834 = arith.mulf %799, %833 : vector<8x128xf32>
    %835 = vector.broadcast %94 : f32 to vector<8x128xf32>
    %836 = arith.mulf %801, %835 : vector<8x128xf32>
    %837 = arith.addf %834, %836 : vector<8x128xf32>
    %838 = vector.broadcast %97 : f32 to vector<8x128xf32>
    %839 = arith.mulf %802, %838 : vector<8x128xf32>
    %840 = arith.addf %837, %839 : vector<8x128xf32>
    %841 = vector.broadcast %92 : f32 to vector<8x128xf32>
    %842 = arith.mulf %799, %841 : vector<8x128xf32>
    %843 = vector.broadcast %95 : f32 to vector<8x128xf32>
    %844 = arith.mulf %801, %843 : vector<8x128xf32>
    %845 = arith.addf %842, %844 : vector<8x128xf32>
    %846 = vector.broadcast %98 : f32 to vector<8x128xf32>
    %847 = arith.mulf %802, %846 : vector<8x128xf32>
    %848 = arith.addf %845, %847 : vector<8x128xf32>
    %849 = vector.broadcast %93 : f32 to vector<8x128xf32>
    %850 = arith.mulf %799, %849 : vector<8x128xf32>
    %851 = vector.broadcast %96 : f32 to vector<8x128xf32>
    %852 = arith.mulf %801, %851 : vector<8x128xf32>
    %853 = arith.addf %850, %852 : vector<8x128xf32>
    %854 = vector.broadcast %99 : f32 to vector<8x128xf32>
    %855 = arith.mulf %802, %854 : vector<8x128xf32>
    %856 = arith.addf %853, %855 : vector<8x128xf32>
    %857 = arith.mulf %652, %822 : vector<8x128xf32>
    %858 = arith.mulf %657, %828 : vector<8x128xf32>
    %859 = arith.addf %857, %858 : vector<8x128xf32>
    %860 = arith.mulf %662, %830 : vector<8x128xf32>
    %861 = arith.addf %859, %860 : vector<8x128xf32>
    %862 = arith.mulf %652, %827 : vector<8x128xf32>
    %863 = arith.mulf %657, %824 : vector<8x128xf32>
    %864 = arith.addf %862, %863 : vector<8x128xf32>
    %865 = arith.mulf %662, %832 : vector<8x128xf32>
    %866 = arith.addf %864, %865 : vector<8x128xf32>
    %867 = arith.mulf %652, %829 : vector<8x128xf32>
    %868 = arith.mulf %657, %831 : vector<8x128xf32>
    %869 = arith.addf %867, %868 : vector<8x128xf32>
    %870 = arith.mulf %662, %826 : vector<8x128xf32>
    %871 = arith.addf %869, %870 : vector<8x128xf32>
    %872 = arith.mulf %652, %840 : vector<8x128xf32>
    %873 = arith.mulf %657, %848 : vector<8x128xf32>
    %874 = arith.addf %872, %873 : vector<8x128xf32>
    %875 = arith.mulf %662, %856 : vector<8x128xf32>
    %876 = arith.addf %874, %875 : vector<8x128xf32>
    %877 = arith.addf %876, %668 : vector<8x128xf32>
    %878 = arith.mulf %673, %822 : vector<8x128xf32>
    %879 = arith.mulf %678, %828 : vector<8x128xf32>
    %880 = arith.addf %878, %879 : vector<8x128xf32>
    %881 = arith.mulf %683, %830 : vector<8x128xf32>
    %882 = arith.addf %880, %881 : vector<8x128xf32>
    %883 = arith.mulf %673, %827 : vector<8x128xf32>
    %884 = arith.mulf %678, %824 : vector<8x128xf32>
    %885 = arith.addf %883, %884 : vector<8x128xf32>
    %886 = arith.mulf %683, %832 : vector<8x128xf32>
    %887 = arith.addf %885, %886 : vector<8x128xf32>
    %888 = arith.mulf %673, %829 : vector<8x128xf32>
    %889 = arith.mulf %678, %831 : vector<8x128xf32>
    %890 = arith.addf %888, %889 : vector<8x128xf32>
    %891 = arith.mulf %683, %826 : vector<8x128xf32>
    %892 = arith.addf %890, %891 : vector<8x128xf32>
    %893 = arith.mulf %673, %840 : vector<8x128xf32>
    %894 = arith.mulf %678, %848 : vector<8x128xf32>
    %895 = arith.addf %893, %894 : vector<8x128xf32>
    %896 = arith.mulf %683, %856 : vector<8x128xf32>
    %897 = arith.addf %895, %896 : vector<8x128xf32>
    %898 = arith.addf %897, %689 : vector<8x128xf32>
    %899 = arith.mulf %694, %822 : vector<8x128xf32>
    %900 = arith.mulf %699, %828 : vector<8x128xf32>
    %901 = arith.addf %899, %900 : vector<8x128xf32>
    %902 = arith.mulf %704, %830 : vector<8x128xf32>
    %903 = arith.addf %901, %902 : vector<8x128xf32>
    %904 = arith.mulf %694, %827 : vector<8x128xf32>
    %905 = arith.mulf %699, %824 : vector<8x128xf32>
    %906 = arith.addf %904, %905 : vector<8x128xf32>
    %907 = arith.mulf %704, %832 : vector<8x128xf32>
    %908 = arith.addf %906, %907 : vector<8x128xf32>
    %909 = arith.mulf %694, %829 : vector<8x128xf32>
    %910 = arith.mulf %699, %831 : vector<8x128xf32>
    %911 = arith.addf %909, %910 : vector<8x128xf32>
    %912 = arith.mulf %704, %826 : vector<8x128xf32>
    %913 = arith.addf %911, %912 : vector<8x128xf32>
    %914 = arith.mulf %694, %840 : vector<8x128xf32>
    %915 = arith.mulf %699, %848 : vector<8x128xf32>
    %916 = arith.addf %914, %915 : vector<8x128xf32>
    %917 = arith.mulf %704, %856 : vector<8x128xf32>
    %918 = arith.addf %916, %917 : vector<8x128xf32>
    %919 = arith.addf %918, %710 : vector<8x128xf32>
    %920 = vector.broadcast %102 : f32 to vector<8x128xf32>
    %921 = arith.mulf %898, %920 : vector<8x128xf32>
    %922 = vector.broadcast %101 : f32 to vector<8x128xf32>
    %923 = arith.mulf %919, %922 : vector<8x128xf32>
    %924 = arith.subf %921, %923 : vector<8x128xf32>
    %925 = vector.broadcast %100 : f32 to vector<8x128xf32>
    %926 = arith.mulf %919, %925 : vector<8x128xf32>
    %927 = vector.broadcast %102 : f32 to vector<8x128xf32>
    %928 = arith.mulf %877, %927 : vector<8x128xf32>
    %929 = arith.subf %926, %928 : vector<8x128xf32>
    %930 = vector.broadcast %101 : f32 to vector<8x128xf32>
    %931 = arith.mulf %877, %930 : vector<8x128xf32>
    %932 = vector.broadcast %100 : f32 to vector<8x128xf32>
    %933 = arith.mulf %898, %932 : vector<8x128xf32>
    %934 = arith.subf %931, %933 : vector<8x128xf32>
    %935 = vector.broadcast %103 : f32 to vector<8x128xf32>
    %936 = arith.subf %935, %924 : vector<8x128xf32>
    %937 = vector.broadcast %104 : f32 to vector<8x128xf32>
    %938 = arith.subf %937, %929 : vector<8x128xf32>
    %939 = vector.broadcast %105 : f32 to vector<8x128xf32>
    %940 = arith.subf %939, %934 : vector<8x128xf32>
    %941 = vector.broadcast %100 : f32 to vector<8x128xf32>
    %942 = arith.mulf %861, %941 : vector<8x128xf32>
    %943 = vector.broadcast %101 : f32 to vector<8x128xf32>
    %944 = arith.mulf %882, %943 : vector<8x128xf32>
    %945 = arith.addf %942, %944 : vector<8x128xf32>
    %946 = vector.broadcast %102 : f32 to vector<8x128xf32>
    %947 = arith.mulf %903, %946 : vector<8x128xf32>
    %948 = arith.addf %945, %947 : vector<8x128xf32>
    %949 = arith.mulf %861, %936 : vector<8x128xf32>
    %950 = arith.mulf %882, %938 : vector<8x128xf32>
    %951 = arith.addf %949, %950 : vector<8x128xf32>
    %952 = arith.mulf %903, %940 : vector<8x128xf32>
    %953 = arith.addf %951, %952 : vector<8x128xf32>
    %c24_414 = arith.constant 24 : index
    %954 = arith.index_cast %163 : i32 to index
    %c0_415 = arith.constant 0 : index
    %c0_416 = arith.constant 0 : index
    %955 = vector.load %arg5[%c24_414, %954, %c0_415, %c0_416] : memref<36x1x8x128xf32, #tpu.memory_space<vmem>>, vector<1x1x8x128xf32>
    %956 = vector.shape_cast %955 : vector<1x1x8x128xf32> to vector<8x128xf32>
    %957 = vector.shape_cast %948 : vector<8x128xf32> to vector<1x1x8x128xf32>
    tpu.vector_store %arg5[%c24_414, %954, %c0_415, %c0_416], %957 {strides = array<i32>} : memref<36x1x8x128xf32, #tpu.memory_space<vmem>>, vector<1x1x8x128xf32>,
    %c27 = arith.constant 27 : index
    %958 = arith.index_cast %163 : i32 to index
    %c0_417 = arith.constant 0 : index
    %c0_418 = arith.constant 0 : index
    %959 = vector.load %arg5[%c27, %958, %c0_417, %c0_418] : memref<36x1x8x128xf32, #tpu.memory_space<vmem>>, vector<1x1x8x128xf32>
    %960 = vector.shape_cast %959 : vector<1x1x8x128xf32> to vector<8x128xf32>
    %961 = vector.shape_cast %953 : vector<8x128xf32> to vector<1x1x8x128xf32>
    tpu.vector_store %arg5[%c27, %958, %c0_417, %c0_418], %961 {strides = array<i32>} : memref<36x1x8x128xf32, #tpu.memory_space<vmem>>, vector<1x1x8x128xf32>,
    %962 = vector.broadcast %100 : f32 to vector<8x128xf32>
    %963 = arith.mulf %866, %962 : vector<8x128xf32>
    %964 = vector.broadcast %101 : f32 to vector<8x128xf32>
    %965 = arith.mulf %887, %964 : vector<8x128xf32>
    %966 = arith.addf %963, %965 : vector<8x128xf32>
    %967 = vector.broadcast %102 : f32 to vector<8x128xf32>
    %968 = arith.mulf %908, %967 : vector<8x128xf32>
    %969 = arith.addf %966, %968 : vector<8x128xf32>
    %970 = arith.mulf %866, %936 : vector<8x128xf32>
    %971 = arith.mulf %887, %938 : vector<8x128xf32>
    %972 = arith.addf %970, %971 : vector<8x128xf32>
    %973 = arith.mulf %908, %940 : vector<8x128xf32>
    %974 = arith.addf %972, %973 : vector<8x128xf32>
    %c25 = arith.constant 25 : index
    %975 = arith.index_cast %163 : i32 to index
    %c0_419 = arith.constant 0 : index
    %c0_420 = arith.constant 0 : index
    %976 = vector.load %arg5[%c25, %975, %c0_419, %c0_420] : memref<36x1x8x128xf32, #tpu.memory_space<vmem>>, vector<1x1x8x128xf32>
    %977 = vector.shape_cast %976 : vector<1x1x8x128xf32> to vector<8x128xf32>
    %978 = vector.shape_cast %969 : vector<8x128xf32> to vector<1x1x8x128xf32>
    tpu.vector_store %arg5[%c25, %975, %c0_419, %c0_420], %978 {strides = array<i32>} : memref<36x1x8x128xf32, #tpu.memory_space<vmem>>, vector<1x1x8x128xf32>,
    %c28 = arith.constant 28 : index
    %979 = arith.index_cast %163 : i32 to index
    %c0_421 = arith.constant 0 : index
    %c0_422 = arith.constant 0 : index
    %980 = vector.load %arg5[%c28, %979, %c0_421, %c0_422] : memref<36x1x8x128xf32, #tpu.memory_space<vmem>>, vector<1x1x8x128xf32>
    %981 = vector.shape_cast %980 : vector<1x1x8x128xf32> to vector<8x128xf32>
    %982 = vector.shape_cast %974 : vector<8x128xf32> to vector<1x1x8x128xf32>
    tpu.vector_store %arg5[%c28, %979, %c0_421, %c0_422], %982 {strides = array<i32>} : memref<36x1x8x128xf32, #tpu.memory_space<vmem>>, vector<1x1x8x128xf32>,
    %983 = vector.broadcast %100 : f32 to vector<8x128xf32>
    %984 = arith.mulf %871, %983 : vector<8x128xf32>
    %985 = vector.broadcast %101 : f32 to vector<8x128xf32>
    %986 = arith.mulf %892, %985 : vector<8x128xf32>
    %987 = arith.addf %984, %986 : vector<8x128xf32>
    %988 = vector.broadcast %102 : f32 to vector<8x128xf32>
    %989 = arith.mulf %913, %988 : vector<8x128xf32>
    %990 = arith.addf %987, %989 : vector<8x128xf32>
    %991 = arith.mulf %871, %936 : vector<8x128xf32>
    %992 = arith.mulf %892, %938 : vector<8x128xf32>
    %993 = arith.addf %991, %992 : vector<8x128xf32>
    %994 = arith.mulf %913, %940 : vector<8x128xf32>
    %995 = arith.addf %993, %994 : vector<8x128xf32>
    %c26 = arith.constant 26 : index
    %996 = arith.index_cast %163 : i32 to index
    %c0_423 = arith.constant 0 : index
    %c0_424 = arith.constant 0 : index
    %997 = vector.load %arg5[%c26, %996, %c0_423, %c0_424] : memref<36x1x8x128xf32, #tpu.memory_space<vmem>>, vector<1x1x8x128xf32>
    %998 = vector.shape_cast %997 : vector<1x1x8x128xf32> to vector<8x128xf32>
    %999 = vector.shape_cast %990 : vector<8x128xf32> to vector<1x1x8x128xf32>
    tpu.vector_store %arg5[%c26, %996, %c0_423, %c0_424], %999 {strides = array<i32>} : memref<36x1x8x128xf32, #tpu.memory_space<vmem>>, vector<1x1x8x128xf32>,
    %c29 = arith.constant 29 : index
    %1000 = arith.index_cast %163 : i32 to index
    %c0_425 = arith.constant 0 : index
    %c0_426 = arith.constant 0 : index
    %1001 = vector.load %arg5[%c29, %1000, %c0_425, %c0_426] : memref<36x1x8x128xf32, #tpu.memory_space<vmem>>, vector<1x1x8x128xf32>
    %1002 = vector.shape_cast %1001 : vector<1x1x8x128xf32> to vector<8x128xf32>
    %1003 = vector.shape_cast %995 : vector<8x128xf32> to vector<1x1x8x128xf32>
    tpu.vector_store %arg5[%c29, %1000, %c0_425, %c0_426], %1003 {strides = array<i32>} : memref<36x1x8x128xf32, #tpu.memory_space<vmem>>, vector<1x1x8x128xf32>,
    %c4_427 = arith.constant 4 : index
    %1004 = arith.index_cast %163 : i32 to index
    %c0_428 = arith.constant 0 : index
    %c0_429 = arith.constant 0 : index
    %1005 = vector.load %arg1[%c4_427, %1004, %c0_428, %c0_429] : memref<6x1x8x128xf32, #tpu.memory_space<vmem>>, vector<1x1x8x128xf32>
    %1006 = vector.shape_cast %1005 : vector<1x1x8x128xf32> to vector<8x128xf32>
    %1007 = vector.broadcast %106 : f32 to vector<8x128xf32>
    %1008 = arith.mulf %1007, %1006 : vector<8x128xf32>
    %cst_430 = arith.constant 1.000000e+00 : f32
    %1009 = vector.broadcast %cst_430 : f32 to vector<8x128xf32>
    %1010 = arith.subf %1009, %198 : vector<8x128xf32>
    %1011 = arith.subf %1008, %197 : vector<8x128xf32>
    %1012 = vector.broadcast %107 : f32 to vector<8x128xf32>
    %1013 = arith.mulf %197, %1012 : vector<8x128xf32>
    %1014 = vector.broadcast %108 : f32 to vector<8x128xf32>
    %1015 = arith.mulf %197, %1014 : vector<8x128xf32>
    %1016 = vector.broadcast %109 : f32 to vector<8x128xf32>
    %1017 = arith.mulf %197, %1016 : vector<8x128xf32>
    %1018 = vector.broadcast %110 : f32 to vector<8x128xf32>
    %1019 = arith.mulf %1010, %1018 : vector<8x128xf32>
    %1020 = vector.broadcast %111 : f32 to vector<8x128xf32>
    %1021 = arith.mulf %1010, %1020 : vector<8x128xf32>
    %1022 = vector.broadcast %112 : f32 to vector<8x128xf32>
    %1023 = arith.mulf %1010, %1022 : vector<8x128xf32>
    %1024 = vector.broadcast %113 : f32 to vector<8x128xf32>
    %1025 = arith.mulf %1010, %1024 : vector<8x128xf32>
    %1026 = vector.broadcast %114 : f32 to vector<8x128xf32>
    %1027 = arith.mulf %1010, %1026 : vector<8x128xf32>
    %1028 = vector.broadcast %115 : f32 to vector<8x128xf32>
    %1029 = arith.mulf %1010, %1028 : vector<8x128xf32>
    %cst_431 = arith.constant 1.000000e+00 : f32
    %1030 = vector.broadcast %cst_431 : f32 to vector<8x128xf32>
    %1031 = arith.addf %1030, %1019 : vector<8x128xf32>
    %cst_432 = arith.constant 1.000000e+00 : f32
    %1032 = vector.broadcast %cst_432 : f32 to vector<8x128xf32>
    %1033 = arith.addf %1032, %1025 : vector<8x128xf32>
    %cst_433 = arith.constant 1.000000e+00 : f32
    %1034 = vector.broadcast %cst_433 : f32 to vector<8x128xf32>
    %1035 = arith.addf %1034, %1029 : vector<8x128xf32>
    %1036 = arith.subf %1021, %1017 : vector<8x128xf32>
    %1037 = arith.addf %1021, %1017 : vector<8x128xf32>
    %1038 = arith.addf %1023, %1015 : vector<8x128xf32>
    %1039 = arith.subf %1023, %1015 : vector<8x128xf32>
    %1040 = arith.subf %1027, %1013 : vector<8x128xf32>
    %1041 = arith.addf %1027, %1013 : vector<8x128xf32>
    %1042 = vector.broadcast %116 : f32 to vector<8x128xf32>
    %1043 = arith.mulf %1008, %1042 : vector<8x128xf32>
    %1044 = vector.broadcast %119 : f32 to vector<8x128xf32>
    %1045 = arith.mulf %1010, %1044 : vector<8x128xf32>
    %1046 = arith.addf %1043, %1045 : vector<8x128xf32>
    %1047 = vector.broadcast %122 : f32 to vector<8x128xf32>
    %1048 = arith.mulf %1011, %1047 : vector<8x128xf32>
    %1049 = arith.addf %1046, %1048 : vector<8x128xf32>
    %1050 = vector.broadcast %117 : f32 to vector<8x128xf32>
    %1051 = arith.mulf %1008, %1050 : vector<8x128xf32>
    %1052 = vector.broadcast %120 : f32 to vector<8x128xf32>
    %1053 = arith.mulf %1010, %1052 : vector<8x128xf32>
    %1054 = arith.addf %1051, %1053 : vector<8x128xf32>
    %1055 = vector.broadcast %123 : f32 to vector<8x128xf32>
    %1056 = arith.mulf %1011, %1055 : vector<8x128xf32>
    %1057 = arith.addf %1054, %1056 : vector<8x128xf32>
    %1058 = vector.broadcast %118 : f32 to vector<8x128xf32>
    %1059 = arith.mulf %1008, %1058 : vector<8x128xf32>
    %1060 = vector.broadcast %121 : f32 to vector<8x128xf32>
    %1061 = arith.mulf %1010, %1060 : vector<8x128xf32>
    %1062 = arith.addf %1059, %1061 : vector<8x128xf32>
    %1063 = vector.broadcast %124 : f32 to vector<8x128xf32>
    %1064 = arith.mulf %1011, %1063 : vector<8x128xf32>
    %1065 = arith.addf %1062, %1064 : vector<8x128xf32>
    %1066 = arith.mulf %861, %1031 : vector<8x128xf32>
    %1067 = arith.mulf %866, %1037 : vector<8x128xf32>
    %1068 = arith.addf %1066, %1067 : vector<8x128xf32>
    %1069 = arith.mulf %871, %1039 : vector<8x128xf32>
    %1070 = arith.addf %1068, %1069 : vector<8x128xf32>
    %1071 = arith.mulf %861, %1036 : vector<8x128xf32>
    %1072 = arith.mulf %866, %1033 : vector<8x128xf32>
    %1073 = arith.addf %1071, %1072 : vector<8x128xf32>
    %1074 = arith.mulf %871, %1041 : vector<8x128xf32>
    %1075 = arith.addf %1073, %1074 : vector<8x128xf32>
    %1076 = arith.mulf %861, %1038 : vector<8x128xf32>
    %1077 = arith.mulf %866, %1040 : vector<8x128xf32>
    %1078 = arith.addf %1076, %1077 : vector<8x128xf32>
    %1079 = arith.mulf %871, %1035 : vector<8x128xf32>
    %1080 = arith.addf %1078, %1079 : vector<8x128xf32>
    %1081 = arith.mulf %861, %1049 : vector<8x128xf32>
    %1082 = arith.mulf %866, %1057 : vector<8x128xf32>
    %1083 = arith.addf %1081, %1082 : vector<8x128xf32>
    %1084 = arith.mulf %871, %1065 : vector<8x128xf32>
    %1085 = arith.addf %1083, %1084 : vector<8x128xf32>
    %1086 = arith.addf %1085, %877 : vector<8x128xf32>
    %1087 = arith.mulf %882, %1031 : vector<8x128xf32>
    %1088 = arith.mulf %887, %1037 : vector<8x128xf32>
    %1089 = arith.addf %1087, %1088 : vector<8x128xf32>
    %1090 = arith.mulf %892, %1039 : vector<8x128xf32>
    %1091 = arith.addf %1089, %1090 : vector<8x128xf32>
    %1092 = arith.mulf %882, %1036 : vector<8x128xf32>
    %1093 = arith.mulf %887, %1033 : vector<8x128xf32>
    %1094 = arith.addf %1092, %1093 : vector<8x128xf32>
    %1095 = arith.mulf %892, %1041 : vector<8x128xf32>
    %1096 = arith.addf %1094, %1095 : vector<8x128xf32>
    %1097 = arith.mulf %882, %1038 : vector<8x128xf32>
    %1098 = arith.mulf %887, %1040 : vector<8x128xf32>
    %1099 = arith.addf %1097, %1098 : vector<8x128xf32>
    %1100 = arith.mulf %892, %1035 : vector<8x128xf32>
    %1101 = arith.addf %1099, %1100 : vector<8x128xf32>
    %1102 = arith.mulf %882, %1049 : vector<8x128xf32>
    %1103 = arith.mulf %887, %1057 : vector<8x128xf32>
    %1104 = arith.addf %1102, %1103 : vector<8x128xf32>
    %1105 = arith.mulf %892, %1065 : vector<8x128xf32>
    %1106 = arith.addf %1104, %1105 : vector<8x128xf32>
    %1107 = arith.addf %1106, %898 : vector<8x128xf32>
    %1108 = arith.mulf %903, %1031 : vector<8x128xf32>
    %1109 = arith.mulf %908, %1037 : vector<8x128xf32>
    %1110 = arith.addf %1108, %1109 : vector<8x128xf32>
    %1111 = arith.mulf %913, %1039 : vector<8x128xf32>
    %1112 = arith.addf %1110, %1111 : vector<8x128xf32>
    %1113 = arith.mulf %903, %1036 : vector<8x128xf32>
    %1114 = arith.mulf %908, %1033 : vector<8x128xf32>
    %1115 = arith.addf %1113, %1114 : vector<8x128xf32>
    %1116 = arith.mulf %913, %1041 : vector<8x128xf32>
    %1117 = arith.addf %1115, %1116 : vector<8x128xf32>
    %1118 = arith.mulf %903, %1038 : vector<8x128xf32>
    %1119 = arith.mulf %908, %1040 : vector<8x128xf32>
    %1120 = arith.addf %1118, %1119 : vector<8x128xf32>
    %1121 = arith.mulf %913, %1035 : vector<8x128xf32>
    %1122 = arith.addf %1120, %1121 : vector<8x128xf32>
    %1123 = arith.mulf %903, %1049 : vector<8x128xf32>
    %1124 = arith.mulf %908, %1057 : vector<8x128xf32>
    %1125 = arith.addf %1123, %1124 : vector<8x128xf32>
    %1126 = arith.mulf %913, %1065 : vector<8x128xf32>
    %1127 = arith.addf %1125, %1126 : vector<8x128xf32>
    %1128 = arith.addf %1127, %919 : vector<8x128xf32>
    %1129 = vector.broadcast %127 : f32 to vector<8x128xf32>
    %1130 = arith.mulf %1107, %1129 : vector<8x128xf32>
    %1131 = vector.broadcast %126 : f32 to vector<8x128xf32>
    %1132 = arith.mulf %1128, %1131 : vector<8x128xf32>
    %1133 = arith.subf %1130, %1132 : vector<8x128xf32>
    %1134 = vector.broadcast %125 : f32 to vector<8x128xf32>
    %1135 = arith.mulf %1128, %1134 : vector<8x128xf32>
    %1136 = vector.broadcast %127 : f32 to vector<8x128xf32>
    %1137 = arith.mulf %1086, %1136 : vector<8x128xf32>
    %1138 = arith.subf %1135, %1137 : vector<8x128xf32>
    %1139 = vector.broadcast %126 : f32 to vector<8x128xf32>
    %1140 = arith.mulf %1086, %1139 : vector<8x128xf32>
    %1141 = vector.broadcast %125 : f32 to vector<8x128xf32>
    %1142 = arith.mulf %1107, %1141 : vector<8x128xf32>
    %1143 = arith.subf %1140, %1142 : vector<8x128xf32>
    %1144 = vector.broadcast %128 : f32 to vector<8x128xf32>
    %1145 = arith.subf %1144, %1133 : vector<8x128xf32>
    %1146 = vector.broadcast %129 : f32 to vector<8x128xf32>
    %1147 = arith.subf %1146, %1138 : vector<8x128xf32>
    %1148 = vector.broadcast %130 : f32 to vector<8x128xf32>
    %1149 = arith.subf %1148, %1143 : vector<8x128xf32>
    %1150 = vector.broadcast %125 : f32 to vector<8x128xf32>
    %1151 = arith.mulf %1070, %1150 : vector<8x128xf32>
    %1152 = vector.broadcast %126 : f32 to vector<8x128xf32>
    %1153 = arith.mulf %1091, %1152 : vector<8x128xf32>
    %1154 = arith.addf %1151, %1153 : vector<8x128xf32>
    %1155 = vector.broadcast %127 : f32 to vector<8x128xf32>
    %1156 = arith.mulf %1112, %1155 : vector<8x128xf32>
    %1157 = arith.addf %1154, %1156 : vector<8x128xf32>
    %1158 = arith.mulf %1070, %1145 : vector<8x128xf32>
    %1159 = arith.mulf %1091, %1147 : vector<8x128xf32>
    %1160 = arith.addf %1158, %1159 : vector<8x128xf32>
    %1161 = arith.mulf %1112, %1149 : vector<8x128xf32>
    %1162 = arith.addf %1160, %1161 : vector<8x128xf32>
    %c30 = arith.constant 30 : index
    %1163 = arith.index_cast %163 : i32 to index
    %c0_434 = arith.constant 0 : index
    %c0_435 = arith.constant 0 : index
    %1164 = vector.load %arg5[%c30, %1163, %c0_434, %c0_435] : memref<36x1x8x128xf32, #tpu.memory_space<vmem>>, vector<1x1x8x128xf32>
    %1165 = vector.shape_cast %1164 : vector<1x1x8x128xf32> to vector<8x128xf32>
    %1166 = vector.shape_cast %1157 : vector<8x128xf32> to vector<1x1x8x128xf32>
    tpu.vector_store %arg5[%c30, %1163, %c0_434, %c0_435], %1166 {strides = array<i32>} : memref<36x1x8x128xf32, #tpu.memory_space<vmem>>, vector<1x1x8x128xf32>,
    %c33 = arith.constant 33 : index
    %1167 = arith.index_cast %163 : i32 to index
    %c0_436 = arith.constant 0 : index
    %c0_437 = arith.constant 0 : index
    %1168 = vector.load %arg5[%c33, %1167, %c0_436, %c0_437] : memref<36x1x8x128xf32, #tpu.memory_space<vmem>>, vector<1x1x8x128xf32>
    %1169 = vector.shape_cast %1168 : vector<1x1x8x128xf32> to vector<8x128xf32>
    %1170 = vector.shape_cast %1162 : vector<8x128xf32> to vector<1x1x8x128xf32>
    tpu.vector_store %arg5[%c33, %1167, %c0_436, %c0_437], %1170 {strides = array<i32>} : memref<36x1x8x128xf32, #tpu.memory_space<vmem>>, vector<1x1x8x128xf32>,
    %1171 = vector.broadcast %125 : f32 to vector<8x128xf32>
    %1172 = arith.mulf %1075, %1171 : vector<8x128xf32>
    %1173 = vector.broadcast %126 : f32 to vector<8x128xf32>
    %1174 = arith.mulf %1096, %1173 : vector<8x128xf32>
    %1175 = arith.addf %1172, %1174 : vector<8x128xf32>
    %1176 = vector.broadcast %127 : f32 to vector<8x128xf32>
    %1177 = arith.mulf %1117, %1176 : vector<8x128xf32>
    %1178 = arith.addf %1175, %1177 : vector<8x128xf32>
    %1179 = arith.mulf %1075, %1145 : vector<8x128xf32>
    %1180 = arith.mulf %1096, %1147 : vector<8x128xf32>
    %1181 = arith.addf %1179, %1180 : vector<8x128xf32>
    %1182 = arith.mulf %1117, %1149 : vector<8x128xf32>
    %1183 = arith.addf %1181, %1182 : vector<8x128xf32>
    %c31 = arith.constant 31 : index
    %1184 = arith.index_cast %163 : i32 to index
    %c0_438 = arith.constant 0 : index
    %c0_439 = arith.constant 0 : index
    %1185 = vector.load %arg5[%c31, %1184, %c0_438, %c0_439] : memref<36x1x8x128xf32, #tpu.memory_space<vmem>>, vector<1x1x8x128xf32>
    %1186 = vector.shape_cast %1185 : vector<1x1x8x128xf32> to vector<8x128xf32>
    %1187 = vector.shape_cast %1178 : vector<8x128xf32> to vector<1x1x8x128xf32>
    tpu.vector_store %arg5[%c31, %1184, %c0_438, %c0_439], %1187 {strides = array<i32>} : memref<36x1x8x128xf32, #tpu.memory_space<vmem>>, vector<1x1x8x128xf32>,
    %c34 = arith.constant 34 : index
    %1188 = arith.index_cast %163 : i32 to index
    %c0_440 = arith.constant 0 : index
    %c0_441 = arith.constant 0 : index
    %1189 = vector.load %arg5[%c34, %1188, %c0_440, %c0_441] : memref<36x1x8x128xf32, #tpu.memory_space<vmem>>, vector<1x1x8x128xf32>
    %1190 = vector.shape_cast %1189 : vector<1x1x8x128xf32> to vector<8x128xf32>
    %1191 = vector.shape_cast %1183 : vector<8x128xf32> to vector<1x1x8x128xf32>
    tpu.vector_store %arg5[%c34, %1188, %c0_440, %c0_441], %1191 {strides = array<i32>} : memref<36x1x8x128xf32, #tpu.memory_space<vmem>>, vector<1x1x8x128xf32>,
    %1192 = vector.broadcast %125 : f32 to vector<8x128xf32>
    %1193 = arith.mulf %1080, %1192 : vector<8x128xf32>
    %1194 = vector.broadcast %126 : f32 to vector<8x128xf32>
    %1195 = arith.mulf %1101, %1194 : vector<8x128xf32>
    %1196 = arith.addf %1193, %1195 : vector<8x128xf32>
    %1197 = vector.broadcast %127 : f32 to vector<8x128xf32>
    %1198 = arith.mulf %1122, %1197 : vector<8x128xf32>
    %1199 = arith.addf %1196, %1198 : vector<8x128xf32>
    %1200 = arith.mulf %1080, %1145 : vector<8x128xf32>
    %1201 = arith.mulf %1101, %1147 : vector<8x128xf32>
    %1202 = arith.addf %1200, %1201 : vector<8x128xf32>
    %1203 = arith.mulf %1122, %1149 : vector<8x128xf32>
    %1204 = arith.addf %1202, %1203 : vector<8x128xf32>
    %c32 = arith.constant 32 : index
    %1205 = arith.index_cast %163 : i32 to index
    %c0_442 = arith.constant 0 : index
    %c0_443 = arith.constant 0 : index
    %1206 = vector.load %arg5[%c32, %1205, %c0_442, %c0_443] : memref<36x1x8x128xf32, #tpu.memory_space<vmem>>, vector<1x1x8x128xf32>
    %1207 = vector.shape_cast %1206 : vector<1x1x8x128xf32> to vector<8x128xf32>
    %1208 = vector.shape_cast %1199 : vector<8x128xf32> to vector<1x1x8x128xf32>
    tpu.vector_store %arg5[%c32, %1205, %c0_442, %c0_443], %1208 {strides = array<i32>} : memref<36x1x8x128xf32, #tpu.memory_space<vmem>>, vector<1x1x8x128xf32>,
    %c35 = arith.constant 35 : index
    %1209 = arith.index_cast %163 : i32 to index
    %c0_444 = arith.constant 0 : index
    %c0_445 = arith.constant 0 : index
    %1210 = vector.load %arg5[%c35, %1209, %c0_444, %c0_445] : memref<36x1x8x128xf32, #tpu.memory_space<vmem>>, vector<1x1x8x128xf32>
    %1211 = vector.shape_cast %1210 : vector<1x1x8x128xf32> to vector<8x128xf32>
    %1212 = vector.shape_cast %1204 : vector<8x128xf32> to vector<1x1x8x128xf32>
    tpu.vector_store %arg5[%c35, %1209, %c0_444, %c0_445], %1212 {strides = array<i32>} : memref<36x1x8x128xf32, #tpu.memory_space<vmem>>, vector<1x1x8x128xf32>,
    %c5_446 = arith.constant 5 : index
    %1213 = arith.index_cast %163 : i32 to index
    %c0_447 = arith.constant 0 : index
    %c0_448 = arith.constant 0 : index
    %1214 = vector.load %arg1[%c5_446, %1213, %c0_447, %c0_448] : memref<6x1x8x128xf32, #tpu.memory_space<vmem>>, vector<1x1x8x128xf32>
    %1215 = vector.shape_cast %1214 : vector<1x1x8x128xf32> to vector<8x128xf32>
    %1216 = vector.broadcast %131 : f32 to vector<8x128xf32>
    %1217 = arith.mulf %1216, %1215 : vector<8x128xf32>
    %cst_449 = arith.constant 1.000000e+00 : f32
    %1218 = vector.broadcast %cst_449 : f32 to vector<8x128xf32>
    %1219 = arith.subf %1218, %205 : vector<8x128xf32>
    %1220 = arith.subf %1217, %204 : vector<8x128xf32>
    %1221 = vector.broadcast %132 : f32 to vector<8x128xf32>
    %1222 = arith.mulf %204, %1221 : vector<8x128xf32>
    %1223 = vector.broadcast %133 : f32 to vector<8x128xf32>
    %1224 = arith.mulf %204, %1223 : vector<8x128xf32>
    %1225 = vector.broadcast %134 : f32 to vector<8x128xf32>
    %1226 = arith.mulf %204, %1225 : vector<8x128xf32>
    %1227 = vector.broadcast %135 : f32 to vector<8x128xf32>
    %1228 = arith.mulf %1219, %1227 : vector<8x128xf32>
    %1229 = vector.broadcast %136 : f32 to vector<8x128xf32>
    %1230 = arith.mulf %1219, %1229 : vector<8x128xf32>
    %1231 = vector.broadcast %137 : f32 to vector<8x128xf32>
    %1232 = arith.mulf %1219, %1231 : vector<8x128xf32>
    %1233 = vector.broadcast %138 : f32 to vector<8x128xf32>
    %1234 = arith.mulf %1219, %1233 : vector<8x128xf32>
    %1235 = vector.broadcast %139 : f32 to vector<8x128xf32>
    %1236 = arith.mulf %1219, %1235 : vector<8x128xf32>
    %1237 = vector.broadcast %140 : f32 to vector<8x128xf32>
    %1238 = arith.mulf %1219, %1237 : vector<8x128xf32>
    %cst_450 = arith.constant 1.000000e+00 : f32
    %1239 = vector.broadcast %cst_450 : f32 to vector<8x128xf32>
    %1240 = arith.addf %1239, %1228 : vector<8x128xf32>
    %cst_451 = arith.constant 1.000000e+00 : f32
    %1241 = vector.broadcast %cst_451 : f32 to vector<8x128xf32>
    %1242 = arith.addf %1241, %1234 : vector<8x128xf32>
    %cst_452 = arith.constant 1.000000e+00 : f32
    %1243 = vector.broadcast %cst_452 : f32 to vector<8x128xf32>
    %1244 = arith.addf %1243, %1238 : vector<8x128xf32>
    %1245 = arith.subf %1230, %1226 : vector<8x128xf32>
    %1246 = arith.addf %1230, %1226 : vector<8x128xf32>
    %1247 = arith.addf %1232, %1224 : vector<8x128xf32>
    %1248 = arith.subf %1232, %1224 : vector<8x128xf32>
    %1249 = arith.subf %1236, %1222 : vector<8x128xf32>
    %1250 = arith.addf %1236, %1222 : vector<8x128xf32>
    %1251 = vector.broadcast %141 : f32 to vector<8x128xf32>
    %1252 = arith.mulf %1217, %1251 : vector<8x128xf32>
    %1253 = vector.broadcast %144 : f32 to vector<8x128xf32>
    %1254 = arith.mulf %1219, %1253 : vector<8x128xf32>
    %1255 = arith.addf %1252, %1254 : vector<8x128xf32>
    %1256 = vector.broadcast %147 : f32 to vector<8x128xf32>
    %1257 = arith.mulf %1220, %1256 : vector<8x128xf32>
    %1258 = arith.addf %1255, %1257 : vector<8x128xf32>
    %1259 = vector.broadcast %142 : f32 to vector<8x128xf32>
    %1260 = arith.mulf %1217, %1259 : vector<8x128xf32>
    %1261 = vector.broadcast %145 : f32 to vector<8x128xf32>
    %1262 = arith.mulf %1219, %1261 : vector<8x128xf32>
    %1263 = arith.addf %1260, %1262 : vector<8x128xf32>
    %1264 = vector.broadcast %148 : f32 to vector<8x128xf32>
    %1265 = arith.mulf %1220, %1264 : vector<8x128xf32>
    %1266 = arith.addf %1263, %1265 : vector<8x128xf32>
    %1267 = vector.broadcast %143 : f32 to vector<8x128xf32>
    %1268 = arith.mulf %1217, %1267 : vector<8x128xf32>
    %1269 = vector.broadcast %146 : f32 to vector<8x128xf32>
    %1270 = arith.mulf %1219, %1269 : vector<8x128xf32>
    %1271 = arith.addf %1268, %1270 : vector<8x128xf32>
    %1272 = vector.broadcast %149 : f32 to vector<8x128xf32>
    %1273 = arith.mulf %1220, %1272 : vector<8x128xf32>
    %1274 = arith.addf %1271, %1273 : vector<8x128xf32>
    %1275 = arith.mulf %1070, %1240 : vector<8x128xf32>
    %1276 = arith.mulf %1075, %1246 : vector<8x128xf32>
    %1277 = arith.addf %1275, %1276 : vector<8x128xf32>
    %1278 = arith.mulf %1080, %1248 : vector<8x128xf32>
    %1279 = arith.addf %1277, %1278 : vector<8x128xf32>
    %1280 = arith.mulf %1070, %1245 : vector<8x128xf32>
    %1281 = arith.mulf %1075, %1242 : vector<8x128xf32>
    %1282 = arith.addf %1280, %1281 : vector<8x128xf32>
    %1283 = arith.mulf %1080, %1250 : vector<8x128xf32>
    %1284 = arith.addf %1282, %1283 : vector<8x128xf32>
    %1285 = arith.mulf %1070, %1247 : vector<8x128xf32>
    %1286 = arith.mulf %1075, %1249 : vector<8x128xf32>
    %1287 = arith.addf %1285, %1286 : vector<8x128xf32>
    %1288 = arith.mulf %1080, %1244 : vector<8x128xf32>
    %1289 = arith.addf %1287, %1288 : vector<8x128xf32>
    %1290 = arith.mulf %1070, %1258 : vector<8x128xf32>
    %1291 = arith.mulf %1075, %1266 : vector<8x128xf32>
    %1292 = arith.addf %1290, %1291 : vector<8x128xf32>
    %1293 = arith.mulf %1080, %1274 : vector<8x128xf32>
    %1294 = arith.addf %1292, %1293 : vector<8x128xf32>
    %1295 = arith.addf %1294, %1086 : vector<8x128xf32>
    %1296 = arith.mulf %1091, %1240 : vector<8x128xf32>
    %1297 = arith.mulf %1096, %1246 : vector<8x128xf32>
    %1298 = arith.addf %1296, %1297 : vector<8x128xf32>
    %1299 = arith.mulf %1101, %1248 : vector<8x128xf32>
    %1300 = arith.addf %1298, %1299 : vector<8x128xf32>
    %1301 = arith.mulf %1091, %1245 : vector<8x128xf32>
    %1302 = arith.mulf %1096, %1242 : vector<8x128xf32>
    %1303 = arith.addf %1301, %1302 : vector<8x128xf32>
    %1304 = arith.mulf %1101, %1250 : vector<8x128xf32>
    %1305 = arith.addf %1303, %1304 : vector<8x128xf32>
    %1306 = arith.mulf %1091, %1247 : vector<8x128xf32>
    %1307 = arith.mulf %1096, %1249 : vector<8x128xf32>
    %1308 = arith.addf %1306, %1307 : vector<8x128xf32>
    %1309 = arith.mulf %1101, %1244 : vector<8x128xf32>
    %1310 = arith.addf %1308, %1309 : vector<8x128xf32>
    %1311 = arith.mulf %1091, %1258 : vector<8x128xf32>
    %1312 = arith.mulf %1096, %1266 : vector<8x128xf32>
    %1313 = arith.addf %1311, %1312 : vector<8x128xf32>
    %1314 = arith.mulf %1101, %1274 : vector<8x128xf32>
    %1315 = arith.addf %1313, %1314 : vector<8x128xf32>
    %1316 = arith.addf %1315, %1107 : vector<8x128xf32>
    %1317 = arith.mulf %1112, %1240 : vector<8x128xf32>
    %1318 = arith.mulf %1117, %1246 : vector<8x128xf32>
    %1319 = arith.addf %1317, %1318 : vector<8x128xf32>
    %1320 = arith.mulf %1122, %1248 : vector<8x128xf32>
    %1321 = arith.addf %1319, %1320 : vector<8x128xf32>
    %1322 = arith.mulf %1112, %1245 : vector<8x128xf32>
    %1323 = arith.mulf %1117, %1242 : vector<8x128xf32>
    %1324 = arith.addf %1322, %1323 : vector<8x128xf32>
    %1325 = arith.mulf %1122, %1250 : vector<8x128xf32>
    %1326 = arith.addf %1324, %1325 : vector<8x128xf32>
    %1327 = arith.mulf %1112, %1247 : vector<8x128xf32>
    %1328 = arith.mulf %1117, %1249 : vector<8x128xf32>
    %1329 = arith.addf %1327, %1328 : vector<8x128xf32>
    %1330 = arith.mulf %1122, %1244 : vector<8x128xf32>
    %1331 = arith.addf %1329, %1330 : vector<8x128xf32>
    %1332 = arith.mulf %1112, %1258 : vector<8x128xf32>
    %1333 = arith.mulf %1117, %1266 : vector<8x128xf32>
    %1334 = arith.addf %1332, %1333 : vector<8x128xf32>
    %1335 = arith.mulf %1122, %1274 : vector<8x128xf32>
    %1336 = arith.addf %1334, %1335 : vector<8x128xf32>
    %1337 = arith.addf %1336, %1128 : vector<8x128xf32>
    %1338 = vector.broadcast %150 : f32 to vector<8x128xf32>
    %1339 = arith.mulf %1279, %1338 : vector<8x128xf32>
    %1340 = vector.broadcast %154 : f32 to vector<8x128xf32>
    %1341 = arith.mulf %1284, %1340 : vector<8x128xf32>
    %1342 = arith.addf %1339, %1341 : vector<8x128xf32>
    %1343 = vector.broadcast %158 : f32 to vector<8x128xf32>
    %1344 = arith.mulf %1289, %1343 : vector<8x128xf32>
    %1345 = arith.addf %1342, %1344 : vector<8x128xf32>
    %c0_453 = arith.constant 0 : index
    %1346 = arith.index_cast %163 : i32 to index
    %c0_454 = arith.constant 0 : index
    %c0_455 = arith.constant 0 : index
    %1347 = vector.load %arg4[%c0_453, %1346, %c0_454, %c0_455] : memref<12x1x8x128xf32, #tpu.memory_space<vmem>>, vector<1x1x8x128xf32>
    %1348 = vector.shape_cast %1347 : vector<1x1x8x128xf32> to vector<8x128xf32>
    %1349 = vector.shape_cast %1345 : vector<8x128xf32> to vector<1x1x8x128xf32>
    tpu.vector_store %arg4[%c0_453, %1346, %c0_454, %c0_455], %1349 {strides = array<i32>} : memref<12x1x8x128xf32, #tpu.memory_space<vmem>>, vector<1x1x8x128xf32>,
    %1350 = vector.broadcast %151 : f32 to vector<8x128xf32>
    %1351 = arith.mulf %1279, %1350 : vector<8x128xf32>
    %1352 = vector.broadcast %155 : f32 to vector<8x128xf32>
    %1353 = arith.mulf %1284, %1352 : vector<8x128xf32>
    %1354 = arith.addf %1351, %1353 : vector<8x128xf32>
    %1355 = vector.broadcast %159 : f32 to vector<8x128xf32>
    %1356 = arith.mulf %1289, %1355 : vector<8x128xf32>
    %1357 = arith.addf %1354, %1356 : vector<8x128xf32>
    %c1_456 = arith.constant 1 : index
    %1358 = arith.index_cast %163 : i32 to index
    %c0_457 = arith.constant 0 : index
    %c0_458 = arith.constant 0 : index
    %1359 = vector.load %arg4[%c1_456, %1358, %c0_457, %c0_458] : memref<12x1x8x128xf32, #tpu.memory_space<vmem>>, vector<1x1x8x128xf32>
    %1360 = vector.shape_cast %1359 : vector<1x1x8x128xf32> to vector<8x128xf32>
    %1361 = vector.shape_cast %1357 : vector<8x128xf32> to vector<1x1x8x128xf32>
    tpu.vector_store %arg4[%c1_456, %1358, %c0_457, %c0_458], %1361 {strides = array<i32>} : memref<12x1x8x128xf32, #tpu.memory_space<vmem>>, vector<1x1x8x128xf32>,
    %1362 = vector.broadcast %152 : f32 to vector<8x128xf32>
    %1363 = arith.mulf %1279, %1362 : vector<8x128xf32>
    %1364 = vector.broadcast %156 : f32 to vector<8x128xf32>
    %1365 = arith.mulf %1284, %1364 : vector<8x128xf32>
    %1366 = arith.addf %1363, %1365 : vector<8x128xf32>
    %1367 = vector.broadcast %160 : f32 to vector<8x128xf32>
    %1368 = arith.mulf %1289, %1367 : vector<8x128xf32>
    %1369 = arith.addf %1366, %1368 : vector<8x128xf32>
    %c2_459 = arith.constant 2 : index
    %1370 = arith.index_cast %163 : i32 to index
    %c0_460 = arith.constant 0 : index
    %c0_461 = arith.constant 0 : index
    %1371 = vector.load %arg4[%c2_459, %1370, %c0_460, %c0_461] : memref<12x1x8x128xf32, #tpu.memory_space<vmem>>, vector<1x1x8x128xf32>
    %1372 = vector.shape_cast %1371 : vector<1x1x8x128xf32> to vector<8x128xf32>
    %1373 = vector.shape_cast %1369 : vector<8x128xf32> to vector<1x1x8x128xf32>
    tpu.vector_store %arg4[%c2_459, %1370, %c0_460, %c0_461], %1373 {strides = array<i32>} : memref<12x1x8x128xf32, #tpu.memory_space<vmem>>, vector<1x1x8x128xf32>,
    %1374 = vector.broadcast %153 : f32 to vector<8x128xf32>
    %1375 = arith.mulf %1279, %1374 : vector<8x128xf32>
    %1376 = vector.broadcast %157 : f32 to vector<8x128xf32>
    %1377 = arith.mulf %1284, %1376 : vector<8x128xf32>
    %1378 = arith.addf %1375, %1377 : vector<8x128xf32>
    %1379 = vector.broadcast %161 : f32 to vector<8x128xf32>
    %1380 = arith.mulf %1289, %1379 : vector<8x128xf32>
    %1381 = arith.addf %1378, %1380 : vector<8x128xf32>
    %1382 = arith.addf %1381, %1295 : vector<8x128xf32>
    %c3_462 = arith.constant 3 : index
    %1383 = arith.index_cast %163 : i32 to index
    %c0_463 = arith.constant 0 : index
    %c0_464 = arith.constant 0 : index
    %1384 = vector.load %arg4[%c3_462, %1383, %c0_463, %c0_464] : memref<12x1x8x128xf32, #tpu.memory_space<vmem>>, vector<1x1x8x128xf32>
    %1385 = vector.shape_cast %1384 : vector<1x1x8x128xf32> to vector<8x128xf32>
    %1386 = vector.shape_cast %1382 : vector<8x128xf32> to vector<1x1x8x128xf32>
    tpu.vector_store %arg4[%c3_462, %1383, %c0_463, %c0_464], %1386 {strides = array<i32>} : memref<12x1x8x128xf32, #tpu.memory_space<vmem>>, vector<1x1x8x128xf32>,
    %1387 = vector.broadcast %150 : f32 to vector<8x128xf32>
    %1388 = arith.mulf %1300, %1387 : vector<8x128xf32>
    %1389 = vector.broadcast %154 : f32 to vector<8x128xf32>
    %1390 = arith.mulf %1305, %1389 : vector<8x128xf32>
    %1391 = arith.addf %1388, %1390 : vector<8x128xf32>
    %1392 = vector.broadcast %158 : f32 to vector<8x128xf32>
    %1393 = arith.mulf %1310, %1392 : vector<8x128xf32>
    %1394 = arith.addf %1391, %1393 : vector<8x128xf32>
    %c4_465 = arith.constant 4 : index
    %1395 = arith.index_cast %163 : i32 to index
    %c0_466 = arith.constant 0 : index
    %c0_467 = arith.constant 0 : index
    %1396 = vector.load %arg4[%c4_465, %1395, %c0_466, %c0_467] : memref<12x1x8x128xf32, #tpu.memory_space<vmem>>, vector<1x1x8x128xf32>
    %1397 = vector.shape_cast %1396 : vector<1x1x8x128xf32> to vector<8x128xf32>
    %1398 = vector.shape_cast %1394 : vector<8x128xf32> to vector<1x1x8x128xf32>
    tpu.vector_store %arg4[%c4_465, %1395, %c0_466, %c0_467], %1398 {strides = array<i32>} : memref<12x1x8x128xf32, #tpu.memory_space<vmem>>, vector<1x1x8x128xf32>,
    %1399 = vector.broadcast %151 : f32 to vector<8x128xf32>
    %1400 = arith.mulf %1300, %1399 : vector<8x128xf32>
    %1401 = vector.broadcast %155 : f32 to vector<8x128xf32>
    %1402 = arith.mulf %1305, %1401 : vector<8x128xf32>
    %1403 = arith.addf %1400, %1402 : vector<8x128xf32>
    %1404 = vector.broadcast %159 : f32 to vector<8x128xf32>
    %1405 = arith.mulf %1310, %1404 : vector<8x128xf32>
    %1406 = arith.addf %1403, %1405 : vector<8x128xf32>
    %c5_468 = arith.constant 5 : index
    %1407 = arith.index_cast %163 : i32 to index
    %c0_469 = arith.constant 0 : index
    %c0_470 = arith.constant 0 : index
    %1408 = vector.load %arg4[%c5_468, %1407, %c0_469, %c0_470] : memref<12x1x8x128xf32, #tpu.memory_space<vmem>>, vector<1x1x8x128xf32>
    %1409 = vector.shape_cast %1408 : vector<1x1x8x128xf32> to vector<8x128xf32>
    %1410 = vector.shape_cast %1406 : vector<8x128xf32> to vector<1x1x8x128xf32>
    tpu.vector_store %arg4[%c5_468, %1407, %c0_469, %c0_470], %1410 {strides = array<i32>} : memref<12x1x8x128xf32, #tpu.memory_space<vmem>>, vector<1x1x8x128xf32>,
    %1411 = vector.broadcast %152 : f32 to vector<8x128xf32>
    %1412 = arith.mulf %1300, %1411 : vector<8x128xf32>
    %1413 = vector.broadcast %156 : f32 to vector<8x128xf32>
    %1414 = arith.mulf %1305, %1413 : vector<8x128xf32>
    %1415 = arith.addf %1412, %1414 : vector<8x128xf32>
    %1416 = vector.broadcast %160 : f32 to vector<8x128xf32>
    %1417 = arith.mulf %1310, %1416 : vector<8x128xf32>
    %1418 = arith.addf %1415, %1417 : vector<8x128xf32>
    %c6_471 = arith.constant 6 : index
    %1419 = arith.index_cast %163 : i32 to index
    %c0_472 = arith.constant 0 : index
    %c0_473 = arith.constant 0 : index
    %1420 = vector.load %arg4[%c6_471, %1419, %c0_472, %c0_473] : memref<12x1x8x128xf32, #tpu.memory_space<vmem>>, vector<1x1x8x128xf32>
    %1421 = vector.shape_cast %1420 : vector<1x1x8x128xf32> to vector<8x128xf32>
    %1422 = vector.shape_cast %1418 : vector<8x128xf32> to vector<1x1x8x128xf32>
    tpu.vector_store %arg4[%c6_471, %1419, %c0_472, %c0_473], %1422 {strides = array<i32>} : memref<12x1x8x128xf32, #tpu.memory_space<vmem>>, vector<1x1x8x128xf32>,
    %1423 = vector.broadcast %153 : f32 to vector<8x128xf32>
    %1424 = arith.mulf %1300, %1423 : vector<8x128xf32>
    %1425 = vector.broadcast %157 : f32 to vector<8x128xf32>
    %1426 = arith.mulf %1305, %1425 : vector<8x128xf32>
    %1427 = arith.addf %1424, %1426 : vector<8x128xf32>
    %1428 = vector.broadcast %161 : f32 to vector<8x128xf32>
    %1429 = arith.mulf %1310, %1428 : vector<8x128xf32>
    %1430 = arith.addf %1427, %1429 : vector<8x128xf32>
    %1431 = arith.addf %1430, %1316 : vector<8x128xf32>
    %c7_474 = arith.constant 7 : index
    %1432 = arith.index_cast %163 : i32 to index
    %c0_475 = arith.constant 0 : index
    %c0_476 = arith.constant 0 : index
    %1433 = vector.load %arg4[%c7_474, %1432, %c0_475, %c0_476] : memref<12x1x8x128xf32, #tpu.memory_space<vmem>>, vector<1x1x8x128xf32>
    %1434 = vector.shape_cast %1433 : vector<1x1x8x128xf32> to vector<8x128xf32>
    %1435 = vector.shape_cast %1431 : vector<8x128xf32> to vector<1x1x8x128xf32>
    tpu.vector_store %arg4[%c7_474, %1432, %c0_475, %c0_476], %1435 {strides = array<i32>} : memref<12x1x8x128xf32, #tpu.memory_space<vmem>>, vector<1x1x8x128xf32>,
    %1436 = vector.broadcast %150 : f32 to vector<8x128xf32>
    %1437 = arith.mulf %1321, %1436 : vector<8x128xf32>
    %1438 = vector.broadcast %154 : f32 to vector<8x128xf32>
    %1439 = arith.mulf %1326, %1438 : vector<8x128xf32>
    %1440 = arith.addf %1437, %1439 : vector<8x128xf32>
    %1441 = vector.broadcast %158 : f32 to vector<8x128xf32>
    %1442 = arith.mulf %1331, %1441 : vector<8x128xf32>
    %1443 = arith.addf %1440, %1442 : vector<8x128xf32>
    %c8_477 = arith.constant 8 : index
    %1444 = arith.index_cast %163 : i32 to index
    %c0_478 = arith.constant 0 : index
    %c0_479 = arith.constant 0 : index
    %1445 = vector.load %arg4[%c8_477, %1444, %c0_478, %c0_479] : memref<12x1x8x128xf32, #tpu.memory_space<vmem>>, vector<1x1x8x128xf32>
    %1446 = vector.shape_cast %1445 : vector<1x1x8x128xf32> to vector<8x128xf32>
    %1447 = vector.shape_cast %1443 : vector<8x128xf32> to vector<1x1x8x128xf32>
    tpu.vector_store %arg4[%c8_477, %1444, %c0_478, %c0_479], %1447 {strides = array<i32>} : memref<12x1x8x128xf32, #tpu.memory_space<vmem>>, vector<1x1x8x128xf32>,
    %1448 = vector.broadcast %151 : f32 to vector<8x128xf32>
    %1449 = arith.mulf %1321, %1448 : vector<8x128xf32>
    %1450 = vector.broadcast %155 : f32 to vector<8x128xf32>
    %1451 = arith.mulf %1326, %1450 : vector<8x128xf32>
    %1452 = arith.addf %1449, %1451 : vector<8x128xf32>
    %1453 = vector.broadcast %159 : f32 to vector<8x128xf32>
    %1454 = arith.mulf %1331, %1453 : vector<8x128xf32>
    %1455 = arith.addf %1452, %1454 : vector<8x128xf32>
    %c9_480 = arith.constant 9 : index
    %1456 = arith.index_cast %163 : i32 to index
    %c0_481 = arith.constant 0 : index
    %c0_482 = arith.constant 0 : index
    %1457 = vector.load %arg4[%c9_480, %1456, %c0_481, %c0_482] : memref<12x1x8x128xf32, #tpu.memory_space<vmem>>, vector<1x1x8x128xf32>
    %1458 = vector.shape_cast %1457 : vector<1x1x8x128xf32> to vector<8x128xf32>
    %1459 = vector.shape_cast %1455 : vector<8x128xf32> to vector<1x1x8x128xf32>
    tpu.vector_store %arg4[%c9_480, %1456, %c0_481, %c0_482], %1459 {strides = array<i32>} : memref<12x1x8x128xf32, #tpu.memory_space<vmem>>, vector<1x1x8x128xf32>,
    %1460 = vector.broadcast %152 : f32 to vector<8x128xf32>
    %1461 = arith.mulf %1321, %1460 : vector<8x128xf32>
    %1462 = vector.broadcast %156 : f32 to vector<8x128xf32>
    %1463 = arith.mulf %1326, %1462 : vector<8x128xf32>
    %1464 = arith.addf %1461, %1463 : vector<8x128xf32>
    %1465 = vector.broadcast %160 : f32 to vector<8x128xf32>
    %1466 = arith.mulf %1331, %1465 : vector<8x128xf32>
    %1467 = arith.addf %1464, %1466 : vector<8x128xf32>
    %c10_483 = arith.constant 10 : index
    %1468 = arith.index_cast %163 : i32 to index
    %c0_484 = arith.constant 0 : index
    %c0_485 = arith.constant 0 : index
    %1469 = vector.load %arg4[%c10_483, %1468, %c0_484, %c0_485] : memref<12x1x8x128xf32, #tpu.memory_space<vmem>>, vector<1x1x8x128xf32>
    %1470 = vector.shape_cast %1469 : vector<1x1x8x128xf32> to vector<8x128xf32>
    %1471 = vector.shape_cast %1467 : vector<8x128xf32> to vector<1x1x8x128xf32>
    tpu.vector_store %arg4[%c10_483, %1468, %c0_484, %c0_485], %1471 {strides = array<i32>} : memref<12x1x8x128xf32, #tpu.memory_space<vmem>>, vector<1x1x8x128xf32>,
    %1472 = vector.broadcast %153 : f32 to vector<8x128xf32>
    %1473 = arith.mulf %1321, %1472 : vector<8x128xf32>
    %1474 = vector.broadcast %157 : f32 to vector<8x128xf32>
    %1475 = arith.mulf %1326, %1474 : vector<8x128xf32>
    %1476 = arith.addf %1473, %1475 : vector<8x128xf32>
    %1477 = vector.broadcast %161 : f32 to vector<8x128xf32>
    %1478 = arith.mulf %1331, %1477 : vector<8x128xf32>
    %1479 = arith.addf %1476, %1478 : vector<8x128xf32>
    %1480 = arith.addf %1479, %1337 : vector<8x128xf32>
    %c11_486 = arith.constant 11 : index
    %1481 = arith.index_cast %163 : i32 to index
    %c0_487 = arith.constant 0 : index
    %c0_488 = arith.constant 0 : index
    %1482 = vector.load %arg4[%c11_486, %1481, %c0_487, %c0_488] : memref<12x1x8x128xf32, #tpu.memory_space<vmem>>, vector<1x1x8x128xf32>
    %1483 = vector.shape_cast %1482 : vector<1x1x8x128xf32> to vector<8x128xf32>
    %1484 = vector.shape_cast %1480 : vector<8x128xf32> to vector<1x1x8x128xf32>
    tpu.vector_store %arg4[%c11_486, %1481, %c0_487, %c0_488], %1484 {strides = array<i32>} : memref<12x1x8x128xf32, #tpu.memory_space<vmem>>, vector<1x1x8x128xf32>,
    %c1_i32_489 = arith.constant 1 : i32
    return
  }
  func.func @transform_0(%arg0: i32) -> (i32, i32, i32, i32) {
    %c0_i32 = arith.constant 0 : i32
    %c0_i32_0 = arith.constant 0 : i32
    %c0_i32_1 = arith.constant 0 : i32
    %c0_i32_2 = arith.constant 0 : i32
    return %c0_i32, %arg0, %c0_i32_0, %c0_i32_1 : i32, i32, i32, i32
  }
  func.func @transform_1(%arg0: i32) -> (i32, i32) {
    %c0_i32 = arith.constant 0 : i32
    %c0_i32_0 = arith.constant 0 : i32
    %c0_i32_1 = arith.constant 0 : i32
    return %c0_i32, %c0_i32_0 : i32, i32
  }
  func.func @transform_2(%arg0: i32) -> (i32, i32) {
    %c0_i32 = arith.constant 0 : i32
    %c0_i32_0 = arith.constant 0 : i32
    %c0_i32_1 = arith.constant 0 : i32
    return %c0_i32, %c0_i32_0 : i32, i32
  }
  func.func @transform_3(%arg0: i32) -> (i32, i32, i32, i32) {
    %c0_i32 = arith.constant 0 : i32
    %c0_i32_0 = arith.constant 0 : i32
    %c0_i32_1 = arith.constant 0 : i32
    %c0_i32_2 = arith.constant 0 : i32
    return %c0_i32, %arg0, %c0_i32_0, %c0_i32_1 : i32, i32, i32, i32
  }
  func.func @transform_4(%arg0: i32) -> (i32, i32, i32, i32) {
    %c0_i32 = arith.constant 0 : i32
    %c0_i32_0 = arith.constant 0 : i32
    %c0_i32_1 = arith.constant 0 : i32
    %c0_i32_2 = arith.constant 0 : i32
    return %c0_i32, %arg0, %c0_i32_0, %c0_i32_1 : i32, i32, i32, i32
  }
}

</mosaic_0001>

<bundles_post_ra>
// kernel: tpu_custom_call.1
= control target key start
LH: loop header
LB: loop body
LE: loop exit
PB: predicated region body
PF: predicated region fallthrough
CT: control target
= control target key end

     0   :  { %10 = vsyncpa [#allocation3], 0  ;;  %s5056_s0 = inlined_call_operand.hbm [shape: f32[6,1,8,128], index: 0, kind: input, shape index: {}]   ;;  %s5057_s1 = inlined_call_operand.hbm [shape: f32[6,25], index: 1, kind: input, shape index: {}]   ;;  %s5058_s2 = inlined_call_operand.hbm [shape: f32[4,4], index: 2, kind: input, shape index: {}]   ;;  %s5059_s3 = inlined_call_operand.hbm [shape: f32[12,1,8,128], index: 3, kind: output, shape index: {0}]   ;;  %s5060_s4 = inlined_call_operand.hbm [shape: f32[36,1,8,128], index: 4, kind: output, shape index: {1}]  }
   0x1   :  { %11 = vsyncpa [#allocation5], 0 }
   0x2   :  { %12 = vsyncpa [#allocation8], 0 }
   0x3   :  { %13 = vsyncpa [#allocation4], 0 }
   0x4   :  { %14 = vsyncpa [#allocation11], 0  ;;  %s2931_s15 = smov [#allocation2]  }
   0x5   :  { %s20_s16 = sshll.u32 %s2931_s15, 4  ;;  %s21_s16 = int_to_ptr.vmem [resolvable:$true] %s20_s16 }
   0x6   :  { %s2853_s17 = scalar_lea.vmem %s21_s16, 768  ;;  %p2858_p1 = scmp.lt.s32.totalorder %s21_s16, %s21_s16 }
   0x7   :  { %p2854_p0 = scmp.ne.s32.totalorder %s21_s16, %s2853_s17  ;;  %p2859_p2 = scmp.lt.s32.totalorder %s2853_s17, %s2853_s17 }
   0x9   :  { %p2860_p3 = por %p2859_p2, %p2858_p1 }
   0xb   :  { %p2861_p4 = pnand %p2860_p3, %p2854_p0 }
   0xd   :  { %2864 = shalt.err (!%p2861_p4)
}
   0xe   :  { %s2932_s18 = smov 128   ;;  %s2933_s19 = smov 8  }
   0xf   :  { %26 = dma.hbm_to_vmem [thread:$0]  %s5056_s0, 768, %s21_s16, [#allocation3], %s2932_s18, %s2932_s18, %s2933_s19  }
  0x10   :  { %s2934_s22 = smov [#allocation6]   ;;  %s2935_s25 = smov [#allocation7]  }
  0x11   :  { %34 = dma.hbm_to_smem %s5057_s1, 128, %s2934_s22, [#allocation5]  }
  0x12   :  { %42 = dma.hbm_to_smem %s5058_s2, 64, %s2935_s25, [#allocation8]  }
  0x13   :  { %2921 = dma.done.wait [#allocation3], 768  }
  0x14   :  { %2922 = vsyncadd [#allocation3], 4294966528 }
  0x15   :  { %2923 = dma.done.wait [#allocation5], 128  }
  0x16   :  { %2924 = vsyncadd [#allocation5], 4294967168 }
  0x17   :  { %2925 = dma.done.wait [#allocation8], 64  }
  0x18   :  { %2926 = vsyncadd [#allocation8], 4294967232 }
  0x19   :  { %52 = sfence }
  0x1a   :  { %s53_s28 = sld [smem:[#allocation6]]  ;;  %v215_v5 = vld [vmem:[#allocation2] sm:$0xff]  ;;  %v5067_v20 = vmov 683565275   ;;  %v5063_v22 = vmov 2475754826  }
  0x1b   :  { %s2575_s29 = sld [smem:[#allocation6 + $0x3]]  ;;  %v5065_v24 = vmov 2131351028   ;;  %v5069_v26 = vmov 2102212464   ;;  %v426_v59 = vld [vmem:[#allocation2 + $0x8] sm:$0xff] }
  0x1c   :  { %s2573_s0 = sld [smem:[#allocation6 + $0x1]]  ;;  %v5071_v28 = vmov 920167782   ;;  %v5073_v35 = vmov 1326507024  }
  0x1d   :  { %s2576_s30 = sld [smem:[#allocation6 + $0x4]] }
  0x1e   :  { %s2574_s5 = sld [smem:[#allocation6 + $0x2]] }
  0x1f   :  { %s2577_s6 = sld [smem:[#allocation6 + $0x5]] }
  0x20   :  { %v1480_v0 = vstv %s53_s28  ;;  %s2578_s1 = sld [smem:[#allocation6 + $0x6]] }
  0x21   :  { %1481 = vst [vmem:[#allocation10] sm:$0xff] %v1480_v0  ;;  %v1482_v1 = vstv %s2575_s29  ;;  %s2603_s2 = sld [smem:[#allocation6 + $0x86]] }
  0x22   :  { %1484 = vst [vmem:[#allocation10 + $0x18] sm:$0xff] %v1482_v1  ;;  %v1485_v2 = vstv %s2573_s0  ;;  %s3011_s7 = sld [smem:[#allocation6 + $0x8]] }
  0x23   :  { %1487 = vst [vmem:[#allocation10 + $0x8] sm:$0xff] %v1485_v2  ;;  %v1488_v3 = vstv %s2576_s30  ;;  %s3013_s8 = sld [smem:[#allocation6 + $0x9]] }
  0x24   :  { %1490 = vst [vmem:[#allocation10 + $0x20] sm:$0xff] %v1488_v3  ;;  %v1491_v4 = vstv %s2574_s5  ;;  %s3017_s9 = sld [smem:[#allocation6 + $0xa]] }
  0x25   :  { %1493 = vst [vmem:[#allocation10 + $0x10] sm:$0xff] %v1491_v4  ;;  %v1494_v6 = vstv %s2577_s6  ;;  %s3019_s10 = sld [smem:[#allocation6 + $0xb]] }
  0x26   :  { %1496 = vst [vmem:[#allocation10 + $0x28] sm:$0xff] %v1494_v6  ;;  %v216_v7 = vstv %s2578_s1  ;;  %s3024_s11 = sld [smem:[#allocation6 + $0xc]] }
  0x27   :  { %v2981_v8 = vmul.f32 %v216_v7, %v215_v5  ;;  %v427_v60 = vstv %s2603_s2  ;;  %s3026_s12 = sld [smem:[#allocation6 + $0x80]] }
  0x28   :  { %v3004_v62 = vmul.f32 %v427_v60, %v426_v59  ;;  %s3030_s13 = sld [smem:[#allocation6 + $0x81]] }
  0x29   :  { %v221_v9 = vand.u32 2139095040, %v2981_v8  ;;  %v218_v11 = vand.u32 2147483647, %v2981_v8  ;;  %s3032_s14 = sld [smem:[#allocation6 + $0x82]]  ;;  %vm220_vm12 = vcmp.lt.s32.totalorder %v2981_v8, 0 }
  0x2a   :  { %v432_v0 = vand.u32 2139095040, %v3004_v62  ;;  %v429_v5 = vand.u32 2147483647, %v3004_v62  ;;  %s3035_s15 = sld [smem:[#allocation6 + $0x10]]  ;;  %vm431_vm15 = vcmp.lt.s32.totalorder %v3004_v62, 0 }
  0x2b   :  { %v222_v10 = vshrl.u32 %v221_v9, 23  ;;  %v225_v14 = vand.u32 8388607, %v218_v11  ;;  %s3042_s16 = sld [smem:[#allocation6 + $0x11]]  ;;  %vm3100_vm13 = vcmp.le.f32.partialorder %v218_v11, 0.7853982 }
  0x2c   :  { %v433_v3 = vshrl.u32 %v432_v0, 23  ;;  %s3044_s17 = sld [smem:[#allocation6 + $0x12]]  ;;  %v1509_v11 = vstv %s3024_s11 }
  0x2d   :  { %v2733_v12 = vadd.s32 4294967169, %v222_v10  ;;  %v226_v17 = vor.u32 8388608, %v225_v14  ;;  %s3051_s20 = sld [smem:[#allocation6 + $0x13]] }
  0x2e   :  { %v2741_v6 = vadd.s32 4294967169, %v433_v3  ;;  %s3056_s21 = sld [smem:[#allocation6 + $0x14]] }
  0x2f   :  { %v228_v13 = vadd.s32 1, %v2733_v12  ;;  %v266_v37 = vshll.u32 %v226_v17, 8  ;;  %v436_v12 = vand.u32 8388607, %v429_v5  ;;  %s3060_s22 = sld [smem:[#allocation6 + $0x15]] }
  0x30   :  { %v439_v9 = vadd.s32 1, %v2741_v6  ;;  %s3064_s23 = sld [smem:[#allocation6 + $0x16]] }
  0x31   :  { %vm229_vm0 = vcmp.gt.s32.totalorder %v228_v13, 0  ;;  %v437_v17 = vor.u32 8388608, %v436_v12  ;;  %s3066_s24 = sld [smem:[#allocation6 + $0x17]] }
  0x32   :  { %v230_v15 = vsel %vm229_vm0, %v228_v13, 0  ;;  %vm440_vm6 = vcmp.gt.s32.totalorder %v439_v9, 0  ;;  %s3071_s25 = sld [smem:[#allocation6 + $0x18]] }
  0x33   :  { %v232_v16 = vand.u32 31, %v230_v15  ;;  %v231_v18 = vshrl.u32 %v230_v15, 5  ;;  %v441_v13 = vsel %vm440_vm6, %v439_v9, 0  ;;  %s3077_s26 = sld [smem:[#allocation6 + $0x106]] }
  0x34   :  { %v443_v15 = vand.u32 31, %v441_v13  ;;  %s3079_s27 = sld [smem:[#allocation6 + $0x83]] }
  0x35   :  { %v233_v19 = vsub.s32 32, %v232_v16  ;;  %v235_v21 = vshll.u32 %v5067_v20, %v232_v16  ;;  %v238_v23 = vshll.u32 %v5063_v22, %v232_v16  ;;  %v241_v25 = vshll.u32 %v5065_v24, %v232_v16  ;;  %s3083_s28 = sld [smem:[#allocation6 + $0x84]] }
  0x36   :  { %v244_v27 = vshll.u32 %v5069_v26, %v232_v16  ;;  %v247_v29 = vshll.u32 %v5071_v28, %v232_v16  ;;  %vm250_vm1 = vcmp.lt.s32.totalorder %v231_v18, 1  ;;  %vm253_vm2 = vcmp.lt.s32.totalorder %v231_v18, 4  ;;  %s3096_s29 = sld [smem:[#allocation6 + $0x186]] }
  0x37   :  { %v234_v30 = vshrl.u32 %v5067_v20, %v233_v19  ;;  %v236_v31 = vshrl.u32 %v5063_v22, %v233_v19  ;;  %v239_v32 = vshrl.u32 %v5065_v24, %v233_v19  ;;  %v242_v33 = vshrl.u32 %v5069_v26, %v233_v19  ;;  %s3106_s0 = sld [smem:[#allocation6 + $0x85]] }
  0x38   :  { %v245_v34 = vshrl.u32 %v5071_v28, %v233_v19  ;;  %v248_v36 = vshrl.u32 %v5073_v35, %v233_v19  ;;  %vm251_vm3 = vcmp.lt.s32.totalorder %v231_v18, 2  ;;  %vm252_vm4 = vcmp.lt.s32.totalorder %v231_v18, 3  ;;  %s3110_s30 = sld [smem:[#allocation6 + $0x7]] }
  0x39   :  { %v237_v38 = vor.u32 %v236_v31, %v235_v21  ;;  %v240_v39 = vor.u32 %v239_v32, %v238_v23  ;;  %v243_v40 = vor.u32 %v242_v33, %v241_v25  ;;  %v444_v18 = vsub.s32 32, %v443_v15  ;;  %s3120_s5 = sld [smem:[#allocation6 + $0xd]] }
  0x3a   :  { %v246_v41 = vor.u32 %v245_v34, %v244_v27  ;;  %v249_v42 = vor.u32 %v248_v36, %v247_v29  ;;  %v446_v19 = vshll.u32 %v5067_v20, %v443_v15  ;;  %v449_v21 = vshll.u32 %v5063_v22, %v443_v15  ;;  %s3125_s6 = sld [smem:[#allocation6 + $0xe]] }
  0x3b   :  { %v254_v43 = vsel %vm250_vm1, %v234_v30, %v237_v38  ;;  %v255_v44 = vsel %vm253_vm2, %v243_v40, 2102212464  ;;  %v258_v45 = vsel %vm250_vm1, %v237_v38, %v240_v39  ;;  %v262_v46 = vsel %vm250_vm1, %v240_v39, %v243_v40  ;;  %s3135_s1 = sld [smem:[#allocation6 + $0xf]] }
  0x3c   :  { %v256_v47 = vsel %vm252_vm4, %v240_v39, %v255_v44  ;;  %v259_v48 = vsel %vm253_vm2, %v246_v41, 920167782  ;;  %v263_v49 = vsel %vm253_vm2, %v249_v42, 1326507024  ;;  %v1501_v25 = vstv %s3011_s7  ;;  %s3142_s2 = sld [smem:[#allocation6 + $0x88]] }
  0x3d   :  { %v260_v50 = vsel %vm252_vm4, %v243_v40, %v259_v48  ;;  %v264_v51 = vsel %vm252_vm4, %v246_v41, %v263_v49  ;;  %v257_v52 = vsel %vm251_vm3, %v254_v43, %v256_v47  ;;  %v1503_v27 = vstv %s3013_s8  ;;  %s3340_s7 = sld [smem:[#allocation6 + $0x100]] }
  0x3e   :  { %v261_v53 = vsel %vm251_vm3, %v258_v45, %v260_v50  ;;  %v265_v54 = vsel %vm251_vm3, %v262_v46, %v264_v51  ;;  %v273_v61 = vmul.u32 %v266_v37, %v257_v52  ;;  %v442_v29 = vshrl.u32 %v441_v13, 5  ;;  %s3345_s8 = sld [smem:[#allocation6 + $0x102]] }
  0x3f   :  { %v2998_v55 = vmul.u32.u64.low %v266_v37, %v265_v54  ;;  %v2999_v56 = vmul.u32.u64.high %v266_v37, %v265_v54, %v2998_v55  ;;  %v3001_v57 = vmul.u32.u64.low %v266_v37, %v261_v53  ;;  %v3002_v58 = vmul.u32.u64.high %v266_v37, %v261_v53, %v3001_v57  ;;  %s3376_s11 = sld [smem:[#allocation6 + $0x92]] }
  0x40   :  { %v447_v30 = vshrl.u32 %v5063_v22, %v444_v18  ;;  %v450_v31 = vshrl.u32 %v5065_v24, %v444_v18  ;;  %v452_v32 = vshll.u32 %v5065_v24, %v443_v15  ;;  %v455_v33 = vshll.u32 %v5069_v26, %v443_v15 }
  0x41   :  { %vm275_vm5 = vc.u32 %v2999_v56, %v3001_v57  ;;  %v276_v63 = vadd.s32 1, %v3002_v58  ;;  %v274_v34 = vadd.s32 %v3001_v57, %v2999_v56  ;;  %v445_v37 = vshrl.u32 %v5067_v20, %v444_v18 }
  0x42   :  { %v3054_v38 = vshll.u32 %v437_v17, 8  ;;  %v448_v39 = vor.u32 %v447_v30, %v446_v19  ;;  %v451_v40 = vor.u32 %v450_v31, %v449_v21  ;;  %v453_v41 = vshrl.u32 %v5069_v26, %v444_v18 }
  0x43   :  { %v277_v1 = vsel %vm275_vm5, %v276_v63, %v3002_v58  ;;  %v456_v42 = vshrl.u32 %v5071_v28, %v444_v18  ;;  %v458_v44 = vshll.u32 %v5071_v28, %v443_v15  ;;  %v459_v45 = vshrl.u32 %v5073_v35, %v444_v18 }
  0x44   :  { %v278_v2 = vadd.s32 %v277_v1, %v273_v61  ;;  %vm461_vm7 = vcmp.lt.s32.totalorder %v442_v29, 1  ;;  %v454_v46 = vor.u32 %v453_v41, %v452_v32  ;;  %vm462_vm8 = vcmp.lt.s32.totalorder %v442_v29, 2  ;;  %v637_v32 = vld [vmem:[#allocation2 + $0x10] sm:$0xff] }
  0x45   :  { %v457_v47 = vor.u32 %v456_v42, %v455_v33  ;;  %vm463_vm9 = vcmp.lt.s32.totalorder %v442_v29, 3  ;;  %v460_v48 = vor.u32 %v459_v45, %v458_v44  ;;  %vm464_vm11 = vcmp.lt.s32.totalorder %v442_v29, 4 }
  0x46   :  { %v279_v4 = vadd.s32 536870912, %v278_v2  ;;  %v465_v49 = vsel %vm461_vm7, %v445_v37, %v448_v39  ;;  %v466_v51 = vsel %vm464_vm11, %v454_v46, 2102212464  ;;  %v469_v52 = vsel %vm461_vm7, %v448_v39, %v451_v40 }
  0x47   :  { %v470_v53 = vsel %vm464_vm11, %v457_v47, 920167782  ;;  %v467_v57 = vsel %vm463_vm9, %v451_v40, %v466_v51  ;;  %v473_v59 = vsel %vm461_vm7, %v451_v40, %v454_v46  ;;  %v474_v60 = vsel %vm464_vm11, %v460_v48, 1326507024  ;;  %v848_v48 = vld [vmem:[#allocation2 + $0x18] sm:$0xff] }
  0x48   :  { %v3015_v7 = vshrl.u32 %v279_v4, 30  ;;  %v471_v58 = vsel %vm463_vm9, %v454_v46, %v470_v53  ;;  %v475_v1 = vsel %vm463_vm9, %v457_v47, %v474_v60  ;;  %v1505_v15 = vstv %s3017_s9  ;;  %s3359_s9 = sld [smem:[#allocation6 + $0x90]] }
  0x49   :  { %v472_v0 = vsel %vm462_vm8, %v469_v52, %v471_v58  ;;  %v476_v3 = vsel %vm462_vm8, %v473_v59, %v475_v1  ;;  %v1526_v17 = vstv %s3035_s15  ;;  %v3115_v29 = vstv %s3030_s13  ;;  %s3158_s13 = sld [smem:[#allocation6 + $0x8a]] }
  0x4a   :  { %v281_v10 = vshll.u32 %v3015_v7, 30  ;;  %v3088_v4 = vmul.u32.u64.low %v3054_v38, %v472_v0  ;;  %v3089_v6 = vmul.u32.u64.high %v3054_v38, %v472_v0, %v3088_v4  ;;  %v304_v21 = vsub.s32 4, %v3015_v7  ;;  %s3170_s15 = sld [smem:[#allocation6 + $0x8c]] }
  0x4b   :  { %v3093_v12 = vmul.u32.u64.low %v3054_v38, %v476_v3  ;;  %v3094_v13 = vmul.u32.u64.high %v3054_v38, %v476_v3, %v3093_v12  ;;  %v3118_v30 = vstv %s3026_s12  ;;  %v3130_v37 = vstv %s3032_s14  ;;  %s3153_s12 = sld [smem:[#allocation6 + $0x89]] }
  0x4c   :  { %v3028_v14 = vsub.s32 %v278_v2, %v281_v10  ;;  %v468_v2 = vsel %vm462_vm8, %v465_v49, %v467_v57  ;;  %v487_v31 = vadd.s32 1, %v3089_v6  ;;  %v638_v40 = vstv %s3077_s26  ;;  %s3164_s14 = sld [smem:[#allocation6 + $0x8b]] }
  0x4d   :  { %vm486_vm14 = vc.u32 %v3094_v13, %v3088_v4  ;;  %v305_v42 = vsel %vm220_vm12, %v304_v21, %v3015_v7  ;;  %v3144_v44 = vmul.f32 %v638_v40, %v637_v32  ;;  %v1528_v45 = vstv %s3051_s20  ;;  %s3388_s20 = sld [smem:[#allocation6 + $0x94]] }
  0x4e   :  { %v284_v16 = vsub.s32 0, %v3028_v14  ;;  %v488_v39 = vsel %vm486_vm14, %v487_v31, %v3089_v6  ;;  %v5061_v7 = vstv %s3096_s29  ;;  %v1536_v51 = vstv %s3056_s21  ;;  %s3393_s21 = sld [smem:[#allocation6 + $0x95]] }
  0x4f   :  { %5104 = vst [vmem:[#allocation17_spill] sm:$0xff] %v3144_v44  ;;  %v307_v53 = vsel %vm3100_vm13, 0, %v305_v42  ;;  %v1547_v58 = vstv %s3071_s25  ;;  %v3174_v60 = vmul.f32 %v5061_v7, %v848_v48  ;;  %v5062_v0 = vand.u32 2147483647, %v3144_v44  ;;  %s3411_s25 = sld [smem:[#allocation6 + $0x103]] }
  0x50   :  { %v2734_v23 = vmin.u32 %v284_v16, %v3028_v14  ;;  %v1507_v16 = vstv %s3019_s10  ;;  %v1564_v3 = vstv %s3083_s28  ;;  %v3191_v21 = vand.u32 3, %v307_v53  ;;  %s3369_s10 = sld [smem:[#allocation6 + $0x91]] }
  0x51   :  { %5105 = vst [vmem:[#allocation18_spill] sm:$0xff] %v3174_v60  ;;  %v647_v31 = vand.u32 8388607, %v5062_v0  ;;  %vm310_vm2 = vweird.f32 %v2981_v8  ;;  %s3426_s26 = sld [smem:[#allocation6 + $0x104]] }
  0x52   :  { %v286_v36 = vclz %v2734_v23  ;;  %v484_v23 = vmul.u32 %v3054_v38, %v468_v2  ;;  %v3133_v38 = vmul.f32 %v1526_v17, %v2981_v8  ;;  %v311_v2 = vadd.s32 3, %v307_v53  ;;  %s3448_s28 = sld [smem:[#allocation6 + $0x87]] }
  0x53   :  { %v1513_v17 = vstv %s3125_s6  ;;  %vm416_vm1 = vcmp.lt.s32.totalorder %v3191_v21, 2  ;;  %v648_v53 = vor.u32 8388608, %v647_v31  ;;  %vm417_vm4 = vcmp.eq.s32.totalorder %v3191_v21, 0  ;;  %s3712_s6 = sld [smem:[#allocation6 + $0x108]] }
  0x54   :  { %v2735_v43 = vadd.s32 4294967294, %v286_v36  ;;  %v1542_v36 = vstv %s3044_s17  ;;  %vm420_vm5 = vcmp.eq.s32.totalorder %v3191_v21, 2  ;;  %s3382_s17 = sld [smem:[#allocation6 + $0x93]] }
  0x55   :  { %v3151_v47 = vmul.f32 %v1542_v36, %v2981_v8 }
  0x56   :  { %vm2736_vm10 = vcmp.lt.s32.totalorder %v2735_v43, 0 }
  0x57   :  { %v289_v50 = vsel %vm2736_vm10, 0, %v2735_v43  ;;  %v489_v43 = vadd.s32 %v488_v39, %v484_v23  ;;  %v1515_v23 = vstv %s3135_s1  ;;  %vm3355_vm10 = vcmp.le.f32.partialorder %v429_v5, 0.7853982  ;;  %s3716_s1 = sld [smem:[#allocation6 + $0x109]] }
  0x58   :  { %v290_v54 = vsub.s32 32, %v289_v50  ;;  %v291_v55 = vshll.u32 %v3028_v14, %v289_v50  ;;  %v294_v56 = vsub.s32 4294967266, %v289_v50  ;;  %v1531_v50 = vstv %s3064_s23  ;;  %s3401_s23 = sld [smem:[#allocation6 + $0x97]] }
  0x59   :  { %v490_v52 = vadd.s32 536870912, %v489_v43  ;;  %v1511_v14 = vstv %s3120_s5  ;;  %s3475_s5 = sld [smem:[#allocation6 + $0x8f]] }
  0x5a   :  { %v292_v61 = vshrl.u32 %v274_v34, %v290_v54  ;;  %v295_v63 = vadd.s32 127, %v294_v56  ;;  %v1534_v34 = vstv %s3042_s16  ;;  %v1539_v54 = vstv %s3066_s24  ;;  %s3180_s16 = sld [smem:[#allocation6 + $0x101]] }
  0x5b   :  { %v3148_v46 = vmul.f32 %v1534_v34, %v2981_v8  ;;  %v643_v56 = vand.u32 2139095040, %v3144_v44  ;;  %v491_v59 = vshrl.u32 %v490_v52, 30  ;;  %s3405_s24 = sld [smem:[#allocation6 + $0x98]] }
  0x5c   :  { %v293_v9 = vor.u32 %v292_v61, %v291_v55  ;;  %v296_v10 = vshll.u32 %v295_v63, 23  ;;  %v1544_v55 = vstv %s3060_s22  ;;  %v1562_v63 = vstv %s3079_s27  ;;  %s3397_s22 = sld [smem:[#allocation6 + $0x96]] }
  0x5d   :  { %v644_v1 = vshrl.u32 %v643_v56, 23  ;;  %v492_v6 = vshll.u32 %v491_v59, 30  ;;  %s3441_s27 = sld [smem:[#allocation6 + $0x105]] }
  0x5e   :  { %v297_v18 = vor.u32 4788187, %v296_v10  ;;  %v300_v19 = vcvt.s32.f32 %v293_v9  ;;  %v1499_v10 = vstv %s3110_s30  ;;  %s3468_s30 = sld [smem:[#allocation6 + $0x8e]] }
  0x5f   :  { %v2749_v12 = vadd.s32 4294967169, %v644_v1 }
  0x60   :  { %v298_v33 = vand.u32 2147483647, %v297_v18  ;;  %v3188_v18 = vsub.s32 %v489_v43, %v492_v6  ;;  %v515_v43 = vsub.s32 4, %v491_v59  ;;  %v3206_v52 = vstv %s3180_s16  ;;  %s3755_s16 = sld [smem:[#allocation6 + $0x182]] }
  0x61   :  { %v650_v32 = vadd.s32 1, %v2749_v12 }
  0x62   :  { %v301_v41 = vmul.f32 %v300_v19, %v298_v33  ;;  %v854_v19 = vand.u32 2139095040, %v3174_v60  ;;  %v312_v33 = vand.u32 3, %v311_v2  ;;  %v495_v34 = vsub.s32 0, %v3188_v18 }
  0x63   :  { %vm651_vm0 = vcmp.gt.s32.totalorder %v650_v32, 0  ;;  %v3215_v6 = vsel %vm431_vm15, %v515_v43, %v491_v59 }
  0x64   :  { %v302_v49 = vxor.u32 2147483648, %v301_v41  ;;  %v2742_v42 = vmin.u32 %v495_v34, %v3188_v18  ;;  %v652_v56 = vsel %vm651_vm0, %v650_v32, 0  ;;  %vm313_vm3 = vcmp.lt.s32.totalorder %v312_v33, 2 }
  0x65   :  { %vm314_vm6 = vcmp.eq.s32.totalorder %v312_v33, 0  ;;  %vm317_vm7 = vcmp.eq.s32.totalorder %v312_v33, 2  ;;  %v654_v1 = vand.u32 31, %v652_v56  ;;  %v3220_v31 = vshrl.u32 %v652_v56, 5 }
  0x66   :  { %v303_v57 = vsel %vm220_vm12, %v302_v49, %v301_v41  ;;  %v855_v49 = vshrl.u32 %v854_v19, 23  ;;  %vm521_vm0 = vweird.f32 %v3004_v62 }
  0x67   :  { %v306_v61 = vsel %vm3100_vm13, %v2981_v8, %v303_v57  ;;  %v497_v57 = vclz %v2742_v42  ;;  %v655_v32 = vsub.s32 32, %v654_v1  ;;  %v657_v34 = vshll.u32 %v5067_v20, %v654_v1 }
  0x68   :  { %2818 = vcosq.f32 %v306_v61  ;;  %v3218_v19 = vadd.s32 4294967169, %v855_v49  ;;  %v3223_v42 = vshll.u32 %v648_v53, 8  ;;  %v3231_v56 = vshll.u32 %v5071_v28, %v654_v1 }
  0x69   :  { %2820 = vsinq.f32 %v306_v61  ;;  %v485_v61 = vadd.s32 %v3088_v4, %v3094_v13  ;;  %v2743_v2 = vadd.s32 4294967294, %v497_v57  ;;  %v660_v4 = vshll.u32 %v5063_v22, %v654_v1 }
  0x6a   :  { %v663_v13 = vshll.u32 %v5065_v24, %v654_v1  ;;  %v666_v57 = vshll.u32 %v5069_v26, %v654_v1  ;;  %v658_v7 = vshrl.u32 %v5063_v22, %v655_v32  ;;  %v661_v49 = vshrl.u32 %v5065_v24, %v655_v32 }
  0x6b   :  { %vm2744_vm8 = vcmp.lt.s32.totalorder %v2743_v2, 0  ;;  %v3235_v36 = vshrl.u32 %v5067_v20, %v655_v32  ;;  %vm672_vm9 = vcmp.lt.s32.totalorder %v3220_v31, 1  ;;  %vm674_vm11 = vcmp.lt.s32.totalorder %v3220_v31, 3 }
  0x6c   :  { %v500_v43 = vsel %vm2744_vm8, 0, %v2743_v2  ;;  %v3237_v12 = vor.u32 %v658_v7, %v657_v34  ;;  %v664_v2 = vshrl.u32 %v5069_v26, %v655_v32  ;;  %v3246_v20 = vor.u32 %v661_v49, %v660_v4 }
  0x6d   :  { %v501_v53 = vsub.s32 32, %v500_v43  ;;  %v502_v41 = vshll.u32 %v3188_v18, %v500_v43  ;;  %v505_v40 = vsub.s32 4294967266, %v500_v43  ;;  %v667_v7 = vshrl.u32 %v5071_v28, %v655_v32 }
  0x6e   :  { %v3258_v33 = vor.u32 %v664_v2, %v663_v13  ;;  %v3273_v13 = vshrl.u32 %v5073_v35, %v655_v32  ;;  %vm675_vm12 = vcmp.lt.s32.totalorder %v3220_v31, 4  ;;  %vm673_vm13 = vcmp.lt.s32.totalorder %v3220_v31, 2 }
  0x6f   :  { %v503_v24 = vshrl.u32 %v485_v61, %v501_v53  ;;  %v506_v9 = vadd.s32 127, %v505_v40 }
  0x71   :  { %v507_v40 = vshll.u32 %v506_v9, 23 }
  0x75   :  { %v2819_v59 = vpop.eup %2818 }
  0x76   :  { %v2821_v0 = vpop.eup %2820  ;;  %v318_v48 = vxor.u32 2147483648, %v2819_v59 }
  0x77   :  { %v315_v39 = vxor.u32 2147483648, %v2821_v0 }
  0x78   :  { %v319_v22 = vsel %vm317_vm7, %v318_v48, %v2821_v0  ;;  %v422_v1 = vsel %vm420_vm5, %v318_v48, %v2821_v0  ;;  %v3252_v48 = vor.u32 %v503_v24, %v502_v41 }
  0x79   :  { %v316_v18 = vsel %vm314_vm6, %v2819_v59, %v315_v39  ;;  %v419_v43 = vsel %vm417_vm4, %v2819_v59, %v315_v39  ;;  %v3269_v59 = vor.u32 4788187, %v507_v40 }
  0x7a   :  { %v320_v34 = vsel %vm313_vm3, %v316_v18, %v319_v22  ;;  %v423_v0 = vsel %vm416_vm1, %v419_v43, %v422_v1  ;;  %v3260_v22 = vor.u32 %v667_v7, %v666_v57  ;;  %v511_v49 = vcvt.s32.f32 %v3252_v48 }
  0x7b   :  { %v321_v61 = vsel %vm310_vm2, nan, %v320_v34  ;;  %v424_v39 = vsel %vm310_vm2, nan, %v423_v0  ;;  %v677_v48 = vsel %vm675_vm12, %v3258_v33, 2102212464 }
  0x7c   :  { %v1497_v21 = vsub.f32 1.0, %v424_v39  ;;  %v1502_v24 = vmul.f32 %v1501_v25, %v321_v61  ;;  %v1504_v9 = vmul.f32 %v1503_v27, %v321_v61  ;;  %v1498_v41 = vsub.f32 %v2981_v8, %v321_v61 }
  0x7d   :  { %v1500_v4 = vmul.f32 %v1499_v10, %v321_v61 }
  0x7e   :  { %v1506_v57 = vmul.f32 %v1505_v15, %v1497_v21  ;;  %v1508_v53 = vmul.f32 %v1507_v16, %v1497_v21  ;;  %v1510_v25 = vmul.f32 %v1509_v11, %v1497_v21  ;;  %v1529_v27 = vmul.f32 %v1528_v45, %v1497_v21 }
  0x7f   :  { %v1532_v8 = vmul.f32 %v1531_v50, %v1498_v41  ;;  %v1537_v10 = vmul.f32 %v1536_v51, %v1497_v21  ;;  %v1540_v2 = vmul.f32 %v1539_v54, %v1498_v41  ;;  %v1545_v1 = vmul.f32 %v1544_v55, %v1497_v21 }
  0x80   :  { %v3291_v32 = vadd.f32 1.0, %v1506_v57  ;;  %v3293_v18 = vadd.f32 %v1508_v53, %v1504_v9  ;;  %v3295_v15 = vsub.f32 %v1510_v25, %v1502_v24  ;;  %v1530_v16 = vadd.f32 %v1529_v27, %v3133_v38 }
  0x81   :  { %v1538_v11 = vadd.f32 %v1537_v10, %v3148_v46  ;;  %v1546_v45 = vadd.f32 %v1545_v1, %v3151_v47  ;;  %v1548_v50 = vmul.f32 %v1547_v58, %v1498_v41  ;;  %v1512_v51 = vmul.f32 %v1511_v14, %v1497_v21 }
  0x82   :  { %v1568_v54 = vmul.f32 %v3118_v30, %v3291_v32  ;;  %v1569_v55 = vmul.f32 %v3115_v29, %v3293_v18  ;;  %v1571_v43 = vmul.f32 %v3130_v37, %v3295_v15  ;;  %v3310_v7 = vadd.f32 %v1532_v8, %v1530_v16 }
  0x83   :  { %v3312_v38 = vadd.f32 %v1540_v2, %v1538_v11  ;;  %v3314_v46 = vadd.f32 %v1548_v50, %v1546_v45  ;;  %v1514_v47 = vmul.f32 %v1513_v17, %v1497_v21  ;;  %v3318_v58 = vadd.f32 1.0, %v1512_v51 }
  0x84   :  { %v1570_v14 = vadd.f32 %v1569_v55, %v1568_v54  ;;  %v1557_v34 = vmul.f32 %v3130_v37, %v3310_v7  ;;  %v1559_v0 = vmul.f32 %v3115_v29, %v3310_v7  ;;  %v3324_v40 = vsub.f32 %v1508_v53, %v1504_v9 }
  0x85   :  { %v1551_v61 = vmul.f32 %v3130_v37, %v3312_v38  ;;  %v1553_v39 = vmul.f32 %v3115_v29, %v3314_v46  ;;  %v1556_v17 = vmul.f32 %v3118_v30, %v3314_v46  ;;  %v1560_v41 = vmul.f32 %v3118_v30, %v3312_v38 }
  0x86   :  { %v1572_v57 = vadd.f32 %v1571_v43, %v1570_v14  ;;  %v3334_v27 = vadd.f32 %v1514_v47, %v1500_v4  ;;  %v1582_v8 = vmul.f32 %v3118_v30, %v3324_v40  ;;  %v1583_v9 = vmul.f32 %v3115_v29, %v3318_v58 }
  0x87   :  { %v1554_v53 = vsub.f32 %v1551_v61, %v1553_v39  ;;  %v1558_v10 = vsub.f32 %v1556_v17, %v1557_v34  ;;  %v1561_v2 = vsub.f32 %v1559_v0, %v1560_v41  ;;  %v1516_v1 = vmul.f32 %v1515_v23, %v1497_v21 }
  0x88   :  { %1579 = vst [vmem:[#allocation10 + $0x30] sm:$0xff] %v1572_v57  ;;  %v1584_v16 = vadd.f32 %v1583_v9, %v1582_v8  ;;  %v1585_v11 = vmul.f32 %v3130_v37, %v3334_v27  ;;  %v3349_v45 = vadd.f32 %v1510_v25, %v1502_v24  ;;  %v3351_v50 = vsub.f32 %v1514_v47, %v1500_v4 }
  0x89   :  { %v1563_v23 = vsub.f32 %v1562_v63, %v1554_v53  ;;  %v1565_v21 = vsub.f32 %v1564_v3, %v1558_v10  ;;  %v5108_v54 = vstv %s3106_s0  ;;  %v3367_v43 = vadd.f32 1.0, %v1516_v1  ;;  %s3460_s0 = sld [smem:[#allocation6 + $0x8d]] }
  0x8a   :  { %v1567_v55 = vsub.f32 %v5108_v54, %v1561_v2  ;;  %v1586_v24 = vadd.f32 %v1585_v11, %v1584_v16  ;;  %v1596_v4 = vmul.f32 %v3118_v30, %v3349_v45  ;;  %v1597_v5 = vmul.f32 %v3115_v29, %v3351_v50 }
  0x8b   :  { %v509_v25 = vand.u32 2147483647, %v3269_v59  ;;  %v1573_v63 = vmul.f32 %v1563_v23, %v3291_v32  ;;  %v1574_v3 = vmul.f32 %v1565_v21, %v3293_v18  ;;  %v1587_v14 = vmul.f32 %v1563_v23, %v3324_v40 }
  0x8c   :  { %v1576_v47 = vmul.f32 %v1567_v55, %v3295_v15  ;;  %1593 = vst [vmem:[#allocation10 + $0x38] sm:$0xff] %v1586_v24  ;;  %v1588_v30 = vmul.f32 %v1565_v21, %v3318_v58  ;;  %v1590_v34 = vmul.f32 %v1567_v55, %v3334_v27  ;;  %v1598_v29 = vadd.f32 %v1597_v5, %v1596_v4 }
  0x8d   :  { %v1599_v59 = vmul.f32 %v3130_v37, %v3367_v43  ;;  %v1575_v0 = vadd.f32 %v1574_v3, %v1573_v63  ;;  %v1601_v61 = vmul.f32 %v1563_v23, %v3349_v45  ;;  %v1602_v39 = vmul.f32 %v1565_v21, %v3351_v50 }
  0x8e   :  { %v1604_v17 = vmul.f32 %v1567_v55, %v3367_v43  ;;  %v1589_v41 = vadd.f32 %v1588_v30, %v1587_v14  ;;  %v512_v8 = vmul.f32 %v511_v49, %v509_v25  ;;  %v671_v37 = vor.u32 %v3273_v13, %v3231_v56 }
  0x8f   :  { %v1600_v57 = vadd.f32 %v1599_v59, %v1598_v29  ;;  %v1577_v9 = vadd.f32 %v1576_v47, %v1575_v0  ;;  %v1603_v53 = vadd.f32 %v1602_v39, %v1601_v61  ;;  %v676_v49 = vsel %vm672_vm9, %v3235_v36, %v3237_v12 }
  0x90   :  { %v1591_v10 = vadd.f32 %v1590_v34, %v1589_v41  ;;  %v513_v2 = vxor.u32 2147483648, %v512_v8  ;;  %v680_v13 = vsel %vm672_vm9, %v3237_v12, %v3246_v20  ;;  %v681_v1 = vsel %vm675_vm12, %v3260_v22, 920167782 }
  0x91   :  { %1607 = vst [vmem:[#allocation10 + $0x40] sm:$0xff] %v1600_v57  ;;  %1581 = vst [vmem:[#allocation10 + $0x48] sm:$0xff] %v1577_v9  ;;  %v1605_v56 = vadd.f32 %v1604_v17, %v1603_v53  ;;  %v678_v11 = vsel %vm674_vm11, %v3246_v20, %v677_v48  ;;  %v682_v36 = vsel %vm674_vm11, %v3258_v33, %v681_v1  ;;  %v685_v54 = vsel %vm675_vm12, %v671_v37, 1326507024 }
  0x92   :  { %1595 = vst [vmem:[#allocation10 + $0x50] sm:$0xff] %v1591_v10  ;;  %v514_v16 = vsel %vm431_vm15, %v513_v2, %v512_v8  ;;  %v684_v12 = vsel %vm672_vm9, %v3246_v20, %v3258_v33  ;;  %v683_v21 = vsel %vm673_vm13, %v680_v13, %v682_v36  ;;  %v861_v55 = vadd.s32 1, %v3218_v19 }
  0x93   :  { %1609 = vst [vmem:[#allocation10 + $0x58] sm:$0xff] %v1605_v56  ;;  %v517_v23 = vsel %vm3355_vm10, %v3004_v62, %v514_v16  ;;  %v686_v20 = vsel %vm674_vm11, %v3260_v22, %v685_v54  ;;  %v3454_v33 = vmul.u32.u64.low %v3223_v42, %v683_v21  ;;  %v3455_v24 = vmul.u32.u64.high %v3223_v42, %v683_v21, %v3454_v33 }
  0x94   :  { %2822 = vcosq.f32 %v517_v23  ;;  %v518_v4 = vsel %vm3355_vm10, 0, %v3215_v6  ;;  %v679_v19 = vsel %vm673_vm13, %v676_v49, %v678_v11  ;;  %v687_v22 = vsel %vm673_vm13, %v684_v12, %v686_v20 }
  0x95   :  { %2824 = vsinq.f32 %v517_v23  ;;  %v1641_v5 = vstv %s3359_s9  ;;  %v1649_v25 = vstv %s3369_s10  ;;  %v1657_v6 = vstv %s3376_s11  ;;  %s3772_s9 = sld [smem:[#allocation6 + $0x110]] }
  0x96   :  { %v3471_v63 = vmul.u32.u64.low %v3223_v42, %v687_v22  ;;  %v3472_v51 = vmul.u32.u64.high %v3223_v42, %v687_v22, %v3471_v63  ;;  %v5109_v3 = vand.u32 2147483647, %v3174_v60  ;;  %vm862_vm14 = vcmp.gt.s32.totalorder %v861_v55, 0  ;;  %s3782_s10 = sld [smem:[#allocation6 + $0x111]] }
  0x97   :  { %v522_v31 = vadd.s32 3, %v518_v4  ;;  %v3480_v14 = vstv %s3340_s7  ;;  %v695_v30 = vmul.u32 %v3223_v42, %v679_v19  ;;  %v698_v34 = vadd.s32 1, %v3455_v24  ;;  %s3767_s7 = sld [smem:[#allocation6 + $0x206]] }
  0x98   :  { %v858_v47 = vand.u32 8388607, %v5109_v3  ;;  %v3485_v29 = vstv %s3345_s8  ;;  %v3488_v59 = vmul.f32 %v1641_v5, %v3004_v62  ;;  %v1643_v0 = vstv %s3382_s17  ;;  %s3770_s8 = sld [smem:[#allocation6 + $0x10d]] }
  0x99   :  { %v3492_v61 = vmul.f32 %v1649_v25, %v3004_v62  ;;  %v1651_v39 = vstv %s3388_s20  ;;  %v3496_v17 = vmul.f32 %v1657_v6, %v3004_v62  ;;  %vm697_vm15 = vc.u32 %v3472_v51, %v3454_v33  ;;  %s3784_s11 = sld [smem:[#allocation6 + $0x112]] }
  0x9a   :  { %v863_v42 = vsel %vm862_vm14, %v861_v55, 0  ;;  %v626_v41 = vand.u32 3, %v518_v4  ;;  %v1659_v57 = vstv %s3393_s21  ;;  %v699_v8 = vsel %vm697_vm15, %v698_v34, %v3455_v24  ;;  %s3792_s17 = sld [smem:[#allocation6 + $0x113]] }
  0x9b   :  { %v859_v37 = vor.u32 8388608, %v858_v47  ;;  %v523_v9 = vand.u32 3, %v522_v31  ;;  %v1646_v53 = vstv %s3397_s22  ;;  %v1654_v10 = vstv %s3401_s23  ;;  %s3800_s20 = sld [smem:[#allocation6 + $0x114]] }
  0x9c   :  { %v700_v2 = vadd.s32 %v699_v8, %v695_v30  ;;  %v1662_v48 = vstv %s3405_s24  ;;  %v865_v13 = vand.u32 31, %v863_v42  ;;  %v1614_v16 = vstv %s3448_s28  ;;  %s3809_s21 = sld [smem:[#allocation6 + $0x115]] }
  0x9d   :  { %vm627_vm1 = vcmp.lt.s32.totalorder %v626_v41, 2  ;;  %v3512_v21 = vshll.u32 %v859_v37, 8  ;;  %vm524_vm2 = vcmp.lt.s32.totalorder %v523_v9, 2  ;;  %vm628_vm3 = vcmp.eq.s32.totalorder %v626_v41, 0  ;;  %s3816_s22 = sld [smem:[#allocation6 + $0x116]] }
  0x9e   :  { %v701_v36 = vadd.s32 536870912, %v700_v2  ;;  %vm631_vm4 = vcmp.eq.s32.totalorder %v626_v41, 2  ;;  %vm525_vm5 = vcmp.eq.s32.totalorder %v523_v9, 0  ;;  %vm528_vm6 = vcmp.eq.s32.totalorder %v523_v9, 2  ;;  %s3818_s23 = sld [smem:[#allocation6 + $0x117]] }
  0x9f   :  { %5110 = vst [vmem:[#allocation19_spill] sm:$0xff] %v3512_v21  ;;  %v3516_v20 = vshrl.u32 %v863_v42, 5  ;;  %v866_v24 = vsub.s32 32, %v865_v13  ;;  %v3519_v22 = vadd.s32 %v3454_v33, %v3472_v51  ;;  %v5113_v25 = vmov 683565275   ;;  %s3821_s24 = sld [smem:[#allocation6 + $0x118]] }
  0xa0   :  { %v3514_v54 = vshrl.u32 %v701_v36, 30  ;;  %v868_v63 = vshll.u32 %v5113_v25, %v865_v13  ;;  %v5114_v3 = vmov 2475754826   ;;  %v5115_v31 = vmov 2131351028   ;;  %s3854_s28 = sld [smem:[#allocation6 + $0x185]] }
  0xa1   :  { %v2823_v55 = vpop.eup %2822  ;;  %5112 = vst [vmem:[#allocation21_spill] sm:$0xff] %v3519_v22  ;;  %v3524_v47 = vshll.u32 %v5114_v3, %v865_v13  ;;  %v3527_v30 = vshll.u32 %v5115_v31, %v865_v13  ;;  %v3530_v34 = vshll.u32 %v5069_v26, %v865_v13  ;;  %v3536_v51 = vshll.u32 %v5071_v28, %v865_v13 }
  0xa2   :  { %5111 = vst [vmem:[#allocation20_spill] sm:$0xff] %v3514_v54  ;;  %v2825_v4 = vpop.eup %2824  ;;  %v529_v19 = vxor.u32 2147483648, %v2823_v55  ;;  %v703_v5 = vshll.u32 %v3514_v54, 30  ;;  %v3541_v49 = vshrl.u32 %v5113_v25, %v866_v24  ;;  %v869_v56 = vshrl.u32 %v5114_v3, %v866_v24 }
  0xa3   :  { %v526_v6 = vxor.u32 2147483648, %v2825_v4  ;;  %v3548_v13 = vshrl.u32 %v5115_v31, %v866_v24  ;;  %v3555_v9 = vshrl.u32 %v5069_v26, %v866_v24  ;;  %v3558_v41 = vshrl.u32 %v5071_v28, %v866_v24 }
  0xa4   :  { %v530_v42 = vsel %vm528_vm6, %v529_v19, %v2825_v4  ;;  %v633_v8 = vsel %vm631_vm4, %v529_v19, %v2825_v4  ;;  %v3533_v33 = vsub.s32 %v700_v2, %v703_v5  ;;  %v3574_v26 = vor.u32 %v869_v56, %v868_v63 }
  0xa5   :  { %v527_v37 = vsel %vm525_vm5, %v2823_v55, %v526_v6  ;;  %v630_v36 = vsel %vm628_vm3, %v2823_v55, %v526_v6  ;;  %v5116_v6 = vstv %s3142_s2  ;;  %v3577_v28 = vshrl.u32 %v5073_v35, %v866_v24  ;;  %s3723_s2 = sld [smem:[#allocation6 + $0x10a]] }
  0xa6   :  { %v531_v1 = vsel %vm524_vm2, %v527_v37, %v530_v42  ;;  %v634_v4 = vsel %vm627_vm1, %v630_v36, %v633_v8  ;;  %v706_v2 = vsub.s32 0, %v3533_v33  ;;  %v5117_v8 = vstv %s3153_s12  ;;  %s3726_s12 = sld [smem:[#allocation6 + $0x10b]] }
  0xa7   :  { %v532_v55 = vsel %vm521_vm0, nan, %v531_v1  ;;  %v635_v19 = vsel %vm521_vm0, nan, %v634_v4  ;;  %v5119_v23 = vstv %s3164_s14  ;;  %v5122_v60 = vstv %s3468_s30  ;;  %s3742_s14 = sld [smem:[#allocation6 + $0x180]] }
  0xa8   :  { %v3560_v5 = vsub.f32 1.0, %v635_v19  ;;  %v3564_v42 = vmul.f32 %v5116_v6, %v532_v55  ;;  %v1619_v37 = vmul.f32 %v5117_v8, %v532_v55  ;;  %v1613_v1 = vsub.f32 %v3004_v62, %v532_v55  ;;  %s3870_s30 = sld [smem:[#allocation6 + $0x10e]] }
  0xa9   :  { %v3569_v36 = vmul.f32 %v1614_v16, %v532_v55  ;;  %v3572_v4 = vmin.u32 %v706_v2, %v3533_v33  ;;  %v5118_v19 = vstv %s3158_s13  ;;  %v5120_v62 = vstv %s3170_s15  ;;  %s3729_s13 = sld [smem:[#allocation6 + $0x10c]] }
  0xaa   :  { %v1621_v6 = vmul.f32 %v5118_v19, %v3560_v5  ;;  %v1623_v8 = vmul.f32 %v5119_v23, %v3560_v5  ;;  %v3588_v16 = vmul.f32 %v5120_v62, %v3560_v5  ;;  %v1644_v2 = vmul.f32 %v1643_v0, %v3560_v5  ;;  %s3746_s15 = sld [smem:[#allocation6 + $0x181]] }
  0xab   :  { %v1647_v56 = vmul.f32 %v1646_v53, %v1613_v1  ;;  %v1652_v63 = vmul.f32 %v1651_v39, %v3560_v5  ;;  %v1655_v24 = vmul.f32 %v1654_v10, %v1613_v1  ;;  %v1660_v55 = vmul.f32 %v1659_v57, %v3560_v5 }
  0xac   :  { %v1632_v35 = vadd.f32 1.0, %v1621_v6  ;;  %v1636_v19 = vadd.f32 %v1623_v8, %v1619_v37  ;;  %v1638_v23 = vsub.f32 %v3588_v16, %v3564_v42  ;;  %v1645_v12 = vadd.f32 %v1644_v2, %v3488_v59 }
  0xad   :  { %v1653_v62 = vadd.f32 %v1652_v63, %v3492_v61  ;;  %v1661_v11 = vadd.f32 %v1660_v55, %v3496_v17  ;;  %v1663_v0 = vmul.f32 %v1662_v48, %v1613_v1  ;;  %v5121_v53 = vstv %s3460_s0  ;;  %s3863_s0 = sld [smem:[#allocation6 + $0x107]] }
  0xae   :  { %v1627_v39 = vmul.f32 %v5121_v53, %v3560_v5  ;;  %v1665_v10 = vmul.f32 %v1632_v35, %v3291_v32  ;;  %v1666_v57 = vmul.f32 %v1636_v19, %v3324_v40  ;;  %v1668_v6 = vmul.f32 %v1638_v23, %v3349_v45 }
  0xaf   :  { %v1686_v31 = vmul.f32 %v1632_v35, %v3293_v18  ;;  %v1687_v59 = vmul.f32 %v1636_v19, %v3318_v58  ;;  %v1689_v61 = vmul.f32 %v1638_v23, %v3351_v50  ;;  %v1707_v17 = vmul.f32 %v1632_v35, %v3295_v15 }
  0xb0   :  { %v1708_v48 = vmul.f32 %v1636_v19, %v3334_v27  ;;  %v1667_v1 = vadd.f32 %v1666_v57, %v1665_v10  ;;  %v1710_v2 = vmul.f32 %v1638_v23, %v3367_v43  ;;  %v1648_v63 = vadd.f32 %v1647_v56, %v1645_v12 }
  0xb1   :  { %v1656_v55 = vadd.f32 %v1655_v24, %v1653_v62  ;;  %v1688_v53 = vadd.f32 %v1687_v59, %v1686_v31  ;;  %v1664_v25 = vadd.f32 %v1663_v0, %v1661_v11  ;;  %v1629_v44 = vmul.f32 %v5122_v60, %v3560_v5 }
  0xb2   :  { %v1709_v3 = vadd.f32 %v1708_v48, %v1707_v17  ;;  %v3621_v54 = vadd.f32 %v1668_v6, %v1667_v1  ;;  %v1680_v21 = vmul.f32 %v1648_v63, %v3291_v32  ;;  %v1701_v35 = vmul.f32 %v1648_v63, %v3293_v18 }
  0xb3   :  { %v1681_v22 = vmul.f32 %v1656_v55, %v3324_v40  ;;  %v3626_v19 = vadd.f32 %v1689_v61, %v1688_v53  ;;  %v1683_v12 = vmul.f32 %v1664_v25, %v3349_v45  ;;  %v1702_v31 = vmul.f32 %v1656_v55, %v3318_v58 }
  0xb4   :  { %v3628_v10 = vadd.f32 %v1710_v2, %v1709_v3  ;;  %v1746_v11 = vmul.f32 %v3480_v14, %v3621_v54  ;;  %v1704_v56 = vmul.f32 %v1664_v25, %v3351_v50  ;;  %v1722_v24 = vmul.f32 %v1648_v63, %v3295_v15 }
  0xb5   :  { %v1682_v60 = vadd.f32 %v1681_v22, %v1680_v21  ;;  %v1747_v23 = vmul.f32 %v3206_v52, %v3626_v19  ;;  %v1703_v3 = vadd.f32 %v1702_v31, %v1701_v35  ;;  %v1723_v0 = vmul.f32 %v1656_v55, %v3334_v27 }
  0xb6   :  { %v1749_v62 = vmul.f32 %v3485_v29, %v3628_v10  ;;  %v1725_v6 = vmul.f32 %v1664_v25, %v3367_v43  ;;  %v1633_v59 = vadd.f32 1.0, %v1627_v39  ;;  %v1635_v61 = vsub.f32 %v1623_v8, %v1619_v37 }
  0xb7   :  { %v1684_v57 = vadd.f32 %v1683_v12, %v1682_v60  ;;  %v1748_v17 = vadd.f32 %v1747_v23, %v1746_v11  ;;  %v1705_v21 = vadd.f32 %v1704_v56, %v1703_v3  ;;  %v1724_v22 = vadd.f32 %v1723_v0, %v1722_v24 }
  0xb8   :  { %v1640_v48 = vadd.f32 %v1629_v44, %v3569_v36  ;;  %v1670_v2 = vmul.f32 %v1635_v61, %v3291_v32  ;;  %v1671_v63 = vmul.f32 %v1633_v59, %v3324_v40  ;;  %v1691_v53 = vmul.f32 %v1635_v61, %v3293_v18 }
  0xb9   :  { %v3644_v1 = vadd.f32 %v1684_v57, %v3310_v7  ;;  %v1750_v55 = vadd.f32 %v1749_v62, %v1748_v17  ;;  %v3650_v35 = vadd.f32 %v1705_v21, %v3312_v38  ;;  %v1726_v25 = vadd.f32 %v1725_v6, %v1724_v22 }
  0xba   :  { %v1673_v37 = vmul.f32 %v1640_v48, %v3349_v45  ;;  %v1672_v39 = vadd.f32 %v1671_v63, %v1670_v2  ;;  %v1692_v12 = vmul.f32 %v1633_v59, %v3318_v58  ;;  %v1694_v60 = vmul.f32 %v1640_v48, %v3351_v50 }
  0xbb   :  { %v1735_v8 = vmul.f32 %v3485_v29, %v3644_v1  ;;  %v1737_v7 = vmul.f32 %v3206_v52, %v3644_v1  ;;  %1757 = vst [vmem:[#allocation10 + $0x60] sm:$0xff] %v1750_v55  ;;  %v3659_v31 = vadd.f32 %v1726_v25, %v3314_v46  ;;  %v1729_v38 = vmul.f32 %v3485_v29, %v3650_v35 }
  0xbc   :  { %v1738_v11 = vmul.f32 %v3480_v14, %v3650_v35  ;;  %v3666_v56 = vadd.f32 %v1673_v37, %v1672_v39  ;;  %v1693_v24 = vadd.f32 %v1692_v12, %v1691_v53  ;;  %v1712_v23 = vmul.f32 %v1635_v61, %v3295_v15 }
  0xbd   :  { %v1713_v62 = vmul.f32 %v1633_v59, %v3334_v27  ;;  %v1731_v46 = vmul.f32 %v3206_v52, %v3659_v31  ;;  %v1734_v3 = vmul.f32 %v3480_v14, %v3659_v31  ;;  %v1715_v57 = vmul.f32 %v1640_v48, %v3367_v43 }
  0xbe   :  { %v1739_v0 = vsub.f32 %v1737_v7, %v1738_v11  ;;  %v3675_v6 = vadd.f32 %v1694_v60, %v1693_v24  ;;  %v1760_v21 = vmul.f32 %v3480_v14, %v3666_v56  ;;  %v5123_v61 = vstv %s3475_s5  ;;  %s3879_s5 = sld [smem:[#allocation6 + $0x10f]] }
  0xbf   :  { %v1714_v17 = vadd.f32 %v1713_v62, %v1712_v23  ;;  %v1631_v59 = vmul.f32 %v5123_v61, %v3560_v5  ;;  %v1732_v22 = vsub.f32 %v1729_v38, %v1731_v46  ;;  %v1736_v2 = vsub.f32 %v1734_v3, %v1735_v8 }
  0xc0   :  { %v5124_v63 = vstv %s3441_s27  ;;  %v1637_v55 = vadd.f32 %v3588_v16, %v3564_v42  ;;  %v1761_v48 = vmul.f32 %v3206_v52, %v3675_v6  ;;  %v1639_v7 = vsub.f32 %v1629_v44, %v3569_v36  ;;  %s3846_s27 = sld [smem:[#allocation6 + $0x184]] }
  0xc1   :  { %v3684_v53 = vsub.f32 %v5124_v63, %v1739_v0  ;;  %v3688_v25 = vadd.f32 %v1715_v57, %v1714_v17  ;;  %v1634_v37 = vadd.f32 1.0, %v1631_v59  ;;  %v5125_v39 = vstv %s3411_s25  ;;  %s3832_s25 = sld [smem:[#allocation6 + $0x183]] }
  0xc2   :  { %v1741_v12 = vsub.f32 %v5125_v39, %v1732_v22  ;;  %v5126_v11 = vstv %s3426_s26  ;;  %v1675_v38 = vmul.f32 %v1637_v55, %v3291_v32  ;;  %v1762_v60 = vadd.f32 %v1761_v48, %v1760_v21  ;;  %s3841_s26 = sld [smem:[#allocation6 + $0x286]] }
  0xc3   :  { %v1743_v5 = vsub.f32 %v5126_v11, %v1736_v2  ;;  %v1754_v8 = vmul.f32 %v3684_v53, %v3628_v10  ;;  %v1763_v42 = vmul.f32 %v3485_v29, %v3688_v25  ;;  %v1768_v16 = vmul.f32 %v3684_v53, %v3688_v25 }
  0xc4   :  { %v1676_v24 = vmul.f32 %v1639_v7, %v3324_v40  ;;  %vm883_vm7 = vcmp.lt.s32.totalorder %v3516_v20, 1  ;;  %v1751_v44 = vmul.f32 %v1741_v12, %v3621_v54  ;;  %v1765_v23 = vmul.f32 %v1741_v12, %v3666_v56 }
  0xc5   :  { %v1752_v36 = vmul.f32 %v1743_v5, %v3626_v19  ;;  %v1766_v62 = vmul.f32 %v1743_v5, %v3675_v6  ;;  %v1764_v32 = vadd.f32 %v1763_v42, %v1762_v60  ;;  %v1678_v3 = vmul.f32 %v1634_v37, %v3349_v45 }
  0xc6   :  { %v1677_v46 = vadd.f32 %v1676_v24, %v1675_v38  ;;  %v1696_v0 = vmul.f32 %v1637_v55, %v3293_v18  ;;  %v1697_v17 = vmul.f32 %v1639_v7, %v3318_v58  ;;  %v1699_v21 = vmul.f32 %v1634_v37, %v3351_v50  ;;  %v5127_v38 = vld [vmem:[#allocation21_spill] sm:$0xff] }
  0xc7   :  { %v1753_v57 = vadd.f32 %v1752_v36, %v1751_v44  ;;  %v1767_v40 = vadd.f32 %v1766_v62, %v1765_v23  ;;  %1771 = vst [vmem:[#allocation10 + $0x68] sm:$0xff] %v1764_v32  ;;  %v1717_v59 = vmul.f32 %v1637_v55, %v3295_v15  ;;  %v1718_v22 = vmul.f32 %v1639_v7, %v3334_v27 }
  0xc8   :  { %v3718_v61 = vadd.f32 %v1678_v3, %v1677_v46  ;;  %v1720_v45 = vmul.f32 %v1634_v37, %v3367_v43  ;;  %vm884_vm8 = vcmp.lt.s32.totalorder %v3516_v20, 2  ;;  %v1698_v58 = vadd.f32 %v1697_v17, %v1696_v0  ;;  %v5128_v46 = vld [vmem:[#allocation19_spill] sm:$0xff] }
  0xc9   :  { %v1755_v18 = vadd.f32 %v1754_v8, %v1753_v57  ;;  %v1769_v2 = vadd.f32 %v1768_v16, %v1767_v40  ;;  %v708_v50 = vclz %v3572_v4  ;;  %v1719_v63 = vadd.f32 %v1718_v22, %v1717_v59  ;;  %v5129_v59 = vld [vmem:[#allocation20_spill] sm:$0xff] }
  0xca   :  { %v873_v15 = vor.u32 %v3548_v13, %v3524_v47  ;;  %v876_v27 = vor.u32 %v3555_v9, %v3527_v30  ;;  %v879_v43 = vor.u32 %v3558_v41, %v3530_v34  ;;  %v3737_v55 = vadd.f32 %v1699_v21, %v1698_v58 }
  0xcb   :  { %1759 = vst [vmem:[#allocation10 + $0x78] sm:$0xff] %v1755_v18  ;;  %1773 = vst [vmem:[#allocation10 + $0x80] sm:$0xff] %v1769_v2  ;;  %v1774_v48 = vmul.f32 %v3480_v14, %v3718_v61  ;;  %v1779_v4 = vmul.f32 %v1741_v12, %v3718_v61  ;;  %v2751_v37 = vadd.s32 4294967294, %v708_v50  ;;  %v3744_v7 = vadd.f32 %v1720_v45, %v1719_v63  ;;  %v5130_v2 = vld [vmem:[#allocation17_spill] sm:$0xff] }
  0xcc   :  { %v882_v47 = vor.u32 %v3577_v28, %v3536_v51  ;;  %vm885_vm9 = vcmp.lt.s32.totalorder %v3516_v20, 3  ;;  %vm886_vm10 = vcmp.lt.s32.totalorder %v3516_v20, 4  ;;  %v1775_v30 = vmul.f32 %v3206_v52, %v3737_v55 }
  0xcd   :  { %v1780_v14 = vmul.f32 %v1743_v5, %v3737_v55  ;;  %vm2752_vm11 = vcmp.lt.s32.totalorder %v2751_v37, 0  ;;  %v887_v34 = vsel %vm883_vm7, %v3541_v49, %v3574_v26  ;;  %v1777_v28 = vmul.f32 %v3485_v29, %v3744_v7 }
  0xce   :  { %v1782_v51 = vmul.f32 %v3684_v53, %v3744_v7  ;;  %v711_v13 = vsel %vm2752_vm11, 0, %v2751_v37  ;;  %v888_v52 = vsel %vm886_vm10, %v876_v27, 2102212464  ;;  %v1776_v9 = vadd.f32 %v1775_v30, %v1774_v48 }
  0xcf   :  { %v1781_v41 = vadd.f32 %v1780_v14, %v1779_v4  ;;  %v712_v39 = vsub.s32 32, %v711_v13  ;;  %v713_v12 = vshll.u32 %v3533_v33, %v711_v13  ;;  %v716_v49 = vsub.s32 4294967266, %v711_v13 }
  0xd0   :  { %v889_v29 = vsel %vm885_vm9, %v873_v15, %v888_v52  ;;  %v891_v53 = vsel %vm883_vm7, %v3574_v26, %v873_v15  ;;  %v892_v11 = vsel %vm886_vm10, %v879_v43, 920167782  ;;  %v1778_v5 = vadd.f32 %v1777_v28, %v1776_v9 }
  0xd1   :  { %v1783_v8 = vadd.f32 %v1782_v51, %v1781_v41  ;;  %v714_v60 = vshrl.u32 %v5127_v38, %v712_v39  ;;  %v717_v33 = vadd.s32 127, %v716_v49  ;;  %v893_v42 = vsel %vm885_vm9, %v876_v27, %v892_v11 }
  0xd2   :  { %v895_v16 = vsel %vm883_vm7, %v873_v15, %v876_v27  ;;  %v896_v26 = vsel %vm886_vm10, %v882_v47, 1326507024  ;;  %1785 = vst [vmem:[#allocation10 + $0x70] sm:$0xff] %v1778_v5  ;;  %v890_v44 = vsel %vm884_vm8, %v887_v34, %v889_v29  ;;  %v894_v36 = vsel %vm884_vm8, %v891_v53, %v893_v42  ;;  %v1059_v53 = vld [vmem:[#allocation2 + $0x20] sm:$0xff] }
  0xd3   :  { %1787 = vst [vmem:[#allocation10 + $0x88] sm:$0xff] %v1783_v8  ;;  %v715_v24 = vor.u32 %v714_v60, %v713_v12  ;;  %v897_v23 = vsel %vm885_vm9, %v879_v43, %v896_v26  ;;  %v718_v62 = vshll.u32 %v717_v33, 23  ;;  %v726_v22 = vsub.s32 4, %v5129_v59 }
  0xd4   :  { %v898_v32 = vsel %vm884_vm8, %v895_v16, %v897_v23  ;;  %v3805_v3 = vmul.u32.u64.low %v5128_v46, %v894_v36  ;;  %v3806_v0 = vmul.u32.u64.high %v5128_v46, %v894_v36, %v3805_v3  ;;  %v906_v20 = vmul.u32 %v5128_v46, %v890_v44 }
  0xd5   :  { %v3812_v57 = vmul.u32.u64.low %v5128_v46, %v898_v32  ;;  %v3813_v40 = vmul.u32.u64.high %v5128_v46, %v898_v32, %v3812_v57  ;;  %v719_v17 = vor.u32 4788187, %v718_v62  ;;  %v722_v21 = vcvt.s32.f32 %v715_v24  ;;  %v1270_v62 = vld [vmem:[#allocation2 + $0x28] sm:$0xff] }
  0xd6   :  { %v909_v18 = vadd.s32 1, %v3806_v0  ;;  %v5131_v58 = vand.u32 2147483647, %v5130_v2  ;;  %vm642_vm13 = vcmp.lt.s32.totalorder %v5130_v2, 0  ;;  %v1794_v63 = vstv %s3712_s6  ;;  %s4128_s6 = sld [smem:[#allocation6 + $0x18c]] }
  0xd7   :  { %v720_v45 = vand.u32 2147483647, %v719_v17  ;;  %vm908_vm14 = vc.u32 %v3813_v40, %v3805_v3  ;;  %v727_v27 = vsel %vm642_vm13, %v726_v22, %v5129_v59  ;;  %v1796_v43 = vstv %s3716_s1  ;;  %s4135_s1 = sld [smem:[#allocation6 + $0x200]] }
  0xd8   :  { %vm3826_vm12 = vcmp.le.f32.partialorder %v5131_v58, 0.7853982  ;;  %v910_v48 = vsel %vm908_vm14, %v909_v18, %v3806_v0  ;;  %v1798_v4 = vstv %s3723_s2  ;;  %v1800_v37 = vstv %s3726_s12  ;;  %s4137_s2 = sld [smem:[#allocation6 + $0x201]] }
  0xd9   :  { %v723_v15 = vmul.f32 %v722_v21, %v720_v45  ;;  %v1802_v47 = vstv %s3729_s13  ;;  %v911_v30 = vadd.s32 %v910_v48, %v906_v20  ;;  %v3849_v34 = vstv %s3755_s16  ;;  %s3902_s16 = sld [smem:[#allocation6 + $0x188]] }
  0xda   :  { %v3852_v28 = vstv %s3746_s15  ;;  %v1819_v51 = vstv %s3772_s9  ;;  %v729_v13 = vsel %vm3826_vm12, 0, %v727_v27  ;;  %v3860_v52 = vstv %s3742_s14  ;;  %s3886_s14 = sld [smem:[#allocation6 + $0x189]] }
  0xdb   :  { %v724_v14 = vxor.u32 2147483648, %v723_v15  ;;  %v1827_v9 = vstv %s3782_s10  ;;  %v912_v41 = vadd.s32 536870912, %v911_v30  ;;  %v1821_v12 = vstv %s3792_s17  ;;  %s3897_s15 = sld [smem:[#allocation6 + $0x18a]] }
  0xdc   :  { %v1824_v49 = vstv %s3816_s22  ;;  %v1829_v29 = vstv %s3800_s20  ;;  %v3876_v5 = vmul.f32 %v1819_v51, %v5130_v2  ;;  %v1835_v8 = vstv %s3784_s11  ;;  %s3908_s9 = sld [smem:[#allocation6 + $0x18b]]  ;;  %v5136_v51 = vld [vmem:[#allocation18_spill] sm:$0xff] }
  0xdd   :  { %v725_v39 = vsel %vm642_vm13, %v724_v14, %v723_v15  ;;  %v913_v38 = vshrl.u32 %v912_v41, 30  ;;  %v733_v60 = vadd.s32 3, %v729_v13  ;;  %v3882_v33 = vmul.f32 %v1827_v9, %v5130_v2  ;;  %s4143_s12 = sld [smem:[#allocation6 + $0x202]] }
  0xde   :  { %v728_v11 = vsel %vm3826_vm12, %v5130_v2, %v725_v39  ;;  %v5086_v42 = vstv %s3767_s7  ;;  %v1832_v16 = vstv %s3818_s23  ;;  %v3893_v44 = vmul.f32 %v1835_v8, %v5130_v2  ;;  %s4151_s13 = sld [smem:[#allocation6 + $0x190]] }
  0xdf   :  { %2826 = vcosq.f32 %v728_v11  ;;  %v914_v26 = vshll.u32 %v913_v38, 30  ;;  %v3890_v24 = vmul.f32 %v5086_v42, %v1059_v53  ;;  %v1837_v36 = vstv %s3809_s21  ;;  %s4170_s10 = sld [smem:[#allocation6 + $0x192]] }
  0xe0   :  { %2828 = vsinq.f32 %v728_v11  ;;  %v1840_v23 = vstv %s3821_s24  ;;  %v5085_v32 = vstv %s3841_s26  ;;  %v734_v21 = vand.u32 3, %v733_v60  ;;  %s4175_s11 = sld [smem:[#allocation6 + $0x193]] }
  0xe1   :  { %5134 = vst [vmem:[#allocation21_spill] sm:$0xff] %v3890_v24  ;;  %v3904_v57 = vsub.s32 %v911_v30, %v914_v26  ;;  %v5087_v17 = vand.u32 2147483647, %v3890_v24  ;;  %v837_v59 = vand.u32 3, %v729_v13  ;;  %v1065_v20 = vand.u32 2139095040, %v3890_v24  ;;  %s4179_s17 = sld [smem:[#allocation6 + $0x194]] }
  0xe2   :  { %v1792_v45 = vstv %s3863_s0  ;;  %v937_v58 = vsub.s32 4, %v913_v38  ;;  %v3915_v50 = vmul.f32 %v5085_v32, %v1270_v62  ;;  %v1804_v15 = vstv %s3770_s8  ;;  %s4159_s8 = sld [smem:[#allocation6 + $0x191]] }
  0xe3   :  { %v917_v18 = vsub.s32 0, %v3904_v57  ;;  %v1806_v27 = vstv %s3870_s30  ;;  %v1066_v48 = vshrl.u32 %v1065_v20, 23  ;;  %v1069_v30 = vand.u32 8388607, %v5087_v17  ;;  %s4186_s20 = sld [smem:[#allocation6 + $0x195]] }
  0xe4   :  { %5135 = vst [vmem:[#allocation19_spill] sm:$0xff] %v3915_v50  ;;  %v5137_v13 = vand.u32 2147483647, %v5136_v51  ;;  %vm853_vm0 = vcmp.lt.s32.totalorder %v5136_v51, 0  ;;  %vm732_vm1 = vweird.f32 %v5130_v2  ;;  %vm735_vm2 = vcmp.lt.s32.totalorder %v734_v21, 2  ;;  %s4192_s21 = sld [smem:[#allocation6 + $0x196]] }
  0xe5   :  { %v2758_v41 = vmin.u32 %v917_v18, %v3904_v57  ;;  %vm736_vm3 = vcmp.eq.s32.totalorder %v734_v21, 0  ;;  %vm838_vm4 = vcmp.lt.s32.totalorder %v837_v59, 2  ;;  %v2765_v39 = vadd.s32 4294967169, %v1066_v48  ;;  %s4195_s22 = sld [smem:[#allocation6 + $0x197]] }
  0xe6   :  { %vm3924_vm15 = vcmp.le.f32.partialorder %v5137_v13, 0.7853982  ;;  %v938_v11 = vsel %vm853_vm0, %v937_v58, %v913_v38  ;;  %v1070_v8 = vor.u32 8388608, %v1069_v30  ;;  %v1276_v60 = vand.u32 2139095040, %v3915_v50  ;;  %s4202_s23 = sld [smem:[#allocation6 + $0x198]] }
  0xe7   :  { %v919_v53 = vclz %v2758_v41  ;;  %vm739_vm5 = vcmp.eq.s32.totalorder %v734_v21, 2  ;;  %vm839_vm6 = vcmp.eq.s32.totalorder %v837_v59, 0  ;;  %vm842_vm7 = vcmp.eq.s32.totalorder %v837_v59, 2  ;;  %s4209_s24 = sld [smem:[#allocation6 + $0x203]] }
  0xe8   :  { %v1072_v26 = vadd.s32 1, %v2765_v39  ;;  %v907_v32 = vadd.s32 %v3805_v3, %v3813_v40  ;;  %v3941_v48 = vsel %vm3924_vm15, 0, %v938_v11  ;;  %v3944_v30 = vshll.u32 %v1070_v8, 8  ;;  %s4270_s0 = sld [smem:[#allocation6 + $0x18e]] }
  0xe9   :  { %v2759_v62 = vadd.s32 4294967294, %v919_v53  ;;  %v3946_v42 = vshrl.u32 %v1276_v60, 23  ;;  %v5140_v60 = vmov 683565275   ;;  %v5141_v22 = vmov 2475754826  }
  0xea   :  { %vm1073_vm8 = vcmp.gt.s32.totalorder %v1072_v26, 0  ;;  %vm943_vm14 = vweird.f32 %v5136_v51  ;;  %s4277_s30 = sld [smem:[#allocation6 + $0x18f]] }
  0xeb   :  { %vm2760_vm9 = vcmp.lt.s32.totalorder %v2759_v62, 0  ;;  %v1074_v58 = vsel %vm1073_vm8, %v1072_v26, 0 }
  0xec   :  { %v2827_v38 = vpop.eup %2826  ;;  %v922_v17 = vsel %vm2760_vm9, 0, %v2759_v62  ;;  %v3948_v13 = vshrl.u32 %v1074_v58, 5  ;;  %v3950_v18 = vand.u32 31, %v1074_v58 }
  0xed   :  { %v2829_v39 = vpop.eup %2828  ;;  %v740_v53 = vxor.u32 2147483648, %v2827_v38  ;;  %v923_v40 = vsub.s32 32, %v922_v17  ;;  %v924_v11 = vshll.u32 %v3904_v57, %v922_v17  ;;  %v927_v41 = vsub.s32 4294967266, %v922_v17 }
  0xee   :  { %v737_v3 = vxor.u32 2147483648, %v2829_v39  ;;  %v3956_v8 = vsub.s32 32, %v3950_v18  ;;  %v1079_v62 = vshll.u32 %v5140_v60, %v3950_v18  ;;  %vm1094_vm10 = vcmp.lt.s32.totalorder %v3948_v13, 1 }
  0xef   :  { %v741_v20 = vsel %vm739_vm5, %v740_v53, %v2829_v39  ;;  %v844_v26 = vsel %vm842_vm7, %v740_v53, %v2829_v39  ;;  %v925_v46 = vshrl.u32 %v907_v32, %v923_v40  ;;  %v928_v57 = vadd.s32 127, %v927_v41 }
  0xf0   :  { %v738_v58 = vsel %vm736_vm3, %v2827_v38, %v737_v3  ;;  %v841_v0 = vsel %vm839_vm6, %v2827_v38, %v737_v3  ;;  %v3966_v53 = vshrl.u32 %v5140_v60, %v3956_v8  ;;  %v1080_v14 = vshrl.u32 %v5141_v22, %v3956_v8 }
  0xf1   :  { %v742_v17 = vsel %vm735_vm2, %v738_v58, %v741_v20  ;;  %v845_v39 = vsel %vm838_vm4, %v841_v0, %v844_v26  ;;  %v3974_v21 = vor.u32 %v925_v46, %v924_v11  ;;  %v929_v0 = vshll.u32 %v928_v57, 23 }
  0xf2   :  { %v743_v38 = vsel %vm732_vm1, nan, %v742_v17  ;;  %v846_v32 = vsel %vm732_vm1, nan, %v845_v39  ;;  %v3992_v11 = vor.u32 %v1080_v14, %v1079_v62  ;;  %vm1095_vm11 = vcmp.lt.s32.totalorder %v3948_v13, 2 }
  0xf3   :  { %v3976_v59 = vsub.f32 1.0, %v846_v32  ;;  %v3980_v20 = vmul.f32 %v1794_v63, %v743_v38  ;;  %v1797_v41 = vmul.f32 %v1796_v43, %v743_v38  ;;  %v1791_v3 = vsub.f32 %v5130_v2, %v743_v38 }
  0xf4   :  { %v3987_v40 = vmul.f32 %v1792_v45, %v743_v38  ;;  %v3989_v26 = vor.u32 4788187, %v929_v0  ;;  %vm1096_vm12 = vcmp.lt.s32.totalorder %v3948_v13, 3  ;;  %vm1097_vm13 = vcmp.lt.s32.totalorder %v3948_v13, 4 }
  0xf5   :  { %v1799_v58 = vmul.f32 %v1798_v4, %v3976_v59  ;;  %v1801_v63 = vmul.f32 %v1800_v37, %v3976_v59  ;;  %v4003_v2 = vmul.f32 %v1802_v47, %v3976_v59  ;;  %v1822_v43 = vmul.f32 %v1821_v12, %v3976_v59 }
  0xf6   :  { %v1825_v45 = vmul.f32 %v1824_v49, %v1791_v3  ;;  %v1830_v14 = vmul.f32 %v1829_v29, %v3976_v59  ;;  %v1833_v62 = vmul.f32 %v1832_v16, %v1791_v3  ;;  %v1838_v4 = vmul.f32 %v1837_v36, %v3976_v59 }
  0xf7   :  { %v1810_v57 = vadd.f32 1.0, %v1799_v58  ;;  %v1814_v17 = vadd.f32 %v1801_v63, %v1797_v41  ;;  %v1816_v37 = vsub.f32 %v4003_v2, %v3980_v20  ;;  %v1823_v47 = vadd.f32 %v1822_v43, %v3876_v5 }
  0xf8   :  { %v1831_v39 = vadd.f32 %v1830_v14, %v3882_v33  ;;  %v1839_v12 = vadd.f32 %v1838_v4, %v3893_v44  ;;  %v1841_v49 = vmul.f32 %v1840_v23, %v1791_v3  ;;  %v1805_v29 = vmul.f32 %v1804_v15, %v3976_v59 }
  0xf9   :  { %v1843_v16 = vmul.f32 %v1810_v57, %v3621_v54  ;;  %v1844_v36 = vmul.f32 %v1814_v17, %v3666_v56  ;;  %v1846_v38 = vmul.f32 %v1816_v37, %v3718_v61  ;;  %v1864_v32 = vmul.f32 %v1810_v57, %v3626_v19 }
  0xfa   :  { %v1865_v5 = vmul.f32 %v1814_v17, %v3675_v6  ;;  %v1867_v33 = vmul.f32 %v1816_v37, %v3737_v55  ;;  %v1885_v44 = vmul.f32 %v1810_v57, %v3628_v10  ;;  %v1886_v23 = vmul.f32 %v1814_v17, %v3688_v25 }
  0xfb   :  { %v1845_v0 = vadd.f32 %v1844_v36, %v1843_v16  ;;  %v1888_v15 = vmul.f32 %v1816_v37, %v3744_v7  ;;  %v1826_v3 = vadd.f32 %v1825_v45, %v1823_v47  ;;  %v1834_v58 = vadd.f32 %v1833_v62, %v1831_v39 }
  0xfc   :  { %v1866_v43 = vadd.f32 %v1865_v5, %v1864_v32  ;;  %v1887_v14 = vadd.f32 %v1886_v23, %v1885_v44  ;;  %v1842_v4 = vadd.f32 %v1841_v49, %v1839_v12  ;;  %v1807_v46 = vmul.f32 %v1806_v27, %v3976_v59 }
  0xfd   :  { %v4040_v24 = vadd.f32 %v1846_v38, %v1845_v0  ;;  %v1858_v60 = vmul.f32 %v1826_v3, %v3621_v54  ;;  %v1859_v50 = vmul.f32 %v1834_v58, %v3666_v56  ;;  %v1879_v57 = vmul.f32 %v1826_v3, %v3626_v19 }
  0xfe   :  { %v4045_v17 = vadd.f32 %v1867_v33, %v1866_v43  ;;  %v4047_v16 = vadd.f32 %v1888_v15, %v1887_v14  ;;  %v1861_v45 = vmul.f32 %v1842_v4, %v3718_v61  ;;  %v1880_v62 = vmul.f32 %v1834_v58, %v3675_v6 }
  0xff   :  { %v1924_v37 = vmul.f32 %v3860_v52, %v4040_v24  ;;  %v1860_v27 = vadd.f32 %v1859_v50, %v1858_v60  ;;  %v1882_v47 = vmul.f32 %v1842_v4, %v3737_v55  ;;  %v1900_v39 = vmul.f32 %v1826_v3, %v3628_v10 }
 0x100   :  { %v1925_v12 = vmul.f32 %v3852_v28, %v4045_v17  ;;  %v1927_v49 = vmul.f32 %v3849_v34, %v4047_v16  ;;  %v1881_v36 = vadd.f32 %v1880_v62, %v1879_v57  ;;  %v1901_v38 = vmul.f32 %v1834_v58, %v3688_v25 }
 0x101   :  { %v1862_v32 = vadd.f32 %v1861_v45, %v1860_v27  ;;  %v1903_v5 = vmul.f32 %v1842_v4, %v3744_v7  ;;  %v1811_v33 = vadd.f32 1.0, %v1805_v29  ;;  %v1813_v44 = vsub.f32 %v1801_v63, %v1797_v41 }
 0x102   :  { %v1926_v23 = vadd.f32 %v1925_v12, %v1924_v37  ;;  %v1883_v50 = vadd.f32 %v1882_v47, %v1881_v36  ;;  %v1902_v60 = vadd.f32 %v1901_v38, %v1900_v39  ;;  %v1818_v0 = vadd.f32 %v1807_v46, %v3987_v40 }
 0x103   :  { %v4063_v15 = vadd.f32 %v1862_v32, %v3644_v1  ;;  %v1848_v3 = vmul.f32 %v1813_v44, %v3621_v54  ;;  %v1849_v43 = vmul.f32 %v1811_v33, %v3666_v56  ;;  %v1869_v14 = vmul.f32 %v1813_v44, %v3626_v19 }
 0x104   :  { %v1928_v58 = vadd.f32 %v1927_v49, %v1926_v23  ;;  %v4069_v57 = vadd.f32 %v1883_v50, %v3650_v35  ;;  %v1904_v29 = vadd.f32 %v1903_v5, %v1902_v60  ;;  %v1851_v41 = vmul.f32 %v1818_v0, %v3718_v61 }
 0x105   :  { %v1913_v63 = vmul.f32 %v3849_v34, %v4063_v15  ;;  %v1915_v1 = vmul.f32 %v3852_v28, %v4063_v15  ;;  %v1850_v4 = vadd.f32 %v1849_v43, %v1848_v3  ;;  %v1870_v45 = vmul.f32 %v1811_v33, %v3675_v6 }
 0x106   :  { %1935 = vst [vmem:[#allocation10 + $0x90] sm:$0xff] %v1928_v58  ;;  %v4078_v62 = vadd.f32 %v1904_v29, %v3659_v31  ;;  %v1907_v35 = vmul.f32 %v3849_v34, %v4069_v57  ;;  %v1916_v37 = vmul.f32 %v3860_v52, %v4069_v57  ;;  %v1872_v27 = vmul.f32 %v1818_v0, %v3737_v55 }
 0x107   :  { %v4085_v47 = vadd.f32 %v1851_v41, %v1850_v4  ;;  %v1871_v39 = vadd.f32 %v1870_v45, %v1869_v14  ;;  %v1890_v12 = vmul.f32 %v1813_v44, %v3628_v10  ;;  %v1891_v49 = vmul.f32 %v1811_v33, %v3688_v25 }
 0x108   :  { %v1909_v31 = vmul.f32 %v3852_v28, %v4078_v62  ;;  %v1912_v36 = vmul.f32 %v3860_v52, %v4078_v62  ;;  %v1917_v38 = vsub.f32 %v1915_v1, %v1916_v37  ;;  %v1893_v32 = vmul.f32 %v1818_v0, %v3744_v7 }
 0x109   :  { %v4094_v5 = vadd.f32 %v1872_v27, %v1871_v39  ;;  %v1892_v23 = vadd.f32 %v1891_v49, %v1890_v12  ;;  %v1938_v50 = vmul.f32 %v3860_v52, %v4085_v47  ;;  %v5142_v44 = vstv %s3879_s5  ;;  %s4488_s5 = sld [smem:[#allocation6 + $0x209]] }
 0x10a   :  { %v1809_v33 = vmul.f32 %v5142_v44, %v3976_v59  ;;  %v1910_v60 = vsub.f32 %v1907_v35, %v1909_v31  ;;  %v1914_v3 = vsub.f32 %v1912_v36, %v1913_v63  ;;  %v5143_v43 = vstv %s3854_s28  ;;  %s4264_s28 = sld [smem:[#allocation6 + $0x18d]] }
 0x10b   :  { %v1923_v14 = vsub.f32 %v5143_v43, %v1917_v38  ;;  %v1815_v58 = vadd.f32 %v4003_v2, %v3980_v20  ;;  %v4105_v29 = vadd.f32 %v1893_v32, %v1892_v23  ;;  %v1939_v0 = vmul.f32 %v3852_v28, %v4094_v5 }
 0x10c   :  { %v1812_v41 = vadd.f32 1.0, %v1809_v33  ;;  %v1817_v1 = vsub.f32 %v1807_v46, %v3987_v40  ;;  %v5144_v4 = vstv %s3832_s25  ;;  %v5145_v37 = vstv %s3846_s27  ;;  %s4220_s25 = sld [smem:[#allocation6 + $0x204]] }
 0x10d   :  { %v1919_v45 = vsub.f32 %v5144_v4, %v1910_v60  ;;  %v1921_v27 = vsub.f32 %v5145_v37, %v1914_v3  ;;  %v1932_v59 = vmul.f32 %v1923_v14, %v4047_v16  ;;  %v1853_v63 = vmul.f32 %v1815_v58, %v3621_v54  ;;  %s4257_s27 = sld [smem:[#allocation6 + $0x187]] }
 0x10e   :  { %v1940_v35 = vadd.f32 %v1939_v0, %v1938_v50  ;;  %v1941_v20 = vmul.f32 %v3849_v34, %v4105_v29  ;;  %v1946_v2 = vmul.f32 %v1923_v14, %v4105_v29  ;;  %v1854_v39 = vmul.f32 %v1817_v1, %v3666_v56 }
 0x10f   :  { %v1929_v12 = vmul.f32 %v1919_v45, %v4040_v24  ;;  %v1930_v40 = vmul.f32 %v1921_v27, %v4045_v17  ;;  %v1943_v46 = vmul.f32 %v1919_v45, %v4085_v47  ;;  %v1944_v49 = vmul.f32 %v1921_v27, %v4094_v5 }
 0x110   :  { %v1942_v31 = vadd.f32 %v1941_v20, %v1940_v35  ;;  %v1855_v36 = vadd.f32 %v1854_v39, %v1853_v63  ;;  %v1856_v54 = vmul.f32 %v1812_v41, %v3718_v61  ;;  %v1874_v38 = vmul.f32 %v1815_v58, %v3626_v19 }
 0x111   :  { %v1931_v32 = vadd.f32 %v1930_v40, %v1929_v12  ;;  %v1945_v23 = vadd.f32 %v1944_v49, %v1943_v46  ;;  %v1875_v50 = vmul.f32 %v1817_v1, %v3675_v6  ;;  %v1877_v56 = vmul.f32 %v1812_v41, %v3737_v55 }
 0x112   :  { %1949 = vst [vmem:[#allocation10 + $0x98] sm:$0xff] %v1942_v31  ;;  %v4130_v44 = vadd.f32 %v1856_v54, %v1855_v36  ;;  %v1895_v33 = vmul.f32 %v1815_v58, %v3628_v10  ;;  %v1896_v60 = vmul.f32 %v1817_v1, %v3688_v25  ;;  %v1898_v3 = vmul.f32 %v1812_v41, %v3744_v7 }
 0x113   :  { %v1933_v19 = vadd.f32 %v1932_v59, %v1931_v32  ;;  %v1947_v61 = vadd.f32 %v1946_v2, %v1945_v23  ;;  %v1876_v43 = vadd.f32 %v1875_v50, %v1874_v38  ;;  %v931_v6 = vand.u32 2147483647, %v3989_v26 }
 0x114   :  { %v1897_v55 = vadd.f32 %v1896_v60, %v1895_v33  ;;  %v1952_v0 = vmul.f32 %v3860_v52, %v4130_v44  ;;  %v1957_v4 = vmul.f32 %v1919_v45, %v4130_v44  ;;  %v1082_v10 = vshll.u32 %v5141_v22, %v3950_v18  ;;  %v2842_v33 = vld [vmem:[#allocation2 + $0x18] sm:$0xff] }
 0x115   :  { %1937 = vst [vmem:[#allocation10 + $0xa8] sm:$0xff] %v1933_v19  ;;  %1951 = vst [vmem:[#allocation10 + $0xb0] sm:$0xff] %v1947_v61  ;;  %v4147_v25 = vadd.f32 %v1877_v56, %v1876_v43  ;;  %v5146_v7 = vcvt.s32.f32 %v3974_v21  ;;  %v5147_v26 = vmov 2131351028   ;;  %v5148_v45 = vmov 2102212464  }
 0x116   :  { %v1083_v41 = vshrl.u32 %v5147_v26, %v3956_v8  ;;  %v1085_v52 = vshll.u32 %v5147_v26, %v3950_v18  ;;  %v4157_v1 = vadd.f32 %v1898_v3, %v1897_v55  ;;  %v1086_v37 = vshrl.u32 %v5148_v45, %v3956_v8 }
 0x117   :  { %v934_v58 = vmul.f32 %v5146_v7, %v931_v6  ;;  %v1088_v59 = vshll.u32 %v5148_v45, %v3950_v18  ;;  %v5149_v21 = vmov 920167782   ;;  %v1953_v35 = vmul.f32 %v3852_v28, %v4147_v25 }
 0x118   :  { %v1089_v63 = vshrl.u32 %v5149_v21, %v3956_v8  ;;  %v1958_v20 = vmul.f32 %v1921_v27, %v4147_v25  ;;  %v1084_v39 = vor.u32 %v1083_v41, %v1082_v10  ;;  %v1955_v12 = vmul.f32 %v3849_v34, %v4157_v1 }
 0x119   :  { %v935_v2 = vxor.u32 2147483648, %v934_v58  ;;  %v1960_v40 = vmul.f32 %v1923_v14, %v4157_v1  ;;  %v1087_v46 = vor.u32 %v1086_v37, %v1085_v52  ;;  %v1954_v31 = vadd.f32 %v1953_v35, %v1952_v0 }
 0x11a   :  { %v1090_v49 = vor.u32 %v1089_v63, %v1088_v59  ;;  %v1959_v36 = vadd.f32 %v1958_v20, %v1957_v4  ;;  %v1091_v27 = vshll.u32 %v5149_v21, %v3950_v18  ;;  %v5150_v14 = vmov 1326507024  }
 0x11b   :  { %v936_v28 = vsel %vm853_vm0, %v935_v2, %v934_v58  ;;  %v1092_v54 = vshrl.u32 %v5150_v14, %v3956_v8  ;;  %v1956_v38 = vadd.f32 %v1955_v12, %v1954_v31  ;;  %v1098_v18 = vsel %vm1094_vm10, %v3966_v53, %v3992_v11 }
 0x11c   :  { %v939_v34 = vsel %vm3924_vm15, %v5136_v51, %v936_v28  ;;  %v1961_v32 = vadd.f32 %v1960_v40, %v1959_v36  ;;  %v1099_v8 = vsel %vm1097_vm13, %v1087_v46, 2102212464  ;;  %v1102_v23 = vsel %vm1094_vm10, %v3992_v11, %v1084_v39 }
 0x11d   :  { %2830 = vcosq.f32 %v939_v34  ;;  %v1093_v9 = vor.u32 %v1092_v54, %v1091_v27  ;;  %1963 = vst [vmem:[#allocation10 + $0xa0] sm:$0xff] %v1956_v38  ;;  %v1103_v50 = vsel %vm1097_vm13, %v1090_v49, 920167782  ;;  %v1106_v56 = vsel %vm1094_vm10, %v1084_v39, %v1087_v46 }
 0x11e   :  { %2832 = vsinq.f32 %v939_v34  ;;  %1965 = vst [vmem:[#allocation10 + $0xb8] sm:$0xff] %v1961_v32  ;;  %v5151_v60 = vstv %s3096_s29  ;;  %v1100_v3 = vsel %vm1096_vm12, %v1084_v39, %v1099_v8  ;;  %v1104_v11 = vsel %vm1096_vm12, %v1087_v46, %v1103_v50  ;;  %s4227_s29 = sld [smem:[#allocation6 + $0x205]] }
 0x11f   :  { %v4213_v53 = vmul.f32 %v2842_v33, %v5151_v60  ;;  %v1107_v19 = vsel %vm1097_vm13, %v1093_v9, 1326507024  ;;  %v944_v61 = vadd.s32 3, %v3941_v48  ;;  %v1105_v43 = vsel %vm1095_vm11, %v1102_v23, %v1104_v11 }
 0x120   :  { %v1108_v6 = vsel %vm1096_vm12, %v1090_v49, %v1107_v19  ;;  %v2773_v55 = vadd.s32 4294967169, %v3946_v42  ;;  %v1101_v0 = vsel %vm1095_vm11, %v1098_v18, %v1100_v3  ;;  %v1980_v58 = vstv %s4128_s6  ;;  %s4506_s6 = sld [smem:[#allocation6 + $0x280]] }
 0x121   :  { %v1109_v4 = vsel %vm1095_vm11, %v1106_v56, %v1108_v6  ;;  %v4234_v10 = vmul.u32.u64.low %v3944_v30, %v1105_v43  ;;  %v4235_v7 = vmul.u32.u64.high %v3944_v30, %v1105_v43, %v4234_v10  ;;  %v1997_v41 = vstv %s4151_s13  ;;  %s4533_s13 = sld [smem:[#allocation6 + $0x211]] }
 0x122   :  { %v4241_v52 = vmul.u32.u64.low %v3944_v30, %v1109_v4  ;;  %v4242_v37 = vmul.u32.u64.high %v3944_v30, %v1109_v4, %v4241_v52  ;;  %v4245_v42 = vstv %s4143_s12  ;;  %v4248_v59 = vstv %s4137_s2  ;;  %s4520_s2 = sld [smem:[#allocation6 + $0x282]] }
 0x123   :  { %v4251_v13 = vstv %s4135_s1  ;;  %v1999_v63 = vstv %s4175_s11  ;;  %v2005_v35 = vstv %s4159_s8  ;;  %v2013_v20 = vstv %s4170_s10  ;;  %s4514_s1 = sld [smem:[#allocation6 + $0x281]] }
 0x124   :  { %v1117_v2 = vmul.u32 %v3944_v30, %v1101_v0  ;;  %v1283_v39 = vadd.s32 1, %v2773_v55  ;;  %v945_v12 = vand.u32 3, %v944_v61  ;;  %v1048_v40 = vand.u32 3, %v3941_v48  ;;  %v5153_v55 = vld [vmem:[#allocation19_spill] sm:$0xff]  ;;  %s4524_s12 = sld [smem:[#allocation6 + $0x210]] }
 0x125   :  { %v4262_v46 = vmul.f32 %v1997_v41, %v4213_v53  ;;  %v1120_v49 = vadd.s32 1, %v4235_v7  ;;  %v2002_v31 = vstv %s4192_s21  ;;  %v2007_v36 = vstv %s4179_s17  ;;  %s4536_s8 = sld [smem:[#allocation6 + $0x212]] }
 0x126   :  { %v2010_v28 = vstv %s4195_s22  ;;  %vm1119_vm15 = vc.u32 %v4242_v37, %v4234_v10  ;;  %v2006_v30 = vmul.f32 %v2005_v35, %v4213_v53  ;;  %v2014_v48 = vmul.f32 %v2013_v20, %v4213_v53  ;;  %s4540_s10 = sld [smem:[#allocation6 + $0x213]] }
 0x127   :  { %v2015_v27 = vstv %s4186_s20  ;;  %v1121_v34 = vsel %vm1119_vm15, %v1120_v49, %v4235_v7  ;;  %v2018_v54 = vstv %s4202_s23  ;;  %vm1284_vm0 = vcmp.gt.s32.totalorder %v1283_v39, 0  ;;  %s4547_s11 = sld [smem:[#allocation6 + $0x214]] }
 0x128   :  { %v1122_v32 = vadd.s32 %v1121_v34, %v1117_v2  ;;  %vm950_vm1 = vcmp.eq.s32.totalorder %v945_v12, 2  ;;  %vm1053_vm2 = vcmp.eq.s32.totalorder %v1048_v40, 2  ;;  %vm947_vm3 = vcmp.eq.s32.totalorder %v945_v12, 0  ;;  %s4549_s17 = sld [smem:[#allocation6 + $0x215]] }
 0x129   :  { %vm1050_vm4 = vcmp.eq.s32.totalorder %v1048_v40, 0  ;;  %vm946_vm5 = vcmp.lt.s32.totalorder %v945_v12, 2  ;;  %vm1049_vm6 = vcmp.lt.s32.totalorder %v1048_v40, 2  ;;  %v4284_v60 = vsel %vm1284_vm0, %v1283_v39, 0  ;;  %s4551_s20 = sld [smem:[#allocation6 + $0x216]] }
 0x12a   :  { %v2831_v9 = vpop.eup %2830  ;;  %v1123_v56 = vadd.s32 536870912, %v1122_v32  ;;  %v1970_v19 = vstv %s4257_s27  ;;  %v5093_v0 = vand.u32 2147483647, %v5153_v55  ;;  %v4291_v4 = vand.u32 31, %v4284_v60  ;;  %s4555_s21 = sld [smem:[#allocation6 + $0x217]] }
 0x12b   :  { %v2833_v23 = vpop.eup %2832  ;;  %v951_v50 = vxor.u32 2147483648, %v2831_v9  ;;  %v1982_v52 = vstv %s4264_s28  ;;  %v1984_v39 = vstv %s4270_s0  ;;  %v5154_v49 = vstv %s3902_s16  ;;  %s4498_s16 = sld [smem:[#allocation6 + $0x20b]] }
 0x12c   :  { %v948_v33 = vxor.u32 2147483648, %v2833_v23  ;;  %v4287_v61 = vshrl.u32 %v1123_v56, 30  ;;  %v4319_v51 = vsub.s32 32, %v4291_v4  ;;  %s4557_s22 = sld [smem:[#allocation6 + $0x218]] }
 0x12d   :  { %v952_v3 = vsel %vm950_vm1, %v951_v50, %v2833_v23  ;;  %v1055_v11 = vsel %vm1053_vm2, %v951_v50, %v2833_v23  ;;  %s4561_s23 = sld [smem:[#allocation6 + $0x283]] }
 0x12e   :  { %5152 = vst [vmem:[#allocation20_spill] sm:$0xff] %v4287_v61  ;;  %v949_v43 = vsel %vm947_vm3, %v2831_v9, %v948_v33  ;;  %v1052_v6 = vsel %vm1050_vm4, %v2831_v9, %v948_v33  ;;  %v1125_v35 = vshll.u32 %v4287_v61, 30  ;;  %v5155_v9 = vstv %s3886_s14  ;;  %s4491_s14 = sld [smem:[#allocation6 + $0x20a]] }
 0x12f   :  { %v953_v7 = vsel %vm946_vm5, %v949_v43, %v952_v3  ;;  %v1056_v41 = vsel %vm1049_vm6, %v1052_v6, %v1055_v11  ;;  %v4316_v3 = vand.u32 8388607, %v5093_v0  ;;  %v5156_v11 = vstv %s3897_s15  ;;  %s4494_s15 = sld [smem:[#allocation6 + $0x208]] }
 0x130   :  { %v954_v20 = vsel %vm943_vm14, nan, %v953_v7  ;;  %v1057_v2 = vsel %vm943_vm14, nan, %v1056_v41  ;;  %v4312_v33 = vsub.s32 %v1122_v32, %v1125_v35  ;;  %v5157_v6 = vstv %s3908_s9  ;;  %s4501_s9 = sld [smem:[#allocation6 + $0x20c]] }
 0x131   :  { %v4301_v40 = vsub.f32 1.0, %v1057_v2  ;;  %v4305_v34 = vmul.f32 %v5154_v49, %v954_v20  ;;  %v1975_v23 = vmul.f32 %v5155_v9, %v954_v20  ;;  %v1969_v50 = vsub.f32 %v4213_v53, %v954_v20  ;;  %s4588_s27 = sld [smem:[#allocation6 + $0x20d]] }
 0x132   :  { %v4310_v56 = vmul.f32 %v1970_v19, %v954_v20  ;;  %s4601_s28 = sld [smem:[#allocation6 + $0x20f]] }
 0x133   :  { %v1977_v43 = vmul.f32 %v5156_v11, %v4301_v40  ;;  %v1979_v7 = vmul.f32 %v5157_v6, %v4301_v40  ;;  %v4330_v53 = vmul.f32 %v1980_v58, %v4301_v40  ;;  %v2000_v32 = vmul.f32 %v1999_v63, %v4301_v40  ;;  %s4752_s0 = sld [smem:[#allocation6 + $0x289]] }
 0x134   :  { %v2003_v19 = vmul.f32 %v2002_v31, %v1969_v50  ;;  %v2008_v41 = vmul.f32 %v2007_v36, %v4301_v40  ;;  %v2011_v35 = vmul.f32 %v2010_v28, %v1969_v50  ;;  %v2016_v20 = vmul.f32 %v2015_v27, %v4301_v40 }
 0x135   :  { %v1988_v2 = vadd.f32 1.0, %v1977_v43  ;;  %v1992_v49 = vadd.f32 %v1979_v7, %v1975_v23  ;;  %v1994_v9 = vsub.f32 %v4330_v53, %v4305_v34  ;;  %v2001_v11 = vadd.f32 %v2000_v32, %v4262_v46 }
 0x136   :  { %v2009_v6 = vadd.f32 %v2008_v41, %v2006_v30  ;;  %v2017_v0 = vadd.f32 %v2016_v20, %v2014_v48  ;;  %v2019_v58 = vmul.f32 %v2018_v54, %v1969_v50  ;;  %v1983_v18 = vmul.f32 %v1982_v52, %v4301_v40 }
 0x137   :  { %v2021_v63 = vmul.f32 %v1988_v2, %v4040_v24  ;;  %v2022_v31 = vmul.f32 %v1992_v49, %v4085_v47  ;;  %v2024_v36 = vmul.f32 %v1994_v9, %v4130_v44  ;;  %v2042_v28 = vmul.f32 %v1988_v2, %v4045_v17 }
 0x138   :  { %v2043_v27 = vmul.f32 %v1992_v49, %v4094_v5  ;;  %v2045_v43 = vmul.f32 %v1994_v9, %v4147_v25  ;;  %v2063_v38 = vmul.f32 %v1988_v2, %v4047_v16  ;;  %v2064_v46 = vmul.f32 %v1992_v49, %v4105_v29 }
 0x139   :  { %v2023_v30 = vadd.f32 %v2022_v31, %v2021_v63  ;;  %v2066_v48 = vmul.f32 %v1994_v9, %v4157_v1  ;;  %v2004_v54 = vadd.f32 %v2003_v19, %v2001_v11  ;;  %v2012_v52 = vadd.f32 %v2011_v35, %v2009_v6 }
 0x13a   :  { %v2044_v50 = vadd.f32 %v2043_v27, %v2042_v28  ;;  %v2065_v32 = vadd.f32 %v2064_v46, %v2063_v38  ;;  %v2020_v41 = vadd.f32 %v2019_v58, %v2017_v0  ;;  %v1985_v20 = vmul.f32 %v1984_v39, %v4301_v40 }
 0x13b   :  { %v4351_v8 = vadd.f32 %v2024_v36, %v2023_v30  ;;  %v2036_v12 = vmul.f32 %v2004_v54, %v4040_v24  ;;  %v2037_v55 = vmul.f32 %v2012_v52, %v4085_v47  ;;  %v2057_v2 = vmul.f32 %v2004_v54, %v4045_v17 }
 0x13c   :  { %v4356_v61 = vadd.f32 %v2045_v43, %v2044_v50  ;;  %v4358_v49 = vadd.f32 %v2066_v48, %v2065_v32  ;;  %v2039_v19 = vmul.f32 %v2020_v41, %v4130_v44  ;;  %v2058_v35 = vmul.f32 %v2012_v52, %v4094_v5 }
 0x13d   :  { %v2102_v38 = vmul.f32 %v4251_v13, %v4351_v8  ;;  %v2038_v0 = vadd.f32 %v2037_v55, %v2036_v12  ;;  %v2060_v39 = vmul.f32 %v2020_v41, %v4147_v25  ;;  %v2078_v9 = vmul.f32 %v2004_v54, %v4047_v16 }
 0x13e   :  { %v2103_v11 = vmul.f32 %v4248_v59, %v4356_v61  ;;  %v2105_v6 = vmul.f32 %v4245_v42, %v4358_v49  ;;  %v2059_v58 = vadd.f32 %v2058_v35, %v2057_v2  ;;  %v2079_v63 = vmul.f32 %v2012_v52, %v4105_v29 }
 0x13f   :  { %v2040_v31 = vadd.f32 %v2039_v19, %v2038_v0  ;;  %v2081_v36 = vmul.f32 %v2020_v41, %v4157_v1  ;;  %v1989_v28 = vadd.f32 1.0, %v1983_v18  ;;  %v1991_v27 = vsub.f32 %v1979_v7, %v1975_v23 }
 0x140   :  { %v2104_v43 = vadd.f32 %v2103_v11, %v2102_v38  ;;  %v2061_v55 = vadd.f32 %v2060_v39, %v2059_v58  ;;  %v2080_v12 = vadd.f32 %v2079_v63, %v2078_v9  ;;  %v1996_v46 = vadd.f32 %v1985_v20, %v4310_v56 }
 0x141   :  { %v4374_v30 = vadd.f32 %v2040_v31, %v4063_v15  ;;  %v2026_v48 = vmul.f32 %v1991_v27, %v4040_v24  ;;  %v2027_v54 = vmul.f32 %v1989_v28, %v4085_v47  ;;  %v2047_v50 = vmul.f32 %v1991_v27, %v4045_v17 }
 0x142   :  { %v2106_v52 = vadd.f32 %v2105_v6, %v2104_v43  ;;  %v4380_v32 = vadd.f32 %v2061_v55, %v4069_v57  ;;  %v2082_v18 = vadd.f32 %v2081_v36, %v2080_v12  ;;  %v2029_v23 = vmul.f32 %v1996_v46, %v4130_v44 }
 0x143   :  { %v2091_v7 = vmul.f32 %v4245_v42, %v4374_v30  ;;  %v2093_v15 = vmul.f32 %v4248_v59, %v4374_v30  ;;  %v2028_v41 = vadd.f32 %v2027_v54, %v2026_v48  ;;  %v2048_v2 = vmul.f32 %v1989_v28, %v4094_v5 }
 0x144   :  { %2113 = vst [vmem:[#allocation10 + $0xc0] sm:$0xff] %v2106_v52  ;;  %v4389_v19 = vadd.f32 %v2082_v18, %v4078_v62  ;;  %v2085_v57 = vmul.f32 %v4245_v42, %v4380_v32  ;;  %v2094_v35 = vmul.f32 %v4251_v13, %v4380_v32  ;;  %v2050_v38 = vmul.f32 %v1996_v46, %v4147_v25 }
 0x145   :  { %v4396_v0 = vadd.f32 %v2029_v23, %v2028_v41  ;;  %v2049_v39 = vadd.f32 %v2048_v2, %v2047_v50  ;;  %v2068_v9 = vmul.f32 %v1991_v27, %v4047_v16  ;;  %v2069_v11 = vmul.f32 %v1989_v28, %v4105_v29 }
 0x146   :  { %v2087_v62 = vmul.f32 %v4248_v59, %v4389_v19  ;;  %v2090_v6 = vmul.f32 %v4251_v13, %v4389_v19  ;;  %v2095_v58 = vsub.f32 %v2093_v15, %v2094_v35  ;;  %v2071_v63 = vmul.f32 %v1996_v46, %v4157_v1 }
 0x147   :  { %v4405_v31 = vadd.f32 %v2050_v38, %v2049_v39  ;;  %v2070_v36 = vadd.f32 %v2069_v11, %v2068_v9  ;;  %v2116_v43 = vmul.f32 %v4251_v13, %v4396_v0  ;;  %v5158_v27 = vstv %s4277_s30  ;;  %s4757_s30 = sld [smem:[#allocation6 + $0x28a]] }
 0x148   :  { %v1987_v28 = vmul.f32 %v5158_v27, %v4301_v40  ;;  %v2088_v55 = vsub.f32 %v2085_v57, %v2087_v62  ;;  %v2092_v12 = vsub.f32 %v2090_v6, %v2091_v7  ;;  %v5159_v48 = vstv %s4227_s29  ;;  %s4575_s29 = sld [smem:[#allocation6 + $0x207]] }
 0x149   :  { %v2101_v54 = vsub.f32 %v5159_v48, %v2095_v58  ;;  %v1993_v50 = vadd.f32 %v4330_v53, %v4305_v34  ;;  %v4416_v52 = vadd.f32 %v2071_v63, %v2070_v36  ;;  %v2117_v46 = vmul.f32 %v4248_v59, %v4405_v31 }
 0x14a   :  { %v1990_v18 = vadd.f32 1.0, %v1987_v28  ;;  %v1995_v23 = vsub.f32 %v1985_v20, %v4310_v56  ;;  %v5160_v15 = vstv %s4209_s24  ;;  %v5161_v2 = vstv %s4220_s25  ;;  %s4563_s24 = sld [smem:[#allocation6 + $0x284]] }
 0x14b   :  { %v2097_v41 = vsub.f32 %v5160_v15, %v2088_v55  ;;  %v2099_v35 = vsub.f32 %v5161_v2, %v2092_v12  ;;  %v2110_v40 = vmul.f32 %v2101_v54, %v4358_v49  ;;  %v2031_v7 = vmul.f32 %v1993_v50, %v4040_v24  ;;  %s4569_s25 = sld [smem:[#allocation6 + $0x285]] }
 0x14c   :  { %v2118_v57 = vadd.f32 %v2117_v46, %v2116_v43  ;;  %v2119_v34 = vmul.f32 %v4245_v42, %v4416_v52  ;;  %v2124_v53 = vmul.f32 %v2101_v54, %v4416_v52  ;;  %v2032_v38 = vmul.f32 %v1995_v23, %v4085_v47 }
 0x14d   :  { %v2107_v39 = vmul.f32 %v2097_v41, %v4351_v8  ;;  %v2108_v56 = vmul.f32 %v2099_v35, %v4356_v61  ;;  %v2121_v20 = vmul.f32 %v2097_v41, %v4396_v0  ;;  %v2122_v9 = vmul.f32 %v2099_v35, %v4405_v31 }
 0x14e   :  { %v2120_v11 = vadd.f32 %v2119_v34, %v2118_v57  ;;  %v2033_v62 = vadd.f32 %v2032_v38, %v2031_v7  ;;  %v2034_v24 = vmul.f32 %v1990_v18, %v4130_v44  ;;  %v2052_v6 = vmul.f32 %v1993_v50, %v4045_v17 }
 0x14f   :  { %v2109_v58 = vadd.f32 %v2108_v56, %v2107_v39  ;;  %v2123_v63 = vadd.f32 %v2122_v9, %v2121_v20  ;;  %v2053_v36 = vmul.f32 %v1995_v23, %v4094_v5  ;;  %v2055_v47 = vmul.f32 %v1990_v18, %v4147_v25 }
 0x150   :  { %2127 = vst [vmem:[#allocation10 + $0xc8] sm:$0xff] %v2120_v11  ;;  %v4439_v43 = vadd.f32 %v2034_v24, %v2033_v62  ;;  %v2073_v27 = vmul.f32 %v1993_v50, %v4047_v16  ;;  %v2074_v28 = vmul.f32 %v1995_v23, %v4105_v29  ;;  %v2076_v55 = vmul.f32 %v1990_v18, %v4157_v1 }
 0x151   :  { %v2111_v12 = vadd.f32 %v2110_v40, %v2109_v58  ;;  %v2125_v48 = vadd.f32 %v2124_v53, %v2123_v63  ;;  %v2054_v44 = vadd.f32 %v2053_v36, %v2052_v6  ;;  %v1128_v17 = vsub.s32 0, %v4312_v33 }
 0x152   :  { %v2075_v46 = vadd.f32 %v2074_v28, %v2073_v27  ;;  %v1281_v15 = vor.u32 8388608, %v4316_v3  ;;  %v2130_v25 = vmul.f32 %v4251_v13, %v4439_v43  ;;  %v2135_v16 = vmul.f32 %v2097_v41, %v4439_v43 }
 0x153   :  { %2115 = vst [vmem:[#allocation10 + $0xd8] sm:$0xff] %v2111_v12  ;;  %2129 = vst [vmem:[#allocation10 + $0xe0] sm:$0xff] %v2125_v48  ;;  %v4446_v5 = vadd.f32 %v2055_v47, %v2054_v44  ;;  %v2766_v29 = vmin.u32 %v1128_v17, %v4312_v33  ;;  %v5162_v50 = vmov 683565275   ;;  %v1291_v23 = vshrl.u32 %v5141_v22, %v4319_v51 }
 0x154   :  { %v4452_v1 = vadd.f32 %v2076_v55, %v2075_v46  ;;  %v1290_v18 = vshll.u32 %v5162_v50, %v4291_v4  ;;  %v1293_v3 = vshll.u32 %v5141_v22, %v4291_v4  ;;  %v1294_v41 = vshrl.u32 %v5147_v26, %v4319_v51 }
 0x155   :  { %v2131_v2 = vmul.f32 %v4248_v59, %v4446_v5  ;;  %v2136_v13 = vmul.f32 %v2099_v35, %v4446_v5  ;;  %v1130_v40 = vclz %v2766_v29  ;;  %v4468_v39 = vshll.u32 %v1281_v15, 8 }
 0x156   :  { %v2133_v7 = vmul.f32 %v4245_v42, %v4452_v1  ;;  %v2138_v57 = vmul.f32 %v2101_v54, %v4452_v1  ;;  %v1118_v22 = vadd.s32 %v4234_v10, %v4242_v37  ;;  %v1286_v59 = vshrl.u32 %v4284_v60, 5 }
 0x157   :  { %v2132_v34 = vadd.f32 %v2131_v2, %v2130_v25  ;;  %v2137_v53 = vadd.f32 %v2136_v13, %v2135_v16  ;;  %v2767_v38 = vadd.s32 4294967294, %v1130_v40  ;;  %v1289_v35 = vshrl.u32 %v5162_v50, %v4319_v51  ;;  %v5163_v40 = vld [vmem:[#allocation21_spill] sm:$0xff] }
 0x158   :  { %v1292_v56 = vor.u32 %v1291_v23, %v1290_v18  ;;  %v1295_v42 = vor.u32 %v1294_v41, %v1293_v3  ;;  %v1296_v54 = vshll.u32 %v5147_v26, %v4291_v4  ;;  %v1297_v62 = vshrl.u32 %v5148_v45, %v4319_v51  ;;  %v5164_v41 = vld [vmem:[#allocation20_spill] sm:$0xff] }
 0x159   :  { %v2134_v20 = vadd.f32 %v2133_v7, %v2132_v34  ;;  %v2139_v9 = vadd.f32 %v2138_v57, %v2137_v53  ;;  %vm2768_vm7 = vcmp.lt.s32.totalorder %v2767_v38, 0  ;;  %v1299_v10 = vshll.u32 %v5148_v45, %v4291_v4 }
 0x15a   :  { %v1133_v11 = vsel %vm2768_vm7, 0, %v2767_v38  ;;  %v1300_v6 = vshrl.u32 %v5149_v21, %v4319_v51  ;;  %v1298_v58 = vor.u32 %v1297_v62, %v1296_v54  ;;  %v1302_v63 = vshll.u32 %v5149_v21, %v4291_v4 }
 0x15b   :  { %2141 = vst [vmem:[#allocation10 + $0xd0] sm:$0xff] %v2134_v20  ;;  %2143 = vst [vmem:[#allocation10 + $0xe8] sm:$0xff] %v2139_v9  ;;  %v1134_v37 = vsub.s32 32, %v1133_v11  ;;  %v1135_v60 = vshll.u32 %v4312_v33, %v1133_v11  ;;  %v1138_v24 = vsub.s32 4294967266, %v1133_v11  ;;  %v1303_v26 = vshrl.u32 %v5150_v14, %v4319_v51 }
 0x15c   :  { %vm1305_vm8 = vcmp.lt.s32.totalorder %v1286_v59, 1  ;;  %v1301_v45 = vor.u32 %v1300_v6, %v1299_v10  ;;  %vm1306_vm9 = vcmp.lt.s32.totalorder %v1286_v59, 2  ;;  %vm1307_vm10 = vcmp.lt.s32.totalorder %v1286_v59, 3 }
 0x15d   :  { %v1136_v36 = vshrl.u32 %v1118_v22, %v1134_v37  ;;  %v1139_v47 = vadd.s32 127, %v1138_v24  ;;  %v1304_v27 = vor.u32 %v1303_v26, %v1302_v63  ;;  %vm1308_vm11 = vcmp.lt.s32.totalorder %v1286_v59, 4 }
 0x15e   :  { %v1309_v33 = vsel %vm1305_vm8, %v1289_v35, %v1292_v56  ;;  %v1310_v21 = vsel %vm1308_vm11, %v1298_v58, 2102212464  ;;  %v1313_v4 = vsel %vm1305_vm8, %v1292_v56, %v1295_v42  ;;  %v1314_v51 = vsel %vm1308_vm11, %v1301_v45, 920167782 }
 0x15f   :  { %v1137_v28 = vor.u32 %v1136_v36, %v1135_v60  ;;  %v1140_v55 = vshll.u32 %v1139_v47, 23  ;;  %v1311_v14 = vsel %vm1307_vm10, %v1295_v42, %v1310_v21  ;;  %v1317_v12 = vsel %vm1305_vm8, %v1295_v42, %v1298_v58 }
 0x160   :  { %v1318_v48 = vsel %vm1308_vm11, %v1304_v27, 1326507024  ;;  %v1315_v46 = vsel %vm1307_vm10, %v1298_v58, %v1314_v51  ;;  %v1312_v15 = vsel %vm1306_vm9, %v1309_v33, %v1311_v14  ;;  %vm1064_vm12 = vcmp.lt.s32.totalorder %v5163_v40, 0  ;;  %v2843_v58 = vld [vmem:[#allocation2 + $0x20] sm:$0xff] }
 0x161   :  { %v1141_v44 = vor.u32 4788187, %v1140_v55  ;;  %v1144_v17 = vcvt.s32.f32 %v1137_v28  ;;  %v1316_v25 = vsel %vm1306_vm9, %v1313_v4, %v1315_v46  ;;  %v1319_v16 = vsel %vm1307_vm10, %v1301_v45, %v1318_v48 }
 0x162   :  { %v1320_v50 = vsel %vm1306_vm9, %v1317_v12, %v1319_v16  ;;  %v4510_v18 = vmul.u32.u64.low %v4468_v39, %v1316_v25  ;;  %v4511_v23 = vmul.u32.u64.high %v4468_v39, %v1316_v25, %v4510_v18  ;;  %v1148_v7 = vsub.s32 4, %v5164_v41 }
 0x163   :  { %v1142_v29 = vand.u32 2147483647, %v1141_v44  ;;  %v4517_v3 = vmul.u32.u64.low %v4468_v39, %v1320_v50  ;;  %v4518_v2 = vmul.u32.u64.high %v4468_v39, %v1320_v50, %v4517_v3  ;;  %v1328_v57 = vmul.u32 %v4468_v39, %v1312_v15 }
 0x164   :  { %v5165_v34 = vand.u32 2147483647, %v5163_v40  ;;  %v1331_v22 = vadd.s32 1, %v4511_v23  ;;  %v1149_v35 = vsel %vm1064_vm12, %v1148_v7, %v5164_v41  ;;  %v2150_v10 = vstv %s4494_s15  ;;  %s4776_s15 = sld [smem:[#allocation6 + $0x28b]] }
 0x165   :  { %v1145_v13 = vmul.f32 %v1144_v17, %v1142_v29  ;;  %vm1330_vm14 = vc.u32 %v4518_v2, %v4510_v18  ;;  %v2152_v37 = vstv %s4488_s5  ;;  %v2154_v60 = vstv %s4491_s14  ;;  %s4761_s5 = sld [smem:[#allocation6 + $0x287]] }
 0x166   :  { %vm4529_vm13 = vcmp.le.f32.partialorder %v5165_v34, 0.7853982  ;;  %v1332_v39 = vsel %vm1330_vm14, %v1331_v22, %v4511_v23  ;;  %v2156_v24 = vstv %s4498_s16  ;;  %v2158_v6 = vstv %s4501_s9  ;;  %s4763_s14 = sld [smem:[#allocation6 + $0x288]] }
 0x167   :  { %v1146_v38 = vxor.u32 2147483648, %v1145_v13  ;;  %v1333_v20 = vadd.s32 %v1332_v39, %v1328_v57  ;;  %v1151_v42 = vsel %vm4529_vm13, 0, %v1149_v35  ;;  %v5168_v63 = vstv %s3767_s7  ;;  %s4598_s7 = sld [smem:[#allocation6 + $0x20e]] }
 0x168   :  { %v1155_v54 = vadd.s32 3, %v1151_v42  ;;  %v2145_v26 = vmul.f32 %v2843_v58, %v5168_v63  ;;  %vm1154_vm15 = vweird.f32 %v5163_v40  ;;  %v4581_v47 = vstv %s4520_s2  ;;  %s4780_s16 = sld [smem:[#allocation6 + $0x28c]] }
 0x169   :  { %v1147_v59 = vsel %vm1064_vm12, %v1146_v38, %v1145_v13  ;;  %v1334_v9 = vadd.s32 536870912, %v1333_v20  ;;  %v4584_v45 = vstv %s4514_s1  ;;  %v2175_v27 = vstv %s4524_s12  ;;  %s4785_s9 = sld [smem:[#allocation6 + $0x28d]]  ;;  %s2942_s1 = smov [#allocation10]  }
 0x16a   :  { %v1150_v56 = vsel %vm4529_vm13, %v5163_v40, %v1147_v59  ;;  %v2183_v33 = vstv %s4533_s13  ;;  %v1156_v28 = vand.u32 3, %v1155_v54  ;;  %v1259_v55 = vand.u32 3, %v1151_v42  ;;  %s2555_s2 = sshll.u32 %s2942_s1, 4  ;;  %s4792_s12 = sld [smem:[#allocation6 + $0x28f]]  ;;  %s2556_s2 = int_to_ptr.vmem [resolvable:$true] %s2555_s2 }
 0x16b   :  { %2834 = vcosq.f32 %v1150_v56  ;;  %v4559_v11 = vshrl.u32 %v1334_v9, 30  ;;  %v2191_v21 = vstv %s4536_s8  ;;  %v4593_v14 = vstv %s4506_s6  ;;  %s4790_s6 = sld [smem:[#allocation6 + $0x28e]]  ;;  %p2886_p6 = scmp.lt.s32.totalorder %s2556_s2, %s2556_s2 }
 0x16c   :  { %2836 = vsinq.f32 %v1150_v56  ;;  %v2177_v51 = vstv %s4540_s10  ;;  %v2180_v12 = vstv %s4551_s20  ;;  %v2185_v48 = vstv %s4547_s11  ;;  %s4794_s13 = sld [smem:[#allocation7]] }
 0x16d   :  { %v1336_v62 = vshll.u32 %v4559_v11, 30  ;;  %v2176_v44 = vmul.f32 %v2175_v27, %v2145_v26  ;;  %v2184_v17 = vmul.f32 %v2183_v33, %v2145_v26  ;;  %v2188_v46 = vstv %s4555_s21  ;;  %s4796_s8 = sld [smem:[#allocation7 + $0x80]] }
 0x16e   :  { %v2192_v25 = vmul.f32 %v2191_v21, %v2145_v26  ;;  %v2193_v16 = vstv %s4549_s17  ;;  %v2196_v29 = vstv %s4557_s22  ;;  %v2274_v50 = vstv %s4561_s23  ;;  %s4798_s10 = sld [smem:[#allocation7 + $0x100]]  ;;  %s2881_s17 = scalar_lea.vmem %s2556_s2, 4608 }
 0x16f   :  { %v4577_v36 = vsub.s32 %v1333_v20, %v1336_v62  ;;  %vm1161_vm0 = vcmp.eq.s32.totalorder %v1156_v28, 2  ;;  %vm1264_vm1 = vcmp.eq.s32.totalorder %v1259_v55, 2  ;;  %v2276_v3 = vstv %s4563_s24  ;;  %s4802_s11 = sld [smem:[#allocation6 + $0x290]]  ;;  %p2882_p5 = scmp.ne.s32.totalorder %s2556_s2, %s2881_s17 }
 0x170   :  { %vm1158_vm2 = vcmp.eq.s32.totalorder %v1156_v28, 0  ;;  %vm1261_vm3 = vcmp.eq.s32.totalorder %v1259_v55, 0  ;;  %v2278_v57 = vstv %s4569_s25  ;;  %vm1157_vm4 = vcmp.lt.s32.totalorder %v1156_v28, 2  ;;  %p2887_p7 = scmp.lt.s32.totalorder %s2881_s17, %s2881_s17 }
 0x171   :  { %v1339_v4 = vsub.s32 0, %v4577_v36  ;;  %vm1260_vm5 = vcmp.lt.s32.totalorder %v1259_v55, 2  ;;  %v2148_v59 = vstv %s4575_s29  ;;  %v2160_v39 = vstv %s4588_s27 }
 0x172   :  { %v1329_v20 = vadd.s32 %v4510_v18, %v4518_v2  ;;  %v2162_v54 = vstv %s4598_s7  ;;  %v2164_v27 = vstv %s4601_s28  ;;  %p2888_p8 = por %p2887_p7, %p2886_p6 }
 0x173   :  { %v2774_v15 = vmin.u32 %v1339_v4, %v4577_v36 }
 0x174   :  { %p2889_p9 = pnand %p2888_p8, %p2882_p5 }
 0x175   :  { %v1341_v13 = vclz %v2774_v15 }
 0x177   :  { %v2775_v53 = vadd.s32 4294967294, %v1341_v13 }
 0x178   :  { %v2835_v23 = vpop.eup %2834 }
 0x179   :  { %v2837_v41 = vpop.eup %2836  ;;  %v1162_v7 = vxor.u32 2147483648, %v2835_v23  ;;  %vm2776_vm6 = vcmp.lt.s32.totalorder %v2775_v53, 0 }
 0x17a   :  { %v1159_v34 = vxor.u32 2147483648, %v2837_v41  ;;  %v4614_v62 = vsel %vm2776_vm6, 0, %v2775_v53 }
 0x17b   :  { %v1163_v38 = vsel %vm1161_vm0, %v1162_v7, %v2837_v41  ;;  %v1266_v22 = vsel %vm1264_vm1, %v1162_v7, %v2837_v41  ;;  %v1345_v33 = vsub.s32 32, %v4614_v62  ;;  %v1346_v4 = vshll.u32 %v4577_v36, %v4614_v62 }
 0x17c   :  { %v1160_v35 = vsel %vm1158_vm2, %v2835_v23, %v1159_v34  ;;  %v1263_v56 = vsel %vm1261_vm3, %v2835_v23, %v1159_v34  ;;  %v1349_v40 = vsub.s32 4294967266, %v4614_v62 }
 0x17d   :  { %v1164_v9 = vsel %vm1157_vm4, %v1160_v35, %v1163_v38  ;;  %v1267_v42 = vsel %vm1260_vm5, %v1263_v56, %v1266_v22  ;;  %v4634_v15 = vshrl.u32 %v1329_v20, %v1345_v33 }
 0x17e   :  { %v1165_v58 = vsel %vm1154_vm15, nan, %v1164_v9  ;;  %v1268_v63 = vsel %vm1154_vm15, nan, %v1267_v42 }
 0x17f   :  { %v4622_v28 = vsub.f32 1.0, %v1268_v63  ;;  %v4626_v18 = vmul.f32 %v2150_v10, %v1165_v58  ;;  %v2153_v2 = vmul.f32 %v2152_v37, %v1165_v58  ;;  %v2147_v55 = vsub.f32 %v2145_v26, %v1165_v58 }
 0x180   :  { %v4630_v21 = vmul.f32 %v2148_v59, %v1165_v58 }
 0x181   :  { %v2155_v23 = vmul.f32 %v2154_v60, %v4622_v28  ;;  %v2157_v13 = vmul.f32 %v2156_v24, %v4622_v28  ;;  %v4646_v10 = vmul.f32 %v2158_v6, %v4622_v28  ;;  %v2178_v37 = vmul.f32 %v2177_v51, %v4622_v28 }
 0x182   :  { %v2181_v26 = vmul.f32 %v2180_v12, %v2147_v55  ;;  %v2186_v41 = vmul.f32 %v2185_v48, %v4622_v28  ;;  %v2189_v7 = vmul.f32 %v2188_v46, %v2147_v55  ;;  %v2194_v34 = vmul.f32 %v2193_v16, %v4622_v28 }
 0x183   :  { %v2166_v53 = vadd.f32 1.0, %v2155_v23  ;;  %v2170_v38 = vadd.f32 %v2157_v13, %v2153_v2  ;;  %v2172_v60 = vsub.f32 %v4646_v10, %v4626_v18  ;;  %v2179_v22 = vadd.f32 %v2178_v37, %v2176_v44 }
 0x184   :  { %v2187_v59 = vadd.f32 %v2186_v41, %v2184_v17  ;;  %v2195_v24 = vadd.f32 %v2194_v34, %v2192_v25  ;;  %v2197_v35 = vmul.f32 %v2196_v29, %v2147_v55  ;;  %v2161_v6 = vmul.f32 %v2160_v39, %v4622_v28 }
 0x185   :  { %v2199_v56 = vmul.f32 %v2166_v53, %v4351_v8  ;;  %v2200_v51 = vmul.f32 %v2170_v38, %v4396_v0  ;;  %v2202_v12 = vmul.f32 %v2172_v60, %v4439_v43  ;;  %v2220_v48 = vmul.f32 %v2166_v53, %v4356_v61 }
 0x186   :  { %v2221_v46 = vmul.f32 %v2170_v38, %v4405_v31  ;;  %v2223_v16 = vmul.f32 %v2172_v60, %v4446_v5  ;;  %v2241_v20 = vmul.f32 %v2166_v53, %v4358_v49  ;;  %v2242_v44 = vmul.f32 %v2170_v38, %v4416_v52 }
 0x187   :  { %v2201_v17 = vadd.f32 %v2200_v51, %v2199_v56  ;;  %v2244_v25 = vmul.f32 %v2172_v60, %v4452_v1  ;;  %v2182_v29 = vadd.f32 %v2181_v26, %v2179_v22  ;;  %v2190_v39 = vadd.f32 %v2189_v7, %v2187_v59 }
 0x188   :  { %v2222_v9 = vadd.f32 %v2221_v46, %v2220_v48  ;;  %v2243_v42 = vadd.f32 %v2242_v44, %v2241_v20  ;;  %v2198_v58 = vadd.f32 %v2197_v35, %v2195_v24  ;;  %v2163_v63 = vmul.f32 %v2162_v54, %v4622_v28 }
 0x189   :  { %v4664_v33 = vadd.f32 %v2202_v12, %v2201_v17  ;;  %v2214_v55 = vmul.f32 %v2182_v29, %v4351_v8  ;;  %v2215_v23 = vmul.f32 %v2190_v39, %v4396_v0  ;;  %v2235_v37 = vmul.f32 %v2182_v29, %v4356_v61 }
 0x18a   :  { %v4669_v41 = vadd.f32 %v2223_v16, %v2222_v9  ;;  %v4671_v34 = vadd.f32 %v2244_v25, %v2243_v42  ;;  %v2217_v26 = vmul.f32 %v2198_v58, %v4439_v43  ;;  %v2236_v7 = vmul.f32 %v2190_v39, %v4405_v31 }
 0x18b   :  { %v2280_v53 = vmul.f32 %v4593_v14, %v4664_v33  ;;  %v2216_v54 = vadd.f32 %v2215_v23, %v2214_v55  ;;  %v2238_v38 = vmul.f32 %v2198_v58, %v4446_v5  ;;  %v2256_v60 = vmul.f32 %v2182_v29, %v4358_v49 }
 0x18c   :  { %v2281_v22 = vmul.f32 %v4584_v45, %v4669_v41  ;;  %v2283_v59 = vmul.f32 %v4581_v47, %v4671_v34  ;;  %v2237_v24 = vadd.f32 %v2236_v7, %v2235_v37  ;;  %v2257_v35 = vmul.f32 %v2190_v39, %v4416_v52 }
 0x18d   :  { %v2218_v56 = vadd.f32 %v2217_v26, %v2216_v54  ;;  %v2259_v51 = vmul.f32 %v2198_v58, %v4452_v1  ;;  %v2167_v12 = vadd.f32 1.0, %v2161_v6  ;;  %v2169_v48 = vsub.f32 %v2157_v13, %v2153_v2 }
 0x18e   :  { %v2282_v46 = vadd.f32 %v2281_v22, %v2280_v53  ;;  %v2239_v16 = vadd.f32 %v2238_v38, %v2237_v24  ;;  %v2258_v20 = vadd.f32 %v2257_v35, %v2256_v60  ;;  %v2174_v44 = vadd.f32 %v2163_v63, %v4630_v21 }
 0x18f   :  { %v4687_v17 = vadd.f32 %v2218_v56, %v4374_v30  ;;  %v2204_v25 = vmul.f32 %v2169_v48, %v4351_v8  ;;  %v2205_v29 = vmul.f32 %v2167_v12, %v4396_v0  ;;  %v2225_v9 = vmul.f32 %v2169_v48, %v4356_v61 }
 0x190   :  { %v2284_v39 = vadd.f32 %v2283_v59, %v2282_v46  ;;  %v4693_v42 = vadd.f32 %v2239_v16, %v4380_v32  ;;  %v2260_v6 = vadd.f32 %v2259_v51, %v2258_v20  ;;  %v2207_v2 = vmul.f32 %v2174_v44, %v4439_v43 }
 0x191   :  { %v2269_v13 = vmul.f32 %v4581_v47, %v4687_v17  ;;  %v2271_v30 = vmul.f32 %v4584_v45, %v4687_v17  ;;  %v2206_v58 = vadd.f32 %v2205_v29, %v2204_v25  ;;  %v2226_v55 = vmul.f32 %v2167_v12, %v4405_v31 }
 0x192   :  { %2291 = vst [vmem:[#allocation10 + $0xf0] sm:$0xff] %v2284_v39  ;;  %v4702_v23 = vadd.f32 %v2260_v6, %v4389_v19  ;;  %v2263_v32 = vmul.f32 %v4581_v47, %v4693_v42  ;;  %v2272_v37 = vmul.f32 %v4593_v14, %v4693_v42  ;;  %v2228_v26 = vmul.f32 %v2174_v44, %v4446_v5 }
 0x193   :  { %v4709_v7 = vadd.f32 %v2207_v2, %v2206_v58  ;;  %v2227_v53 = vadd.f32 %v2226_v55, %v2225_v9  ;;  %v2246_v54 = vmul.f32 %v2169_v48, %v4358_v49  ;;  %v2247_v38 = vmul.f32 %v2167_v12, %v4416_v52 }
 0x194   :  { %5169 = vst [vmem:[#allocation17_spill] sm:$0xff] %v4702_v23  ;;  %v2265_v19 = vmul.f32 %v4584_v45, %v4702_v23  ;;  %v2268_v60 = vmul.f32 %v4593_v14, %v4702_v23  ;;  %v2273_v22 = vsub.f32 %v2271_v30, %v2272_v37  ;;  %v2249_v59 = vmul.f32 %v2174_v44, %v4452_v1 }
 0x195   :  { %v4718_v24 = vadd.f32 %v2228_v26, %v2227_v53  ;;  %v2248_v35 = vadd.f32 %v2247_v38, %v2246_v54  ;;  %v2294_v56 = vmul.f32 %v4593_v14, %v4709_v7  ;;  %v2165_v51 = vmul.f32 %v2164_v27, %v4622_v28 }
 0x196   :  { %v2266_v12 = vsub.f32 %v2263_v32, %v2265_v19  ;;  %v2270_v48 = vsub.f32 %v2268_v60, %v2269_v13  ;;  %v2279_v46 = vsub.f32 %v2278_v57, %v2273_v22  ;;  %v2171_v16 = vadd.f32 %v4646_v10, %v4626_v18 }
 0x197   :  { %v4729_v20 = vadd.f32 %v2249_v59, %v2248_v35  ;;  %v2295_v44 = vmul.f32 %v4584_v45, %v4718_v24  ;;  %v2168_v25 = vadd.f32 1.0, %v2165_v51  ;;  %v2173_v29 = vsub.f32 %v2163_v63, %v4630_v21 }
 0x198   :  { %v2275_v9 = vsub.f32 %v2274_v50, %v2266_v12  ;;  %v2277_v39 = vsub.f32 %v2276_v3, %v2270_v48  ;;  %v2288_v27 = vmul.f32 %v2279_v46, %v4671_v34  ;;  %v2209_v28 = vmul.f32 %v2171_v16, %v4351_v8  ;;  %v5172_v12 = vld [vmem:[#allocation19_spill] sm:$0xff] }
 0x199   :  { %5170 = vst [vmem:[#allocation18_spill] sm:$0xff] %v4729_v20  ;;  %v2296_v57 = vadd.f32 %v2295_v44, %v2294_v56  ;;  %v2297_v18 = vmul.f32 %v4581_v47, %v4729_v20  ;;  %v2302_v10 = vmul.f32 %v2279_v46, %v4729_v20  ;;  %v2210_v6 = vmul.f32 %v2173_v29, %v4396_v0 }
 0x19a   :  { %v2285_v2 = vmul.f32 %v2275_v9, %v4664_v33  ;;  %v2286_v21 = vmul.f32 %v2277_v39, %v4669_v41  ;;  %v2299_v50 = vmul.f32 %v2275_v9, %v4709_v7  ;;  %v2300_v3 = vmul.f32 %v2277_v39, %v4718_v24 }
 0x19b   :  { %v2298_v63 = vadd.f32 %v2297_v18, %v2296_v57  ;;  %v2211_v13 = vadd.f32 %v2210_v6, %v2209_v28  ;;  %v2212_v8 = vmul.f32 %v2168_v25, %v4439_v43  ;;  %v2230_v30 = vmul.f32 %v2171_v16, %v4356_v61 }
 0x19c   :  { %v2287_v58 = vadd.f32 %v2286_v21, %v2285_v2  ;;  %v2301_v55 = vadd.f32 %v2300_v3, %v2299_v50  ;;  %v2231_v32 = vmul.f32 %v2173_v29, %v4405_v31  ;;  %v2233_v0 = vmul.f32 %v2168_v25, %v4446_v5 }
 0x19d   :  { %2305 = vst [vmem:[#allocation10 + $0xf8] sm:$0xff] %v2298_v63  ;;  %v2251_v37 = vmul.f32 %v2171_v16, %v4358_v49  ;;  %v2252_v26 = vmul.f32 %v2173_v29, %v4416_v52  ;;  %v2254_v53 = vmul.f32 %v2168_v25, %v4452_v1  ;;  %v4759_v61 = vadd.f32 %v2212_v8, %v2211_v13 }
 0x19e   :  { %v2289_v43 = vadd.f32 %v2288_v27, %v2287_v58  ;;  %v2303_v54 = vadd.f32 %v2302_v10, %v2301_v55  ;;  %v2232_v38 = vadd.f32 %v2231_v32, %v2230_v30  ;;  %v1348_v49 = vor.u32 %v4634_v15, %v1346_v4 }
 0x19f   :  { %v2253_v31 = vadd.f32 %v2252_v26, %v2251_v37  ;;  %v1350_v52 = vadd.s32 127, %v1349_v40  ;;  %v2308_v1 = vmul.f32 %v4593_v14, %v4759_v61  ;;  %v2313_v19 = vmul.f32 %v2275_v9, %v4759_v61 }
 0x1a0   :  { %2293 = vst [vmem:[#allocation10 + $0x108] sm:$0xff] %v2289_v43  ;;  %2307 = vst [vmem:[#allocation10 + $0x110] sm:$0xff] %v2303_v54  ;;  %v4771_v5 = vadd.f32 %v2233_v0, %v2232_v38  ;;  %v1355_v22 = vcvt.s32.f32 %v1348_v49  ;;  %vm1275_vm7 = vcmp.lt.s32.totalorder %v5172_v12, 0  ;;  %v1359_v48 = vsub.s32 4, %v4559_v11 }
 0x1a1   :  { %v4778_v60 = vadd.f32 %v2254_v53, %v2253_v31  ;;  %v1351_v36 = vshll.u32 %v1350_v52, 23 }
 0x1a2   :  { %v2309_v62 = vmul.f32 %v4584_v45, %v4771_v5  ;;  %v2314_v4 = vmul.f32 %v2277_v39, %v4771_v5 }
 0x1a3   :  { %5171 = vst [vmem:[#allocation21_spill] sm:$0xff] %v4778_v60  ;;  %v2311_v15 = vmul.f32 %v4581_v47, %v4778_v60  ;;  %v2316_v14 = vmul.f32 %v2279_v46, %v4778_v60  ;;  %v1352_v40 = vor.u32 4788187, %v1351_v36  ;;  %v5173_v46 = vand.u32 2147483647, %v5172_v12 }
 0x1a4   :  { %v2310_v59 = vadd.f32 %v2309_v62, %v2308_v1  ;;  %v2315_v35 = vadd.f32 %v2314_v4, %v2313_v19 }
 0x1a5   :  { %v1353_v45 = vand.u32 2147483647, %v1352_v40  ;;  %vm4806_vm8 = vcmp.le.f32.partialorder %v5173_v46, 0.7853982 }
 0x1a6   :  { %v2312_v56 = vadd.f32 %v2311_v15, %v2310_v59  ;;  %v2317_v51 = vadd.f32 %v2316_v14, %v2315_v35 }
 0x1a7   :  { %v1356_v47 = vmul.f32 %v1355_v22, %v1353_v45 }
 0x1a8   :  { %2319 = vst [vmem:[#allocation10 + $0x100] sm:$0xff] %v2312_v56  ;;  %2321 = vst [vmem:[#allocation10 + $0x118] sm:$0xff] %v2317_v51 }
 0x1a9   :  { %v1357_v44 = vxor.u32 2147483648, %v1356_v47 }
 0x1aa   :  { %2892 = shalt.err (!%p2889_p9)
}
 0x1ab   :  { %2561 = dma.vmem_to_hbm [thread:$0]  %s2556_s2, 4608, %s5060_s4, [#allocation11], %s2932_s18, %s2932_s18, %s2933_s19   ;;  %v1358_v25 = vsel %vm1275_vm7, %v1357_v44, %v1356_v47  ;;  %v1360_v29 = vsel %vm1275_vm7, %v1359_v48, %v4559_v11  ;;  %vm1365_vm9 = vweird.f32 %v5172_v12  ;;  %v2844_v53 = vld [vmem:[#allocation2 + $0x28] sm:$0xff] }
 0x1ac   :  { %s4816_s22 = sld [smem:[#allocation6 + $0x291]]  ;;  %v1361_v9 = vsel %vm4806_vm8, %v5172_v12, %v1358_v25  ;;  %v1362_v39 = vsel %vm4806_vm8, 0, %v1360_v29  ;;  %v2326_v27 = vstv %s4761_s5  ;;  %v2328_v28 = vstv %s4763_s14 }
 0x1ad   :  { %s4820_s23 = sld [smem:[#allocation6 + $0x292]]  ;;  %2838 = vcosq.f32 %v1361_v9  ;;  %v1366_v11 = vadd.s32 3, %v1362_v39  ;;  %v2330_v57 = vstv %s4752_s0  ;;  %v2332_v18 = vstv %s4757_s30 }
 0x1ae   :  { %s4828_s24 = sld [smem:[#allocation7 + $0x1]]  ;;  %2840 = vsinq.f32 %v1361_v9  ;;  %v2334_v10 = vstv %s4776_s15  ;;  %v1470_v2 = vand.u32 3, %v1362_v39  ;;  %v2336_v21 = vstv %s4780_s16 }
 0x1af   :  { %s4830_s4 = sld [smem:[#allocation7 + $0x81]]  ;;  %v1367_v6 = vand.u32 3, %v1366_v11  ;;  %v2338_v50 = vstv %s4785_s9  ;;  %v2340_v3 = vstv %s4790_s6  ;;  %v2342_v63 = vstv %s4792_s12 }
 0x1b0   :  { %s2730_s25 = sld [smem:[#allocation7 + $0x101]]  ;;  %v4855_v13 = vstv %s4794_s13  ;;  %v4858_v8 = vstv %s4796_s8  ;;  %v4863_v30 = vstv %s4798_s10  ;;  %v5176_v43 = vstv %s3841_s26  ;;  %s2943_s26 = smov [#allocation9]  }
 0x1b1   :  { %s2723_s29 = sld [smem:[#allocation7 + $0x2]]  ;;  %v2323_v54 = vmul.f32 %v2844_v53, %v5176_v43  ;;  %vm1372_vm10 = vcmp.eq.s32.totalorder %v1367_v6, 2  ;;  %vm1475_vm11 = vcmp.eq.s32.totalorder %v1470_v2, 2  ;;  %v2353_v31 = vstv %s4802_s11  ;;  %s2543_s30 = sshll.u32 %s2943_s26, 4  ;;  %s2544_s30 = int_to_ptr.vmem [resolvable:$true] %s2543_s30 }
 0x1b2   :  { %s2727_s27 = sld [smem:[#allocation7 + $0x82]]  ;;  %vm1369_vm12 = vcmp.eq.s32.totalorder %v1367_v6, 0  ;;  %vm1472_vm13 = vcmp.eq.s32.totalorder %v1470_v2, 0  ;;  %v2361_v19 = vstv %s4816_s22  ;;  %vm1368_vm14 = vcmp.lt.s32.totalorder %v1367_v6, 2  ;;  %s2901_s5 = scalar_lea.vmem %s2544_s30, 1536 }
 0x1b3   :  { %s2731_s7 = sld [smem:[#allocation7 + $0x102]]  ;;  %vm1471_vm15 = vcmp.lt.s32.totalorder %v1470_v2, 2  ;;  %v2354_v14 = vmul.f32 %v2353_v31, %v2323_v54  ;;  %v2369_v40 = vstv %s4820_s23  ;;  %v2362_v35 = vmul.f32 %v2361_v19, %v2323_v54  ;;  %p2902_p10 = scmp.ne.s32.totalorder %s2544_s30, %s2901_s5 }
 0x1b4   :  { %s4834_s28 = sld [smem:[#allocation6 + $0x293]]  ;;  %v4866_v58 = vstv %s4828_s24  ;;  %v2370_v44 = vmul.f32 %v2369_v40, %v2323_v54  ;;  %p2906_p11 = scmp.lt.s32.totalorder %s2544_s30, %s2544_s30 }
 0x1b5   :  { %s4836_s1 = sld [smem:[#allocation6 + $0x294]]  ;;  %v4869_v55 = vstv %s4830_s4  ;;  %p2907_p12 = scmp.lt.s32.totalorder %s2901_s5, %s2901_s5 }
 0x1b6   :  { %s4839_s2 = sld [smem:[#allocation6 + $0x296]]  ;;  %v4871_v32 = vstv %s2730_s25 }
 0x1b7   :  { %s4846_s17 = sld [smem:[#allocation6 + $0x295]]  ;;  %v4875_v0 = vstv %s2723_s29  ;;  %p2908_p13 = por %p2907_p12, %p2906_p11 }
 0x1b8   :  { %s4850_s20 = sld [smem:[#allocation6 + $0x297]]  ;;  %v4877_v37 = vstv %s2727_s27 }
 0x1b9   :  { %s4860_s14 = sld [smem:[#allocation6 + $0x298]]  ;;  %v4879_v26 = vstv %s2731_s7  ;;  %p2909_p0 = pnand %p2908_p13, %p2902_p10 }
 0x1ba   :  { %s4873_s0 = sld [smem:[#allocation7 + $0x3]]  ;;  %v2839_v38 = vpop.eup %2838  ;;  %v2355_v49 = vstv %s4834_s28 }
 0x1bb   :  { %s4881_s16 = sld [smem:[#allocation7 + $0x83]]  ;;  %v2841_v52 = vpop.eup %2840  ;;  %v1373_v1 = vxor.u32 2147483648, %v2839_v38  ;;  %v2363_v45 = vstv %s4836_s1 }
 0x1bc   :  { %s4885_s9 = sld [smem:[#allocation7 + $0x103]]  ;;  %v1370_v36 = vxor.u32 2147483648, %v2841_v52  ;;  %v2358_v62 = vstv %s4839_s2 }
 0x1bd   :  { %v1374_v4 = vsel %vm1372_vm10, %v1373_v1, %v2841_v52  ;;  %v1477_v15 = vsel %vm1475_vm11, %v1373_v1, %v2841_v52  ;;  %v2371_v48 = vstv %s4846_s17 }
 0x1be   :  { %v1371_v22 = vsel %vm1369_vm12, %v2839_v38, %v1370_v36  ;;  %v1474_v59 = vsel %vm1472_vm13, %v2839_v38, %v1370_v36  ;;  %v2366_v47 = vstv %s4850_s20 }
 0x1bf   :  { %v1375_v56 = vsel %vm1368_vm14, %v1371_v22, %v1374_v4  ;;  %v1478_v51 = vsel %vm1471_vm15, %v1474_v59, %v1477_v15  ;;  %v2374_v25 = vstv %s4860_s14 }
 0x1c0   :  { %v1376_v46 = vsel %vm1365_vm9, nan, %v1375_v56  ;;  %v1479_v16 = vsel %vm1365_vm9, nan, %v1478_v51  ;;  %v4901_v39 = vstv %s4873_s0 }
 0x1c1   :  { %v2324_v29 = vsub.f32 1.0, %v1479_v16  ;;  %v2331_v9 = vmul.f32 %v2330_v57, %v1376_v46  ;;  %v4904_v11 = vstv %s4881_s16  ;;  %v2327_v6 = vmul.f32 %v2326_v27, %v1376_v46 }
 0x1c2   :  { %v2329_v2 = vmul.f32 %v2328_v28, %v1376_v46  ;;  %v2325_v53 = vsub.f32 %v2323_v54, %v1376_v46  ;;  %v4909_v43 = vstv %s4885_s9 }
 0x1c3   :  { %v2333_v38 = vmul.f32 %v2332_v18, %v2324_v29  ;;  %v2335_v31 = vmul.f32 %v2334_v10, %v2324_v29  ;;  %v2337_v12 = vmul.f32 %v2336_v21, %v2324_v29  ;;  %v2339_v52 = vmul.f32 %v2338_v50, %v2324_v29 }
 0x1c4   :  { %v2341_v1 = vmul.f32 %v2340_v3, %v2324_v29  ;;  %v2343_v19 = vmul.f32 %v2342_v63, %v2324_v29  ;;  %v2356_v36 = vmul.f32 %v2355_v49, %v2324_v29  ;;  %v2359_v57 = vmul.f32 %v2358_v62, %v2325_v53 }
 0x1c5   :  { %v4915_v4 = vadd.f32 1.0, %v2333_v38  ;;  %v4917_v15 = vadd.f32 1.0, %v2339_v52  ;;  %v4919_v40 = vsub.f32 %v2335_v31, %v2331_v9  ;;  %v4921_v27 = vadd.f32 %v2335_v31, %v2331_v9 }
 0x1c6   :  { %v4923_v28 = vadd.f32 1.0, %v2343_v19  ;;  %v4925_v54 = vadd.f32 %v2337_v12, %v2329_v2  ;;  %v4927_v18 = vsub.f32 %v2337_v12, %v2329_v2  ;;  %v4929_v10 = vsub.f32 %v2341_v1, %v2327_v6 }
 0x1c7   :  { %v4931_v21 = vadd.f32 %v2341_v1, %v2327_v6  ;;  %v2377_v50 = vmul.f32 %v4915_v4, %v4664_v33  ;;  %v2378_v3 = vmul.f32 %v4921_v27, %v4709_v7  ;;  %v2382_v63 = vmul.f32 %v4919_v40, %v4664_v33 }
 0x1c8   :  { %v2380_v49 = vmul.f32 %v4927_v18, %v4759_v61  ;;  %v2383_v62 = vmul.f32 %v4917_v15, %v4709_v7  ;;  %v2387_v22 = vmul.f32 %v4925_v54, %v4664_v33  ;;  %v2388_v59 = vmul.f32 %v4929_v10, %v4709_v7 }
 0x1c9   :  { %v2379_v56 = vadd.f32 %v2378_v3, %v2377_v50  ;;  %v2385_v51 = vmul.f32 %v4931_v21, %v4759_v61  ;;  %v2390_v46 = vmul.f32 %v4923_v28, %v4759_v61  ;;  %v2357_v16 = vadd.f32 %v2356_v36, %v2354_v14 }
 0x1ca   :  { %v2384_v9 = vadd.f32 %v2383_v62, %v2382_v63  ;;  %v2389_v6 = vadd.f32 %v2388_v59, %v2387_v22  ;;  %v2364_v2 = vmul.f32 %v2363_v45, %v2324_v29  ;;  %v2367_v38 = vmul.f32 %v2366_v47, %v2325_v53 }
 0x1cb   :  { %v2381_v31 = vadd.f32 %v2380_v49, %v2379_v56  ;;  %v4951_v12 = vadd.f32 %v2359_v57, %v2357_v16  ;;  %v2372_v52 = vmul.f32 %v2371_v48, %v2324_v29  ;;  %v2375_v1 = vmul.f32 %v2374_v25, %v2325_v53 }
 0x1cc   :  { %v2386_v19 = vadd.f32 %v2385_v51, %v2384_v9  ;;  %v2391_v23 = vadd.f32 %v2390_v46, %v2389_v6  ;;  %v2365_v60 = vadd.f32 %v2364_v2, %v2362_v35  ;;  %v2398_v50 = vmul.f32 %v4915_v4, %v4669_v41 }
 0x1cd   :  { %v2441_v3 = vmul.f32 %v4855_v13, %v2381_v31  ;;  %v2450_v20 = vmul.f32 %v4866_v58, %v2381_v31  ;;  %v2460_v14 = vmul.f32 %v4875_v0, %v2381_v31  ;;  %v2373_v36 = vadd.f32 %v2372_v52, %v2370_v44 }
 0x1ce   :  { %v2443_v45 = vmul.f32 %v4858_v8, %v2386_v19  ;;  %v2446_v47 = vmul.f32 %v4863_v30, %v2391_v23  ;;  %v2452_v48 = vmul.f32 %v4869_v55, %v2386_v19  ;;  %v2455_v25 = vmul.f32 %v4871_v32, %v2391_v23 }
 0x1cf   :  { %v2462_v35 = vmul.f32 %v4877_v37, %v2386_v19  ;;  %v2465_v29 = vmul.f32 %v4879_v26, %v2391_v23  ;;  %v4964_v53 = vadd.f32 %v2367_v38, %v2365_v60  ;;  %v4966_v57 = vadd.f32 %v2375_v1, %v2373_v36 }
 0x1d0   :  { %v2444_v63 = vadd.f32 %v2443_v45, %v2441_v3  ;;  %v2453_v49 = vadd.f32 %v2452_v48, %v2450_v20  ;;  %v2392_v44 = vmul.f32 %v4951_v12, %v4664_v33  ;;  %v2470_v62 = vmul.f32 %v4901_v39, %v2381_v31 }
 0x1d1   :  { %v2463_v22 = vadd.f32 %v2462_v35, %v2460_v14  ;;  %v2393_v59 = vmul.f32 %v4964_v53, %v4709_v7  ;;  %v2395_v56 = vmul.f32 %v4966_v57, %v4759_v61  ;;  %v2472_v51 = vmul.f32 %v4904_v11, %v2386_v19 }
 0x1d2   :  { %v2447_v60 = vadd.f32 %v2446_v47, %v2444_v63  ;;  %v2456_v46 = vadd.f32 %v2455_v25, %v2453_v49  ;;  %v2475_v16 = vmul.f32 %v4909_v43, %v2391_v23  ;;  %v2399_v20 = vmul.f32 %v4921_v27, %v4718_v24 }
 0x1d3   :  { %v2466_v9 = vadd.f32 %v2465_v29, %v2463_v22  ;;  %v2394_v33 = vadd.f32 %v2393_v59, %v2392_v44  ;;  %v2473_v6 = vadd.f32 %v2472_v51, %v2470_v62  ;;  %v2401_v2 = vmul.f32 %v4927_v18, %v4771_v5 }
 0x1d4   :  { %2448 = vst [vmem:[#allocation9] sm:$0xff] %v2447_v60  ;;  %2458 = vst [vmem:[#allocation9 + $0x8] sm:$0xff] %v2456_v46  ;;  %v2400_v7 = vadd.f32 %v2399_v20, %v2398_v50  ;;  %v2403_v61 = vmul.f32 %v4919_v40, %v4669_v41  ;;  %v2404_v38 = vmul.f32 %v4917_v15, %v4718_v24 }
 0x1d5   :  { %v2406_v23 = vmul.f32 %v4931_v21, %v4771_v5  ;;  %2468 = vst [vmem:[#allocation9 + $0x10] sm:$0xff] %v2466_v9  ;;  %v2396_v31 = vadd.f32 %v2395_v56, %v2394_v33  ;;  %v2476_v52 = vadd.f32 %v2475_v16, %v2473_v6  ;;  %v2408_v1 = vmul.f32 %v4925_v54, %v4669_v41 }
 0x1d6   :  { %v2409_v19 = vmul.f32 %v4929_v10, %v4718_v24  ;;  %v2402_v3 = vadd.f32 %v2401_v2, %v2400_v7  ;;  %v2405_v50 = vadd.f32 %v2404_v38, %v2403_v61  ;;  %v2411_v14 = vmul.f32 %v4923_v28, %v4771_v5  ;;  %v5177_v61 = vld [vmem:[#allocation18_spill] sm:$0xff] }
 0x1d7   :  { %v2413_v36 = vmul.f32 %v4951_v12, %v4669_v41  ;;  %v2397_v45 = vadd.f32 %v2396_v31, %v4687_v17  ;;  %v2414_v48 = vmul.f32 %v4964_v53, %v4718_v24  ;;  %v2416_v25 = vmul.f32 %v4966_v57, %v4771_v5 }
 0x1d8   :  { %v2410_v47 = vadd.f32 %v2409_v19, %v2408_v1  ;;  %v2407_v35 = vadd.f32 %v2406_v23, %v2405_v50  ;;  %v2480_v29 = vmul.f32 %v4855_v13, %v2402_v3  ;;  %v2487_v63 = vmul.f32 %v4866_v58, %v2402_v3  ;;  %v5178_v1 = vld [vmem:[#allocation21_spill] sm:$0xff] }
 0x1d9   :  { %v2494_v49 = vmul.f32 %v4875_v0, %v2402_v3  ;;  %v2477_v44 = vadd.f32 %v2476_v52, %v2397_v45  ;;  %v2415_v22 = vadd.f32 %v2414_v48, %v2413_v36  ;;  %v2501_v41 = vmul.f32 %v4901_v39, %v2402_v3 }
 0x1da   :  { %v2412_v62 = vadd.f32 %v2411_v14, %v2410_v47  ;;  %v2481_v17 = vmul.f32 %v4858_v8, %v2407_v35  ;;  %v2488_v59 = vmul.f32 %v4869_v55, %v2407_v35  ;;  %v2495_v24 = vmul.f32 %v4877_v37, %v2407_v35 }
 0x1db   :  { %v2502_v5 = vmul.f32 %v4904_v11, %v2407_v35  ;;  %2479 = vst [vmem:[#allocation9 + $0x18] sm:$0xff] %v2477_v44  ;;  %v2417_v46 = vadd.f32 %v2416_v25, %v2415_v22  ;;  %v2419_v7 = vmul.f32 %v4915_v4, %v4671_v34  ;;  %v2420_v38 = vmul.f32 %v4921_v27, %v5177_v61 }
 0x1dc   :  { %v2483_v56 = vmul.f32 %v4863_v30, %v2412_v62  ;;  %v2490_v51 = vmul.f32 %v4871_v32, %v2412_v62  ;;  %v2497_v60 = vmul.f32 %v4879_v26, %v2412_v62  ;;  %v2482_v16 = vadd.f32 %v2481_v17, %v2480_v29 }
 0x1dd   :  { %v2489_v20 = vadd.f32 %v2488_v59, %v2487_v63  ;;  %v2496_v9 = vadd.f32 %v2495_v24, %v2494_v49  ;;  %v2503_v33 = vadd.f32 %v2502_v5, %v2501_v41  ;;  %v2418_v6 = vadd.f32 %v2417_v46, %v4693_v42 }
 0x1de   :  { %v2504_v2 = vmul.f32 %v4909_v43, %v2412_v62  ;;  %v2484_v23 = vadd.f32 %v2483_v56, %v2482_v16  ;;  %v2422_v19 = vmul.f32 %v4927_v18, %v5178_v1  ;;  %v2421_v50 = vadd.f32 %v2420_v38, %v2419_v7 }
 0x1df   :  { %v2491_v31 = vadd.f32 %v2490_v51, %v2489_v20  ;;  %v2498_v52 = vadd.f32 %v2497_v60, %v2496_v9  ;;  %v2424_v14 = vmul.f32 %v4919_v40, %v4671_v34  ;;  %v2425_v42 = vmul.f32 %v4917_v15, %v5177_v61 }
 0x1e0   :  { %v2505_v3 = vadd.f32 %v2504_v2, %v2503_v33  ;;  %2486 = vst [vmem:[#allocation9 + $0x20] sm:$0xff] %v2484_v23  ;;  %v2427_v4 = vmul.f32 %v4931_v21, %v5178_v1  ;;  %v2429_v27 = vmul.f32 %v4925_v54, %v4671_v34  ;;  %v2430_v18 = vmul.f32 %v4929_v10, %v5177_v61 }
 0x1e1   :  { %2493 = vst [vmem:[#allocation9 + $0x28] sm:$0xff] %v2491_v31  ;;  %2500 = vst [vmem:[#allocation9 + $0x30] sm:$0xff] %v2498_v52  ;;  %v2432_v36 = vmul.f32 %v4923_v28, %v5178_v1  ;;  %v2423_v40 = vadd.f32 %v2422_v19, %v2421_v50  ;;  %v2426_v47 = vadd.f32 %v2425_v42, %v2424_v14 }
 0x1e2   :  { %v2506_v45 = vadd.f32 %v2505_v3, %v2418_v6  ;;  %v2434_v15 = vmul.f32 %v4951_v12, %v4671_v34  ;;  %v2431_v48 = vadd.f32 %v2430_v18, %v2429_v27  ;;  %v2435_v25 = vmul.f32 %v4964_v53, %v5177_v61 }
 0x1e3   :  { %v2437_v21 = vmul.f32 %v4966_v57, %v5178_v1  ;;  %v2428_v54 = vadd.f32 %v2427_v4, %v2426_v47  ;;  %v2509_v10 = vmul.f32 %v4855_v13, %v2423_v40  ;;  %v2516_v35 = vmul.f32 %v4866_v58, %v2423_v40 }
 0x1e4   :  { %2508 = vst [vmem:[#allocation9 + $0x38] sm:$0xff] %v2506_v45  ;;  %v2523_v28 = vmul.f32 %v4875_v0, %v2423_v40  ;;  %v2433_v29 = vadd.f32 %v2432_v36, %v2431_v48  ;;  %v2436_v63 = vadd.f32 %v2435_v25, %v2434_v15  ;;  %v2530_v49 = vmul.f32 %v4901_v39, %v2423_v40  ;;  %v5179_v39 = vld [vmem:[#allocation17_spill] sm:$0xff] }
 0x1e5   :  { %v2510_v34 = vmul.f32 %v4858_v8, %v2428_v54  ;;  %v2517_v12 = vmul.f32 %v4869_v55, %v2428_v54  ;;  %v2524_v53 = vmul.f32 %v4877_v37, %v2428_v54  ;;  %v2531_v57 = vmul.f32 %v4904_v11, %v2428_v54 }
 0x1e6   :  { %v2512_v44 = vmul.f32 %v4863_v30, %v2433_v29  ;;  %v2519_v13 = vmul.f32 %v4871_v32, %v2433_v29  ;;  %v2526_v58 = vmul.f32 %v4879_v26, %v2433_v29  ;;  %v2438_v62 = vadd.f32 %v2437_v21, %v2436_v63 }
 0x1e7   :  { %v2511_v0 = vadd.f32 %v2510_v34, %v2509_v10  ;;  %v2518_v22 = vadd.f32 %v2517_v12, %v2516_v35  ;;  %v2525_v41 = vadd.f32 %v2524_v53, %v2523_v28  ;;  %v2532_v17 = vadd.f32 %v2531_v57, %v2530_v49 }
 0x1e8   :  { %v2439_v59 = vadd.f32 %v2438_v62, %v5179_v39  ;;  %v2533_v8 = vmul.f32 %v4909_v43, %v2433_v29 }
 0x1e9   :  { %v2513_v55 = vadd.f32 %v2512_v44, %v2511_v0  ;;  %v2520_v24 = vadd.f32 %v2519_v13, %v2518_v22  ;;  %v2527_v37 = vadd.f32 %v2526_v58, %v2525_v41 }
 0x1ea   :  { %v2534_v11 = vadd.f32 %v2533_v8, %v2532_v17 }
 0x1eb   :  { %2515 = vst [vmem:[#allocation9 + $0x40] sm:$0xff] %v2513_v55  ;;  %2522 = vst [vmem:[#allocation9 + $0x48] sm:$0xff] %v2520_v24 }
 0x1ec   :  { %2529 = vst [vmem:[#allocation9 + $0x50] sm:$0xff] %v2527_v37  ;;  %v2535_v30 = vadd.f32 %v2534_v11, %v2439_v59 }
 0x1ee   :  { %2537 = vst [vmem:[#allocation9 + $0x58] sm:$0xff] %v2535_v30 }
 0x1ef   :  { %2912 = shalt.err (!%p2909_p0)
}
 0x1f0   :  { %2549 = dma.vmem_to_hbm [thread:$0]  %s2544_s30, 1536, %s5059_s3, [#allocation4], %s2932_s18, %s2932_s18, %s2933_s19  }
 0x1f1   :  { %2927 = dma.done.wait [#allocation4], 1536  }
 0x1f2   :  { %2928 = vsyncadd [#allocation4], 4294965760 }
 0x1f3   :  { %2929 = dma.done.wait [#allocation11], 4608  }
 0x1f4   :  { %2930 = vsyncadd [#allocation11], 4294962688 }
 0x1f5   :  { %2568 = vsyncpa [#allocation3], 1 }
 0x1f6   :  { %2569 = vsyncpa [#allocation4], 1 }
 0x1f7   :  { %2570 = vsyncpa [#allocation11], 1 }
 0x1f8   :  { %2571 = vsyncpa [#allocation5], 1 }
 0x1f9   :  { %2572 = vsyncpa [#allocation8], 1 }

</bundles_post_ra>
